<compile_context>
chip_gen: v6e
topology: v6e:2x2x1
jax: 0.10.0
libtpu: 0.0.40
codegen_flags: <defaults>
</compile_context>

<pallas_src>
import functools
import math

import jax
import jax.numpy as jnp
from jax import lax
from jax.experimental import pallas as pl
from jax.experimental.pallas import tpu as pltpu


def _round_up(x, m):
    return -(-x // m) * m


def _conv_kernel(x_ref, w_ref, b_ref, o_ref, acc_ref, p_ref=None, *,
                 kh_dim, kw_dim, wp, cin_p, stride, negative_slope):
    """One batch element of ReflectionPad + Conv2d (pad done in the wrapper).

    x_ref  : (1, stride, cin_p, Lg_pad)  row-parity-split flat padded input
    w_ref  : (KH, Cout, KW*cin_p)        per-kh weight slabs, columns ordered (kw, ci)
    b_ref  : (Cout, 1)
    o_ref  : (1, Cout, L)                L = Ho_s * Wp   (lane-dense flat output)
    acc_ref: (Cout, L) f32 accumulator scratch
    p_ref  : (2, KW*cin_p, L) double-buffered sub-patch scratch (None => per-tap path)
    """
    L = acc_ref.shape[1]
    acc_ref[...] = jnp.zeros_like(acc_ref)

    for kh in range(kh_dim):
        parity = kh % stride          # which row-parity group holds this tap's rows
        rb = kh // stride             # starting row inside that group
        if p_ref is None:
            # Wide-Cin path: contraction (cin_p) is already MXU-sized; one matmul
            # per tap, no patch materialization at all.
            for kw in range(kw_dim):
                s = rb * wp + kw
                acc_ref[...] += jnp.dot(
                    w_ref[kh, :, kw * cin_p:(kw + 1) * cin_p],
                    x_ref[0, parity, :, s:s + L],
                    preferred_element_type=jnp.float32)
        else:
            # Per-kh path: build a (KW*cin_p, L) sub-patch (lane-shifted copies) in
            # the slot for this kh parity, then one MXU matmul. Alternating slots
            # lets the build of kh+1 overlap the matmul of kh.
            slot = kh % 2
            for kw in range(kw_dim):
                s = rb * wp + kw
                p_ref[slot, kw * cin_p:(kw + 1) * cin_p, :] = (
                    x_ref[0, parity, :, s:s + L].astype(p_ref.dtype))
            acc_ref[...] += jnp.dot(w_ref[kh], p_ref[slot],
                                    preferred_element_type=jnp.float32)

    out = acc_ref[...] + b_ref[...]            # (Cout, 1) broadcast over lanes
    if negative_slope is not None:             # optional fused LeakyReLU
        out = jnp.where(out >= 0, out, negative_slope * out)
    o_ref[0] = out.astype(o_ref.dtype)


def conv_norm_forward(x_nchw, weight_oihw, bias, kernel_size, stride=1,
                      negative_slope=None, compute_dtype=jnp.float32):
    """ConvNorm.forward (norm=False): ReflectionPad2d(k//2) + Conv2d(bias=True).

    x_nchw:      (N, Cin, H, W)
    weight_oihw: (Cout, Cin, KH, KW)  (PyTorch layout)
    bias:        (Cout,)
    negative_slope: if not None, fuse LeakyReLU(negative_slope) into the kernel.
    compute_dtype:  jnp.float32 (exact) or jnp.bfloat16 (MXU-native, f32 accumulate).
    """
    assert kernel_size % 2 == 1, (
        "ReflectionPad2d(k//2) only reproduces 'same' conv for odd kernel_size")
    pad = kernel_size // 2
    N, Cin, H, W = x_nchw.shape
    Cout, _, KH, KW = weight_oihw.shape
    assert KH == KW == kernel_size
    assert H > pad and W > pad, "ReflectionPad2d requires pad < spatial size"

    cdt = jnp.dtype(compute_dtype)
    out_dtype = x_nchw.dtype

    # Pad channels to a sublane multiple (16 for bf16 packing, else 8); padded
    # channels carry zero weights so the result is unchanged.
    cmult = 16 if cdt == jnp.dtype(jnp.bfloat16) else 8
    cin_p = _round_up(Cin, cmult)
    if cin_p != Cin:
        x_nchw = jnp.pad(x_nchw, ((0, 0), (0, cin_p - Cin), (0, 0), (0, 0)))
        weight_oihw = jnp.pad(weight_oihw,
                              ((0, 0), (0, cin_p - Cin), (0, 0), (0, 0)))
    if cdt != x_nchw.dtype:
        x_nchw = x_nchw.astype(cdt)

    # Reflection pad (XLA glue; data stays NCHW — no transposes).
    x_pad = jnp.pad(x_nchw, ((0, 0), (0, 0), (pad, pad), (pad, pad)), mode="reflect")
    Hp, Wp = H + 2 * pad, W + 2 * pad

    # H-stride handled in-kernel: split padded rows into `stride` parity groups so
    # tap kh only needs a contiguous run of rows inside group (kh % stride),
    # starting at row (kh // stride).
    Hg = -(-Hp // stride)                       # rows per parity group (upper bound)
    Ho_s = (Hp - KH) // stride + 1              # strided output height (== PyTorch)
    Wo = Wp - KW + 1                            # stride-1 output width
    L = Ho_s * Wp                               # flat output length (padded width grid)
    # Flat group length: rounded to a lane multiple AND >= KW-1 columns of slack so
    # every tap slice s : s+L is in-bounds (fixes the previous OOB / clamped slice).
    Lg_pad = _round_up(Hg * Wp + (KW - 1), 128)

    groups = []
    for p in range(stride):
        g = x_pad[:, :, p::stride, :].reshape(N, cin_p, -1)
        g = jnp.pad(g, ((0, 0), (0, 0), (0, Lg_pad - g.shape[-1])))
        groups.append(g)
    x_groups = jnp.stack(groups, axis=1)        # (N, stride, cin_p, Lg_pad)

    # Weight -> (KH, Cout, KW*cin_p), columns ordered (kw, ci) to match the patch.
    w3d = jnp.transpose(weight_oihw, (2, 0, 3, 1)).reshape(KH, Cout, KW * cin_p)
    w3d = w3d.astype(cdt)
    b2 = bias.reshape(Cout, 1).astype(jnp.float32)

    per_tap = cin_p >= 128     # wide Cin: skip the patch scratch entirely

    kernel = functools.partial(
        _conv_kernel, kh_dim=KH, kw_dim=KW, wp=Wp, cin_p=cin_p, stride=stride,
        negative_slope=negative_slope)

    scratch_shapes = [pltpu.VMEM((Cout, L), jnp.float32)]         # f32 accumulator
    if not per_tap:
        scratch_shapes.append(pltpu.VMEM((2, KW * cin_p, L), cdt))  # dbl-buf sub-patch

    # Scheduler hint + explicit VMEM budget (generous slack; floor at the default).
    csize = cdt.itemsize
    flops = 2 * N * Cout * KH * KW * cin_p * L
    bytes_accessed = (x_groups.size * csize + w3d.size * csize
                      + b2.size * 4 + N * Cout * L * 4)
    cost = pl.CostEstimate(flops=flops, transcendentals=0,
                           bytes_accessed=bytes_accessed)
    Lr = _round_up(L, 128)
    est = (2 * stride * cin_p * Lg_pad * csize
           + 2 * KH * Cout * _round_up(KW * cin_p, 128) * csize
           + 2 * Cout * 128 * 4
           + 2 * Cout * Lr * 4
           + Cout * Lr * 4
           + (0 if per_tap else 2 * KW * cin_p * Lr * csize))
    vmem_limit = int(min(max(2 * est + (8 << 20), 32 << 20), 100 << 20))

    out_flat = pl.pallas_call(
        kernel,
        out_shape=jax.ShapeDtypeStruct((N, Cout, L), out_dtype),
        grid_spec=pltpu.PrefetchScalarGridSpec(
            num_scalar_prefetch=0,
            grid=(N,),
            in_specs=[
                pl.BlockSpec((1, stride, cin_p, Lg_pad), lambda n: (n, 0, 0, 0)),
                pl.BlockSpec((KH, Cout, KW * cin_p), lambda n: (0, 0, 0)),
                pl.BlockSpec((Cout, 1), lambda n: (0, 0)),
            ],
            out_specs=pl.BlockSpec((1, Cout, L), lambda n: (n, 0, 0)),
            scratch_shapes=scratch_shapes,
        ),
        compiler_params=pltpu.CompilerParams(
            dimension_semantics=("parallel",),
            vmem_limit_bytes=vmem_limit),
        cost_estimate=cost,
    )(x_groups, w3d, b2)

    # (N, Cout, Ho_s*Wp) -> (N, Cout, Ho_s, Wp) is metadata-only; drop the KW-1
    # garbage columns per row and apply the W stride.
    out = out_flat.reshape(N, Cout, Ho_s, Wp)[:, :, :, 0:Wo:stride]
    return out


def encoder_body_forward(x, params, compute_dtype=jnp.float32):
    """Encoder.body (norm=False): ConvNorm(3,nf,7,s1)+LReLU(0.2) ->
    ConvNorm(nf,2nf,5,s2)+LReLU -> ConvNorm(2nf,4nf,5,s2)+LReLU -> ConvNorm(4nf,6nf,5,s2)."""
    (w1, b1), (w2, b2), (w3, b3), (w4, b4) = params
    y = conv_norm_forward(x, w1, b1, 7, 1, negative_slope=0.2, compute_dtype=compute_dtype)
    y = conv_norm_forward(y, w2, b2, 5, 2, negative_slope=0.2, compute_dtype=compute_dtype)
    y = conv_norm_forward(y, w3, b3, 5, 2, negative_slope=0.2, compute_dtype=compute_dtype)
    y = conv_norm_forward(y, w4, b4, 5, 2, negative_slope=None, compute_dtype=compute_dtype)
    return y


def _reference(x, w, b, kernel_size, stride=1, negative_slope=None):
    pad = kernel_size // 2
    xp = jnp.pad(x, ((0, 0), (0, 0), (pad, pad), (pad, pad)), mode="reflect")
    out = lax.conv_general_dilated(
        xp, w, window_strides=(stride, stride), padding="VALID",
        dimension_numbers=("NCHW", "OIHW", "NCHW"))
    out = out + b.reshape(1, -1, 1, 1)
    if negative_slope is not None:
        out = jnp.where(out >= 0, out, negative_slope * out)
    return out


def _reference_body(x, params):
    (w1, b1), (w2, b2), (w3, b3), (w4, b4) = params
    y = _reference(x, w1, b1, 7, 1, negative_slope=0.2)
    y = _reference(y, w2, b2, 5, 2, negative_slope=0.2)
    y = _reference(y, w3, b3, 5, 2, negative_slope=0.2)
    y = _reference(y, w4, b4, 5, 2)
    return y


if __name__ == "__main__":
    key = jax.random.PRNGKey(0)

    def init_conv(k, cin, cout, ks):
        kw_, kb_ = jax.random.split(k)
        bound = 1.0 / math.sqrt(cin * ks * ks)
        w = jax.random.uniform(kw_, (cout, cin, ks, ks), jnp.float32, -bound, bound)
        b = jax.random.uniform(kb_, (cout,), jnp.float32, -bound, bound)
        return w, b

    def rel_err(y, r):
        return float(jnp.max(jnp.abs(y - r)) / (jnp.max(jnp.abs(r)) + 1e-8))

    keys = jax.random.split(key, 8)
    N, H, W = 2, 16, 16

    # 1) ConvNorm(3, 32, kernel_size=7, stride=1), norm=False  (Encoder.body[0]), f32
    x1 = jax.random.normal(keys[0], (N, 3, H, W), jnp.float32)
    w1, b1 = init_conv(keys[1], 3, 32, 7)
    y1 = jax.jit(functools.partial(conv_norm_forward, kernel_size=7, stride=1))(x1, w1, b1)
    jax.block_until_ready(y1)
    r1 = _reference(x1, w1, b1, 7, 1)
    assert y1.shape == (N, 32, H, W), y1.shape
    assert rel_err(y1, r1) < 3e-2, f"case1 rel err {rel_err(y1, r1)}"

    # 2) ConvNorm(8, 16, kernel_size=5, stride=2) + fused LeakyReLU(0.2), bf16 compute
    x2 = jax.random.normal(keys[2], (N, 8, H, W), jnp.float32)
    w2, b2 = init_conv(keys[3], 8, 16, 5)
    y2 = jax.jit(functools.partial(conv_norm_forward, kernel_size=5, stride=2,
                                   negative_slope=0.2,
                                   compute_dtype=jnp.bfloat16))(x2, w2, b2)
    jax.block_until_ready(y2)
    r2 = _reference(x2, w2, b2, 5, 2, negative_slope=0.2)
    assert y2.shape == (N, 16, H // 2, W // 2), y2.shape
    assert rel_err(y2, r2) < 8e-2, f"case2 rel err {rel_err(y2, r2)}"

    # 3) Full Encoder.body: 3 -> 32 -> 64 -> 128 -> 192 at 16x16, f32
    cfg = [(3, 32, 7), (32, 64, 5), (64, 128, 5), (128, 192, 5)]
    params = [init_conv(keys[4 + i], ci, co, ks) for i, (ci, co, ks) in enumerate(cfg)]
    x3 = jax.random.normal(keys[0], (N, 3, H, W), jnp.float32)
    y3 = jax.jit(encoder_body_forward)(x3, params)
    jax.block_until_ready(y3)
    r3 = _reference_body(x3, params)
    assert y3.shape == (N, 192, 2, 2), y3.shape
    assert rel_err(y3, r3) < 8e-2, f"case3 rel err {rel_err(y3, r3)}"

    print("KERNEL_OK")
</pallas_src>

<mosaic_0001>
module attributes {stable_mosaic.version = 11 : i64} {
  func.func @_conv_kernel(%arg0: i32, %arg1: memref<1x1x8x512xf32, #tpu.memory_space<vmem>>, %arg2: memref<7x32x56xf32, #tpu.memory_space<vmem>>, %arg3: memref<32x1xf32, #tpu.memory_space<vmem>>, %arg4: memref<1x32x352xf32, #tpu.memory_space<vmem>>, %arg5: memref<32x352xf32, #tpu.memory_space<vmem>>, %arg6: memref<2x56x352xf32, #tpu.memory_space<vmem>>) attributes {dimension_semantics = [#tpu.dimension_semantics<parallel>], iteration_bounds = array<i64: 2>, scalar_prefetch = 0 : i64, scratch_operands = 2 : i64, tpu.core_type = #tpu.core_type<tc>, window_params = [{transform_indices = @transform_0, window_bounds = array<i64: 1, 1, 8, 512>}, {pipeline_mode = #tpu.pipeline_mode<synchronous>, transform_indices = @transform_1, window_bounds = array<i64: 7, 32, 56>}, {pipeline_mode = #tpu.pipeline_mode<synchronous>, transform_indices = @transform_2, window_bounds = array<i64: 32, 1>}, {transform_indices = @transform_3, window_bounds = array<i64: 1, 32, 352>}]} {
    %cst = arith.constant 0.000000e+00 : f32
    %0 = vector.broadcast %cst : f32 to vector<32x352xf32>
    %c0 = arith.constant 0 : index
    %c0_0 = arith.constant 0 : index
    %1 = vector.load %arg5[%c0, %c0_0] : memref<32x352xf32, #tpu.memory_space<vmem>>, vector<32x352xf32>
    tpu.vector_store %arg5[%c0, %c0_0], %0 {strides = array<i32>} : memref<32x352xf32, #tpu.memory_space<vmem>>, vector<32x352xf32>,
    %c0_1 = arith.constant 0 : index
    %c0_2 = arith.constant 0 : index
    %c0_3 = arith.constant 0 : index
    %c0_4 = arith.constant 0 : index
    %2 = vector.load %arg1[%c0_1, %c0_2, %c0_3, %c0_4] : memref<1x1x8x512xf32, #tpu.memory_space<vmem>>, vector<1x1x8x352xf32>
    %3 = vector.shape_cast %2 : vector<1x1x8x352xf32> to vector<8x352xf32>
    %c0_5 = arith.constant 0 : index
    %c0_6 = arith.constant 0 : index
    %c0_7 = arith.constant 0 : index
    %4 = vector.load %arg6[%c0_5, %c0_6, %c0_7] : memref<2x56x352xf32, #tpu.memory_space<vmem>>, vector<1x8x352xf32>
    %5 = vector.shape_cast %4 : vector<1x8x352xf32> to vector<8x352xf32>
    %6 = vector.shape_cast %3 : vector<8x352xf32> to vector<1x8x352xf32>
    tpu.vector_store %arg6[%c0_5, %c0_6, %c0_7], %6 {strides = array<i32>} : memref<2x56x352xf32, #tpu.memory_space<vmem>>, vector<1x8x352xf32>,
    %c0_8 = arith.constant 0 : index
    %c0_9 = arith.constant 0 : index
    %c0_10 = arith.constant 0 : index
    %c1 = arith.constant 1 : index
    %7 = vector.load %arg1[%c0_8, %c0_9, %c0_10, %c1] : memref<1x1x8x512xf32, #tpu.memory_space<vmem>>, vector<1x1x8x352xf32>
    %8 = vector.shape_cast %7 : vector<1x1x8x352xf32> to vector<8x352xf32>
    %c0_11 = arith.constant 0 : index
    %c8 = arith.constant 8 : index
    %c0_12 = arith.constant 0 : index
    %9 = vector.load %arg6[%c0_11, %c8, %c0_12] : memref<2x56x352xf32, #tpu.memory_space<vmem>>, vector<1x8x352xf32>
    %10 = vector.shape_cast %9 : vector<1x8x352xf32> to vector<8x352xf32>
    %11 = vector.shape_cast %8 : vector<8x352xf32> to vector<1x8x352xf32>
    tpu.vector_store %arg6[%c0_11, %c8, %c0_12], %11 {strides = array<i32>} : memref<2x56x352xf32, #tpu.memory_space<vmem>>, vector<1x8x352xf32>,
    %c0_13 = arith.constant 0 : index
    %c0_14 = arith.constant 0 : index
    %c0_15 = arith.constant 0 : index
    %c2 = arith.constant 2 : index
    %12 = vector.load %arg1[%c0_13, %c0_14, %c0_15, %c2] : memref<1x1x8x512xf32, #tpu.memory_space<vmem>>, vector<1x1x8x352xf32>
    %13 = vector.shape_cast %12 : vector<1x1x8x352xf32> to vector<8x352xf32>
    %c0_16 = arith.constant 0 : index
    %c16 = arith.constant 16 : index
    %c0_17 = arith.constant 0 : index
    %14 = vector.load %arg6[%c0_16, %c16, %c0_17] : memref<2x56x352xf32, #tpu.memory_space<vmem>>, vector<1x8x352xf32>
    %15 = vector.shape_cast %14 : vector<1x8x352xf32> to vector<8x352xf32>
    %16 = vector.shape_cast %13 : vector<8x352xf32> to vector<1x8x352xf32>
    tpu.vector_store %arg6[%c0_16, %c16, %c0_17], %16 {strides = array<i32>} : memref<2x56x352xf32, #tpu.memory_space<vmem>>, vector<1x8x352xf32>,
    %c0_18 = arith.constant 0 : index
    %c0_19 = arith.constant 0 : index
    %c0_20 = arith.constant 0 : index
    %c3 = arith.constant 3 : index
    %17 = vector.load %arg1[%c0_18, %c0_19, %c0_20, %c3] : memref<1x1x8x512xf32, #tpu.memory_space<vmem>>, vector<1x1x8x352xf32>
    %18 = vector.shape_cast %17 : vector<1x1x8x352xf32> to vector<8x352xf32>
    %c0_21 = arith.constant 0 : index
    %c24 = arith.constant 24 : index
    %c0_22 = arith.constant 0 : index
    %19 = vector.load %arg6[%c0_21, %c24, %c0_22] : memref<2x56x352xf32, #tpu.memory_space<vmem>>, vector<1x8x352xf32>
    %20 = vector.shape_cast %19 : vector<1x8x352xf32> to vector<8x352xf32>
    %21 = vector.shape_cast %18 : vector<8x352xf32> to vector<1x8x352xf32>
    tpu.vector_store %arg6[%c0_21, %c24, %c0_22], %21 {strides = array<i32>} : memref<2x56x352xf32, #tpu.memory_space<vmem>>, vector<1x8x352xf32>,
    %c0_23 = arith.constant 0 : index
    %c0_24 = arith.constant 0 : index
    %c0_25 = arith.constant 0 : index
    %c4 = arith.constant 4 : index
    %22 = vector.load %arg1[%c0_23, %c0_24, %c0_25, %c4] : memref<1x1x8x512xf32, #tpu.memory_space<vmem>>, vector<1x1x8x352xf32>
    %23 = vector.shape_cast %22 : vector<1x1x8x352xf32> to vector<8x352xf32>
    %c0_26 = arith.constant 0 : index
    %c32 = arith.constant 32 : index
    %c0_27 = arith.constant 0 : index
    %24 = vector.load %arg6[%c0_26, %c32, %c0_27] : memref<2x56x352xf32, #tpu.memory_space<vmem>>, vector<1x8x352xf32>
    %25 = vector.shape_cast %24 : vector<1x8x352xf32> to vector<8x352xf32>
    %26 = vector.shape_cast %23 : vector<8x352xf32> to vector<1x8x352xf32>
    tpu.vector_store %arg6[%c0_26, %c32, %c0_27], %26 {strides = array<i32>} : memref<2x56x352xf32, #tpu.memory_space<vmem>>, vector<1x8x352xf32>,
    %c0_28 = arith.constant 0 : index
    %c0_29 = arith.constant 0 : index
    %c0_30 = arith.constant 0 : index
    %c5 = arith.constant 5 : index
    %27 = vector.load %arg1[%c0_28, %c0_29, %c0_30, %c5] : memref<1x1x8x512xf32, #tpu.memory_space<vmem>>, vector<1x1x8x352xf32>
    %28 = vector.shape_cast %27 : vector<1x1x8x352xf32> to vector<8x352xf32>
    %c0_31 = arith.constant 0 : index
    %c40 = arith.constant 40 : index
    %c0_32 = arith.constant 0 : index
    %29 = vector.load %arg6[%c0_31, %c40, %c0_32] : memref<2x56x352xf32, #tpu.memory_space<vmem>>, vector<1x8x352xf32>
    %30 = vector.shape_cast %29 : vector<1x8x352xf32> to vector<8x352xf32>
    %31 = vector.shape_cast %28 : vector<8x352xf32> to vector<1x8x352xf32>
    tpu.vector_store %arg6[%c0_31, %c40, %c0_32], %31 {strides = array<i32>} : memref<2x56x352xf32, #tpu.memory_space<vmem>>, vector<1x8x352xf32>,
    %c0_33 = arith.constant 0 : index
    %c0_34 = arith.constant 0 : index
    %c0_35 = arith.constant 0 : index
    %c6 = arith.constant 6 : index
    %32 = vector.load %arg1[%c0_33, %c0_34, %c0_35, %c6] : memref<1x1x8x512xf32, #tpu.memory_space<vmem>>, vector<1x1x8x352xf32>
    %33 = vector.shape_cast %32 : vector<1x1x8x352xf32> to vector<8x352xf32>
    %c0_36 = arith.constant 0 : index
    %c48 = arith.constant 48 : index
    %c0_37 = arith.constant 0 : index
    %34 = vector.load %arg6[%c0_36, %c48, %c0_37] : memref<2x56x352xf32, #tpu.memory_space<vmem>>, vector<1x8x352xf32>
    %35 = vector.shape_cast %34 : vector<1x8x352xf32> to vector<8x352xf32>
    %36 = vector.shape_cast %33 : vector<8x352xf32> to vector<1x8x352xf32>
    tpu.vector_store %arg6[%c0_36, %c48, %c0_37], %36 {strides = array<i32>} : memref<2x56x352xf32, #tpu.memory_space<vmem>>, vector<1x8x352xf32>,
    %c0_38 = arith.constant 0 : index
    %c0_39 = arith.constant 0 : index
    %37 = vector.load %arg5[%c0_38, %c0_39] : memref<32x352xf32, #tpu.memory_space<vmem>>, vector<32x352xf32>
    %c0_40 = arith.constant 0 : index
    %c0_41 = arith.constant 0 : index
    %c0_42 = arith.constant 0 : index
    %38 = vector.load %arg2[%c0_40, %c0_41, %c0_42] : memref<7x32x56xf32, #tpu.memory_space<vmem>>, vector<1x32x56xf32>
    %39 = vector.shape_cast %38 : vector<1x32x56xf32> to vector<32x56xf32>
    %c0_43 = arith.constant 0 : index
    %c0_44 = arith.constant 0 : index
    %c0_45 = arith.constant 0 : index
    %40 = vector.load %arg6[%c0_43, %c0_44, %c0_45] : memref<2x56x352xf32, #tpu.memory_space<vmem>>, vector<1x56x352xf32>
    %41 = vector.shape_cast %40 : vector<1x56x352xf32> to vector<56x352xf32>
    %cst_46 = arith.constant dense<0.000000e+00> : vector<32x352xf32>
    %42 = tpu.matmul %39, %41, %cst_46 {dimension_numbers = #tpu.dot_dimension_numbers<[1], [0], [0], [1], [0, 0, 1, 1], [], []>} : vector<32x56xf32>, vector<56x352xf32>, vector<32x352xf32> -> vector<32x352xf32>
    %43 = arith.addf %37, %42 : vector<32x352xf32>
    %c0_47 = arith.constant 0 : index
    %c0_48 = arith.constant 0 : index
    %44 = vector.load %arg5[%c0_47, %c0_48] : memref<32x352xf32, #tpu.memory_space<vmem>>, vector<32x352xf32>
    tpu.vector_store %arg5[%c0_47, %c0_48], %43 {strides = array<i32>} : memref<32x352xf32, #tpu.memory_space<vmem>>, vector<32x352xf32>,
    %c0_49 = arith.constant 0 : index
    %c0_50 = arith.constant 0 : index
    %c0_51 = arith.constant 0 : index
    %c22 = arith.constant 22 : index
    %45 = vector.load %arg1[%c0_49, %c0_50, %c0_51, %c22] : memref<1x1x8x512xf32, #tpu.memory_space<vmem>>, vector<1x1x8x352xf32>
    %46 = vector.shape_cast %45 : vector<1x1x8x352xf32> to vector<8x352xf32>
    %c1_52 = arith.constant 1 : index
    %c0_53 = arith.constant 0 : index
    %c0_54 = arith.constant 0 : index
    %47 = vector.load %arg6[%c1_52, %c0_53, %c0_54] : memref<2x56x352xf32, #tpu.memory_space<vmem>>, vector<1x8x352xf32>
    %48 = vector.shape_cast %47 : vector<1x8x352xf32> to vector<8x352xf32>
    %49 = vector.shape_cast %46 : vector<8x352xf32> to vector<1x8x352xf32>
    tpu.vector_store %arg6[%c1_52, %c0_53, %c0_54], %49 {strides = array<i32>} : memref<2x56x352xf32, #tpu.memory_space<vmem>>, vector<1x8x352xf32>,
    %c0_55 = arith.constant 0 : index
    %c0_56 = arith.constant 0 : index
    %c0_57 = arith.constant 0 : index
    %c23 = arith.constant 23 : index
    %50 = vector.load %arg1[%c0_55, %c0_56, %c0_57, %c23] : memref<1x1x8x512xf32, #tpu.memory_space<vmem>>, vector<1x1x8x352xf32>
    %51 = vector.shape_cast %50 : vector<1x1x8x352xf32> to vector<8x352xf32>
    %c1_58 = arith.constant 1 : index
    %c8_59 = arith.constant 8 : index
    %c0_60 = arith.constant 0 : index
    %52 = vector.load %arg6[%c1_58, %c8_59, %c0_60] : memref<2x56x352xf32, #tpu.memory_space<vmem>>, vector<1x8x352xf32>
    %53 = vector.shape_cast %52 : vector<1x8x352xf32> to vector<8x352xf32>
    %54 = vector.shape_cast %51 : vector<8x352xf32> to vector<1x8x352xf32>
    tpu.vector_store %arg6[%c1_58, %c8_59, %c0_60], %54 {strides = array<i32>} : memref<2x56x352xf32, #tpu.memory_space<vmem>>, vector<1x8x352xf32>,
    %c0_61 = arith.constant 0 : index
    %c0_62 = arith.constant 0 : index
    %c0_63 = arith.constant 0 : index
    %c24_64 = arith.constant 24 : index
    %55 = vector.load %arg1[%c0_61, %c0_62, %c0_63, %c24_64] : memref<1x1x8x512xf32, #tpu.memory_space<vmem>>, vector<1x1x8x352xf32>
    %56 = vector.shape_cast %55 : vector<1x1x8x352xf32> to vector<8x352xf32>
    %c1_65 = arith.constant 1 : index
    %c16_66 = arith.constant 16 : index
    %c0_67 = arith.constant 0 : index
    %57 = vector.load %arg6[%c1_65, %c16_66, %c0_67] : memref<2x56x352xf32, #tpu.memory_space<vmem>>, vector<1x8x352xf32>
    %58 = vector.shape_cast %57 : vector<1x8x352xf32> to vector<8x352xf32>
    %59 = vector.shape_cast %56 : vector<8x352xf32> to vector<1x8x352xf32>
    tpu.vector_store %arg6[%c1_65, %c16_66, %c0_67], %59 {strides = array<i32>} : memref<2x56x352xf32, #tpu.memory_space<vmem>>, vector<1x8x352xf32>,
    %c0_68 = arith.constant 0 : index
    %c0_69 = arith.constant 0 : index
    %c0_70 = arith.constant 0 : index
    %c25 = arith.constant 25 : index
    %60 = vector.load %arg1[%c0_68, %c0_69, %c0_70, %c25] : memref<1x1x8x512xf32, #tpu.memory_space<vmem>>, vector<1x1x8x352xf32>
    %61 = vector.shape_cast %60 : vector<1x1x8x352xf32> to vector<8x352xf32>
    %c1_71 = arith.constant 1 : index
    %c24_72 = arith.constant 24 : index
    %c0_73 = arith.constant 0 : index
    %62 = vector.load %arg6[%c1_71, %c24_72, %c0_73] : memref<2x56x352xf32, #tpu.memory_space<vmem>>, vector<1x8x352xf32>
    %63 = vector.shape_cast %62 : vector<1x8x352xf32> to vector<8x352xf32>
    %64 = vector.shape_cast %61 : vector<8x352xf32> to vector<1x8x352xf32>
    tpu.vector_store %arg6[%c1_71, %c24_72, %c0_73], %64 {strides = array<i32>} : memref<2x56x352xf32, #tpu.memory_space<vmem>>, vector<1x8x352xf32>,
    %c0_74 = arith.constant 0 : index
    %c0_75 = arith.constant 0 : index
    %c0_76 = arith.constant 0 : index
    %c26 = arith.constant 26 : index
    %65 = vector.load %arg1[%c0_74, %c0_75, %c0_76, %c26] : memref<1x1x8x512xf32, #tpu.memory_space<vmem>>, vector<1x1x8x352xf32>
    %66 = vector.shape_cast %65 : vector<1x1x8x352xf32> to vector<8x352xf32>
    %c1_77 = arith.constant 1 : index
    %c32_78 = arith.constant 32 : index
    %c0_79 = arith.constant 0 : index
    %67 = vector.load %arg6[%c1_77, %c32_78, %c0_79] : memref<2x56x352xf32, #tpu.memory_space<vmem>>, vector<1x8x352xf32>
    %68 = vector.shape_cast %67 : vector<1x8x352xf32> to vector<8x352xf32>
    %69 = vector.shape_cast %66 : vector<8x352xf32> to vector<1x8x352xf32>
    tpu.vector_store %arg6[%c1_77, %c32_78, %c0_79], %69 {strides = array<i32>} : memref<2x56x352xf32, #tpu.memory_space<vmem>>, vector<1x8x352xf32>,
    %c0_80 = arith.constant 0 : index
    %c0_81 = arith.constant 0 : index
    %c0_82 = arith.constant 0 : index
    %c27 = arith.constant 27 : index
    %70 = vector.load %arg1[%c0_80, %c0_81, %c0_82, %c27] : memref<1x1x8x512xf32, #tpu.memory_space<vmem>>, vector<1x1x8x352xf32>
    %71 = vector.shape_cast %70 : vector<1x1x8x352xf32> to vector<8x352xf32>
    %c1_83 = arith.constant 1 : index
    %c40_84 = arith.constant 40 : index
    %c0_85 = arith.constant 0 : index
    %72 = vector.load %arg6[%c1_83, %c40_84, %c0_85] : memref<2x56x352xf32, #tpu.memory_space<vmem>>, vector<1x8x352xf32>
    %73 = vector.shape_cast %72 : vector<1x8x352xf32> to vector<8x352xf32>
    %74 = vector.shape_cast %71 : vector<8x352xf32> to vector<1x8x352xf32>
    tpu.vector_store %arg6[%c1_83, %c40_84, %c0_85], %74 {strides = array<i32>} : memref<2x56x352xf32, #tpu.memory_space<vmem>>, vector<1x8x352xf32>,
    %c0_86 = arith.constant 0 : index
    %c0_87 = arith.constant 0 : index
    %c0_88 = arith.constant 0 : index
    %c28 = arith.constant 28 : index
    %75 = vector.load %arg1[%c0_86, %c0_87, %c0_88, %c28] : memref<1x1x8x512xf32, #tpu.memory_space<vmem>>, vector<1x1x8x352xf32>
    %76 = vector.shape_cast %75 : vector<1x1x8x352xf32> to vector<8x352xf32>
    %c1_89 = arith.constant 1 : index
    %c48_90 = arith.constant 48 : index
    %c0_91 = arith.constant 0 : index
    %77 = vector.load %arg6[%c1_89, %c48_90, %c0_91] : memref<2x56x352xf32, #tpu.memory_space<vmem>>, vector<1x8x352xf32>
    %78 = vector.shape_cast %77 : vector<1x8x352xf32> to vector<8x352xf32>
    %79 = vector.shape_cast %76 : vector<8x352xf32> to vector<1x8x352xf32>
    tpu.vector_store %arg6[%c1_89, %c48_90, %c0_91], %79 {strides = array<i32>} : memref<2x56x352xf32, #tpu.memory_space<vmem>>, vector<1x8x352xf32>,
    %c0_92 = arith.constant 0 : index
    %c0_93 = arith.constant 0 : index
    %80 = vector.load %arg5[%c0_92, %c0_93] : memref<32x352xf32, #tpu.memory_space<vmem>>, vector<32x352xf32>
    %c1_94 = arith.constant 1 : index
    %c0_95 = arith.constant 0 : index
    %c0_96 = arith.constant 0 : index
    %81 = vector.load %arg2[%c1_94, %c0_95, %c0_96] : memref<7x32x56xf32, #tpu.memory_space<vmem>>, vector<1x32x56xf32>
    %82 = vector.shape_cast %81 : vector<1x32x56xf32> to vector<32x56xf32>
    %c1_97 = arith.constant 1 : index
    %c0_98 = arith.constant 0 : index
    %c0_99 = arith.constant 0 : index
    %83 = vector.load %arg6[%c1_97, %c0_98, %c0_99] : memref<2x56x352xf32, #tpu.memory_space<vmem>>, vector<1x56x352xf32>
    %84 = vector.shape_cast %83 : vector<1x56x352xf32> to vector<56x352xf32>
    %cst_100 = arith.constant dense<0.000000e+00> : vector<32x352xf32>
    %85 = tpu.matmul %82, %84, %cst_100 {dimension_numbers = #tpu.dot_dimension_numbers<[1], [0], [0], [1], [0, 0, 1, 1], [], []>} : vector<32x56xf32>, vector<56x352xf32>, vector<32x352xf32> -> vector<32x352xf32>
    %86 = arith.addf %80, %85 : vector<32x352xf32>
    %c0_101 = arith.constant 0 : index
    %c0_102 = arith.constant 0 : index
    %87 = vector.load %arg5[%c0_101, %c0_102] : memref<32x352xf32, #tpu.memory_space<vmem>>, vector<32x352xf32>
    tpu.vector_store %arg5[%c0_101, %c0_102], %86 {strides = array<i32>} : memref<32x352xf32, #tpu.memory_space<vmem>>, vector<32x352xf32>,
    %c0_103 = arith.constant 0 : index
    %c0_104 = arith.constant 0 : index
    %c0_105 = arith.constant 0 : index
    %c44 = arith.constant 44 : index
    %88 = vector.load %arg1[%c0_103, %c0_104, %c0_105, %c44] : memref<1x1x8x512xf32, #tpu.memory_space<vmem>>, vector<1x1x8x352xf32>
    %89 = vector.shape_cast %88 : vector<1x1x8x352xf32> to vector<8x352xf32>
    %c0_106 = arith.constant 0 : index
    %c0_107 = arith.constant 0 : index
    %c0_108 = arith.constant 0 : index
    %90 = vector.load %arg6[%c0_106, %c0_107, %c0_108] : memref<2x56x352xf32, #tpu.memory_space<vmem>>, vector<1x8x352xf32>
    %91 = vector.shape_cast %90 : vector<1x8x352xf32> to vector<8x352xf32>
    %92 = vector.shape_cast %89 : vector<8x352xf32> to vector<1x8x352xf32>
    tpu.vector_store %arg6[%c0_106, %c0_107, %c0_108], %92 {strides = array<i32>} : memref<2x56x352xf32, #tpu.memory_space<vmem>>, vector<1x8x352xf32>,
    %c0_109 = arith.constant 0 : index
    %c0_110 = arith.constant 0 : index
    %c0_111 = arith.constant 0 : index
    %c45 = arith.constant 45 : index
    %93 = vector.load %arg1[%c0_109, %c0_110, %c0_111, %c45] : memref<1x1x8x512xf32, #tpu.memory_space<vmem>>, vector<1x1x8x352xf32>
    %94 = vector.shape_cast %93 : vector<1x1x8x352xf32> to vector<8x352xf32>
    %c0_112 = arith.constant 0 : index
    %c8_113 = arith.constant 8 : index
    %c0_114 = arith.constant 0 : index
    %95 = vector.load %arg6[%c0_112, %c8_113, %c0_114] : memref<2x56x352xf32, #tpu.memory_space<vmem>>, vector<1x8x352xf32>
    %96 = vector.shape_cast %95 : vector<1x8x352xf32> to vector<8x352xf32>
    %97 = vector.shape_cast %94 : vector<8x352xf32> to vector<1x8x352xf32>
    tpu.vector_store %arg6[%c0_112, %c8_113, %c0_114], %97 {strides = array<i32>} : memref<2x56x352xf32, #tpu.memory_space<vmem>>, vector<1x8x352xf32>,
    %c0_115 = arith.constant 0 : index
    %c0_116 = arith.constant 0 : index
    %c0_117 = arith.constant 0 : index
    %c46 = arith.constant 46 : index
    %98 = vector.load %arg1[%c0_115, %c0_116, %c0_117, %c46] : memref<1x1x8x512xf32, #tpu.memory_space<vmem>>, vector<1x1x8x352xf32>
    %99 = vector.shape_cast %98 : vector<1x1x8x352xf32> to vector<8x352xf32>
    %c0_118 = arith.constant 0 : index
    %c16_119 = arith.constant 16 : index
    %c0_120 = arith.constant 0 : index
    %100 = vector.load %arg6[%c0_118, %c16_119, %c0_120] : memref<2x56x352xf32, #tpu.memory_space<vmem>>, vector<1x8x352xf32>
    %101 = vector.shape_cast %100 : vector<1x8x352xf32> to vector<8x352xf32>
    %102 = vector.shape_cast %99 : vector<8x352xf32> to vector<1x8x352xf32>
    tpu.vector_store %arg6[%c0_118, %c16_119, %c0_120], %102 {strides = array<i32>} : memref<2x56x352xf32, #tpu.memory_space<vmem>>, vector<1x8x352xf32>,
    %c0_121 = arith.constant 0 : index
    %c0_122 = arith.constant 0 : index
    %c0_123 = arith.constant 0 : index
    %c47 = arith.constant 47 : index
    %103 = vector.load %arg1[%c0_121, %c0_122, %c0_123, %c47] : memref<1x1x8x512xf32, #tpu.memory_space<vmem>>, vector<1x1x8x352xf32>
    %104 = vector.shape_cast %103 : vector<1x1x8x352xf32> to vector<8x352xf32>
    %c0_124 = arith.constant 0 : index
    %c24_125 = arith.constant 24 : index
    %c0_126 = arith.constant 0 : index
    %105 = vector.load %arg6[%c0_124, %c24_125, %c0_126] : memref<2x56x352xf32, #tpu.memory_space<vmem>>, vector<1x8x352xf32>
    %106 = vector.shape_cast %105 : vector<1x8x352xf32> to vector<8x352xf32>
    %107 = vector.shape_cast %104 : vector<8x352xf32> to vector<1x8x352xf32>
    tpu.vector_store %arg6[%c0_124, %c24_125, %c0_126], %107 {strides = array<i32>} : memref<2x56x352xf32, #tpu.memory_space<vmem>>, vector<1x8x352xf32>,
    %c0_127 = arith.constant 0 : index
    %c0_128 = arith.constant 0 : index
    %c0_129 = arith.constant 0 : index
    %c48_130 = arith.constant 48 : index
    %108 = vector.load %arg1[%c0_127, %c0_128, %c0_129, %c48_130] : memref<1x1x8x512xf32, #tpu.memory_space<vmem>>, vector<1x1x8x352xf32>
    %109 = vector.shape_cast %108 : vector<1x1x8x352xf32> to vector<8x352xf32>
    %c0_131 = arith.constant 0 : index
    %c32_132 = arith.constant 32 : index
    %c0_133 = arith.constant 0 : index
    %110 = vector.load %arg6[%c0_131, %c32_132, %c0_133] : memref<2x56x352xf32, #tpu.memory_space<vmem>>, vector<1x8x352xf32>
    %111 = vector.shape_cast %110 : vector<1x8x352xf32> to vector<8x352xf32>
    %112 = vector.shape_cast %109 : vector<8x352xf32> to vector<1x8x352xf32>
    tpu.vector_store %arg6[%c0_131, %c32_132, %c0_133], %112 {strides = array<i32>} : memref<2x56x352xf32, #tpu.memory_space<vmem>>, vector<1x8x352xf32>,
    %c0_134 = arith.constant 0 : index
    %c0_135 = arith.constant 0 : index
    %c0_136 = arith.constant 0 : index
    %c49 = arith.constant 49 : index
    %113 = vector.load %arg1[%c0_134, %c0_135, %c0_136, %c49] : memref<1x1x8x512xf32, #tpu.memory_space<vmem>>, vector<1x1x8x352xf32>
    %114 = vector.shape_cast %113 : vector<1x1x8x352xf32> to vector<8x352xf32>
    %c0_137 = arith.constant 0 : index
    %c40_138 = arith.constant 40 : index
    %c0_139 = arith.constant 0 : index
    %115 = vector.load %arg6[%c0_137, %c40_138, %c0_139] : memref<2x56x352xf32, #tpu.memory_space<vmem>>, vector<1x8x352xf32>
    %116 = vector.shape_cast %115 : vector<1x8x352xf32> to vector<8x352xf32>
    %117 = vector.shape_cast %114 : vector<8x352xf32> to vector<1x8x352xf32>
    tpu.vector_store %arg6[%c0_137, %c40_138, %c0_139], %117 {strides = array<i32>} : memref<2x56x352xf32, #tpu.memory_space<vmem>>, vector<1x8x352xf32>,
    %c0_140 = arith.constant 0 : index
    %c0_141 = arith.constant 0 : index
    %c0_142 = arith.constant 0 : index
    %c50 = arith.constant 50 : index
    %118 = vector.load %arg1[%c0_140, %c0_141, %c0_142, %c50] : memref<1x1x8x512xf32, #tpu.memory_space<vmem>>, vector<1x1x8x352xf32>
    %119 = vector.shape_cast %118 : vector<1x1x8x352xf32> to vector<8x352xf32>
    %c0_143 = arith.constant 0 : index
    %c48_144 = arith.constant 48 : index
    %c0_145 = arith.constant 0 : index
    %120 = vector.load %arg6[%c0_143, %c48_144, %c0_145] : memref<2x56x352xf32, #tpu.memory_space<vmem>>, vector<1x8x352xf32>
    %121 = vector.shape_cast %120 : vector<1x8x352xf32> to vector<8x352xf32>
    %122 = vector.shape_cast %119 : vector<8x352xf32> to vector<1x8x352xf32>
    tpu.vector_store %arg6[%c0_143, %c48_144, %c0_145], %122 {strides = array<i32>} : memref<2x56x352xf32, #tpu.memory_space<vmem>>, vector<1x8x352xf32>,
    %c0_146 = arith.constant 0 : index
    %c0_147 = arith.constant 0 : index
    %123 = vector.load %arg5[%c0_146, %c0_147] : memref<32x352xf32, #tpu.memory_space<vmem>>, vector<32x352xf32>
    %c2_148 = arith.constant 2 : index
    %c0_149 = arith.constant 0 : index
    %c0_150 = arith.constant 0 : index
    %124 = vector.load %arg2[%c2_148, %c0_149, %c0_150] : memref<7x32x56xf32, #tpu.memory_space<vmem>>, vector<1x32x56xf32>
    %125 = vector.shape_cast %124 : vector<1x32x56xf32> to vector<32x56xf32>
    %c0_151 = arith.constant 0 : index
    %c0_152 = arith.constant 0 : index
    %c0_153 = arith.constant 0 : index
    %126 = vector.load %arg6[%c0_151, %c0_152, %c0_153] : memref<2x56x352xf32, #tpu.memory_space<vmem>>, vector<1x56x352xf32>
    %127 = vector.shape_cast %126 : vector<1x56x352xf32> to vector<56x352xf32>
    %cst_154 = arith.constant dense<0.000000e+00> : vector<32x352xf32>
    %128 = tpu.matmul %125, %127, %cst_154 {dimension_numbers = #tpu.dot_dimension_numbers<[1], [0], [0], [1], [0, 0, 1, 1], [], []>} : vector<32x56xf32>, vector<56x352xf32>, vector<32x352xf32> -> vector<32x352xf32>
    %129 = arith.addf %123, %128 : vector<32x352xf32>
    %c0_155 = arith.constant 0 : index
    %c0_156 = arith.constant 0 : index
    %130 = vector.load %arg5[%c0_155, %c0_156] : memref<32x352xf32, #tpu.memory_space<vmem>>, vector<32x352xf32>
    tpu.vector_store %arg5[%c0_155, %c0_156], %129 {strides = array<i32>} : memref<32x352xf32, #tpu.memory_space<vmem>>, vector<32x352xf32>,
    %c0_157 = arith.constant 0 : index
    %c0_158 = arith.constant 0 : index
    %c0_159 = arith.constant 0 : index
    %c66 = arith.constant 66 : index
    %131 = vector.load %arg1[%c0_157, %c0_158, %c0_159, %c66] : memref<1x1x8x512xf32, #tpu.memory_space<vmem>>, vector<1x1x8x352xf32>
    %132 = vector.shape_cast %131 : vector<1x1x8x352xf32> to vector<8x352xf32>
    %c1_160 = arith.constant 1 : index
    %c0_161 = arith.constant 0 : index
    %c0_162 = arith.constant 0 : index
    %133 = vector.load %arg6[%c1_160, %c0_161, %c0_162] : memref<2x56x352xf32, #tpu.memory_space<vmem>>, vector<1x8x352xf32>
    %134 = vector.shape_cast %133 : vector<1x8x352xf32> to vector<8x352xf32>
    %135 = vector.shape_cast %132 : vector<8x352xf32> to vector<1x8x352xf32>
    tpu.vector_store %arg6[%c1_160, %c0_161, %c0_162], %135 {strides = array<i32>} : memref<2x56x352xf32, #tpu.memory_space<vmem>>, vector<1x8x352xf32>,
    %c0_163 = arith.constant 0 : index
    %c0_164 = arith.constant 0 : index
    %c0_165 = arith.constant 0 : index
    %c67 = arith.constant 67 : index
    %136 = vector.load %arg1[%c0_163, %c0_164, %c0_165, %c67] : memref<1x1x8x512xf32, #tpu.memory_space<vmem>>, vector<1x1x8x352xf32>
    %137 = vector.shape_cast %136 : vector<1x1x8x352xf32> to vector<8x352xf32>
    %c1_166 = arith.constant 1 : index
    %c8_167 = arith.constant 8 : index
    %c0_168 = arith.constant 0 : index
    %138 = vector.load %arg6[%c1_166, %c8_167, %c0_168] : memref<2x56x352xf32, #tpu.memory_space<vmem>>, vector<1x8x352xf32>
    %139 = vector.shape_cast %138 : vector<1x8x352xf32> to vector<8x352xf32>
    %140 = vector.shape_cast %137 : vector<8x352xf32> to vector<1x8x352xf32>
    tpu.vector_store %arg6[%c1_166, %c8_167, %c0_168], %140 {strides = array<i32>} : memref<2x56x352xf32, #tpu.memory_space<vmem>>, vector<1x8x352xf32>,
    %c0_169 = arith.constant 0 : index
    %c0_170 = arith.constant 0 : index
    %c0_171 = arith.constant 0 : index
    %c68 = arith.constant 68 : index
    %141 = vector.load %arg1[%c0_169, %c0_170, %c0_171, %c68] : memref<1x1x8x512xf32, #tpu.memory_space<vmem>>, vector<1x1x8x352xf32>
    %142 = vector.shape_cast %141 : vector<1x1x8x352xf32> to vector<8x352xf32>
    %c1_172 = arith.constant 1 : index
    %c16_173 = arith.constant 16 : index
    %c0_174 = arith.constant 0 : index
    %143 = vector.load %arg6[%c1_172, %c16_173, %c0_174] : memref<2x56x352xf32, #tpu.memory_space<vmem>>, vector<1x8x352xf32>
    %144 = vector.shape_cast %143 : vector<1x8x352xf32> to vector<8x352xf32>
    %145 = vector.shape_cast %142 : vector<8x352xf32> to vector<1x8x352xf32>
    tpu.vector_store %arg6[%c1_172, %c16_173, %c0_174], %145 {strides = array<i32>} : memref<2x56x352xf32, #tpu.memory_space<vmem>>, vector<1x8x352xf32>,
    %c0_175 = arith.constant 0 : index
    %c0_176 = arith.constant 0 : index
    %c0_177 = arith.constant 0 : index
    %c69 = arith.constant 69 : index
    %146 = vector.load %arg1[%c0_175, %c0_176, %c0_177, %c69] : memref<1x1x8x512xf32, #tpu.memory_space<vmem>>, vector<1x1x8x352xf32>
    %147 = vector.shape_cast %146 : vector<1x1x8x352xf32> to vector<8x352xf32>
    %c1_178 = arith.constant 1 : index
    %c24_179 = arith.constant 24 : index
    %c0_180 = arith.constant 0 : index
    %148 = vector.load %arg6[%c1_178, %c24_179, %c0_180] : memref<2x56x352xf32, #tpu.memory_space<vmem>>, vector<1x8x352xf32>
    %149 = vector.shape_cast %148 : vector<1x8x352xf32> to vector<8x352xf32>
    %150 = vector.shape_cast %147 : vector<8x352xf32> to vector<1x8x352xf32>
    tpu.vector_store %arg6[%c1_178, %c24_179, %c0_180], %150 {strides = array<i32>} : memref<2x56x352xf32, #tpu.memory_space<vmem>>, vector<1x8x352xf32>,
    %c0_181 = arith.constant 0 : index
    %c0_182 = arith.constant 0 : index
    %c0_183 = arith.constant 0 : index
    %c70 = arith.constant 70 : index
    %151 = vector.load %arg1[%c0_181, %c0_182, %c0_183, %c70] : memref<1x1x8x512xf32, #tpu.memory_space<vmem>>, vector<1x1x8x352xf32>
    %152 = vector.shape_cast %151 : vector<1x1x8x352xf32> to vector<8x352xf32>
    %c1_184 = arith.constant 1 : index
    %c32_185 = arith.constant 32 : index
    %c0_186 = arith.constant 0 : index
    %153 = vector.load %arg6[%c1_184, %c32_185, %c0_186] : memref<2x56x352xf32, #tpu.memory_space<vmem>>, vector<1x8x352xf32>
    %154 = vector.shape_cast %153 : vector<1x8x352xf32> to vector<8x352xf32>
    %155 = vector.shape_cast %152 : vector<8x352xf32> to vector<1x8x352xf32>
    tpu.vector_store %arg6[%c1_184, %c32_185, %c0_186], %155 {strides = array<i32>} : memref<2x56x352xf32, #tpu.memory_space<vmem>>, vector<1x8x352xf32>,
    %c0_187 = arith.constant 0 : index
    %c0_188 = arith.constant 0 : index
    %c0_189 = arith.constant 0 : index
    %c71 = arith.constant 71 : index
    %156 = vector.load %arg1[%c0_187, %c0_188, %c0_189, %c71] : memref<1x1x8x512xf32, #tpu.memory_space<vmem>>, vector<1x1x8x352xf32>
    %157 = vector.shape_cast %156 : vector<1x1x8x352xf32> to vector<8x352xf32>
    %c1_190 = arith.constant 1 : index
    %c40_191 = arith.constant 40 : index
    %c0_192 = arith.constant 0 : index
    %158 = vector.load %arg6[%c1_190, %c40_191, %c0_192] : memref<2x56x352xf32, #tpu.memory_space<vmem>>, vector<1x8x352xf32>
    %159 = vector.shape_cast %158 : vector<1x8x352xf32> to vector<8x352xf32>
    %160 = vector.shape_cast %157 : vector<8x352xf32> to vector<1x8x352xf32>
    tpu.vector_store %arg6[%c1_190, %c40_191, %c0_192], %160 {strides = array<i32>} : memref<2x56x352xf32, #tpu.memory_space<vmem>>, vector<1x8x352xf32>,
    %c0_193 = arith.constant 0 : index
    %c0_194 = arith.constant 0 : index
    %c0_195 = arith.constant 0 : index
    %c72 = arith.constant 72 : index
    %161 = vector.load %arg1[%c0_193, %c0_194, %c0_195, %c72] : memref<1x1x8x512xf32, #tpu.memory_space<vmem>>, vector<1x1x8x352xf32>
    %162 = vector.shape_cast %161 : vector<1x1x8x352xf32> to vector<8x352xf32>
    %c1_196 = arith.constant 1 : index
    %c48_197 = arith.constant 48 : index
    %c0_198 = arith.constant 0 : index
    %163 = vector.load %arg6[%c1_196, %c48_197, %c0_198] : memref<2x56x352xf32, #tpu.memory_space<vmem>>, vector<1x8x352xf32>
    %164 = vector.shape_cast %163 : vector<1x8x352xf32> to vector<8x352xf32>
    %165 = vector.shape_cast %162 : vector<8x352xf32> to vector<1x8x352xf32>
    tpu.vector_store %arg6[%c1_196, %c48_197, %c0_198], %165 {strides = array<i32>} : memref<2x56x352xf32, #tpu.memory_space<vmem>>, vector<1x8x352xf32>,
    %c0_199 = arith.constant 0 : index
    %c0_200 = arith.constant 0 : index
    %166 = vector.load %arg5[%c0_199, %c0_200] : memref<32x352xf32, #tpu.memory_space<vmem>>, vector<32x352xf32>
    %c3_201 = arith.constant 3 : index
    %c0_202 = arith.constant 0 : index
    %c0_203 = arith.constant 0 : index
    %167 = vector.load %arg2[%c3_201, %c0_202, %c0_203] : memref<7x32x56xf32, #tpu.memory_space<vmem>>, vector<1x32x56xf32>
    %168 = vector.shape_cast %167 : vector<1x32x56xf32> to vector<32x56xf32>
    %c1_204 = arith.constant 1 : index
    %c0_205 = arith.constant 0 : index
    %c0_206 = arith.constant 0 : index
    %169 = vector.load %arg6[%c1_204, %c0_205, %c0_206] : memref<2x56x352xf32, #tpu.memory_space<vmem>>, vector<1x56x352xf32>
    %170 = vector.shape_cast %169 : vector<1x56x352xf32> to vector<56x352xf32>
    %cst_207 = arith.constant dense<0.000000e+00> : vector<32x352xf32>
    %171 = tpu.matmul %168, %170, %cst_207 {dimension_numbers = #tpu.dot_dimension_numbers<[1], [0], [0], [1], [0, 0, 1, 1], [], []>} : vector<32x56xf32>, vector<56x352xf32>, vector<32x352xf32> -> vector<32x352xf32>
    %172 = arith.addf %166, %171 : vector<32x352xf32>
    %c0_208 = arith.constant 0 : index
    %c0_209 = arith.constant 0 : index
    %173 = vector.load %arg5[%c0_208, %c0_209] : memref<32x352xf32, #tpu.memory_space<vmem>>, vector<32x352xf32>
    tpu.vector_store %arg5[%c0_208, %c0_209], %172 {strides = array<i32>} : memref<32x352xf32, #tpu.memory_space<vmem>>, vector<32x352xf32>,
    %c0_210 = arith.constant 0 : index
    %c0_211 = arith.constant 0 : index
    %c0_212 = arith.constant 0 : index
    %c88 = arith.constant 88 : index
    %174 = vector.load %arg1[%c0_210, %c0_211, %c0_212, %c88] : memref<1x1x8x512xf32, #tpu.memory_space<vmem>>, vector<1x1x8x352xf32>
    %175 = vector.shape_cast %174 : vector<1x1x8x352xf32> to vector<8x352xf32>
    %c0_213 = arith.constant 0 : index
    %c0_214 = arith.constant 0 : index
    %c0_215 = arith.constant 0 : index
    %176 = vector.load %arg6[%c0_213, %c0_214, %c0_215] : memref<2x56x352xf32, #tpu.memory_space<vmem>>, vector<1x8x352xf32>
    %177 = vector.shape_cast %176 : vector<1x8x352xf32> to vector<8x352xf32>
    %178 = vector.shape_cast %175 : vector<8x352xf32> to vector<1x8x352xf32>
    tpu.vector_store %arg6[%c0_213, %c0_214, %c0_215], %178 {strides = array<i32>} : memref<2x56x352xf32, #tpu.memory_space<vmem>>, vector<1x8x352xf32>,
    %c0_216 = arith.constant 0 : index
    %c0_217 = arith.constant 0 : index
    %c0_218 = arith.constant 0 : index
    %c89 = arith.constant 89 : index
    %179 = vector.load %arg1[%c0_216, %c0_217, %c0_218, %c89] : memref<1x1x8x512xf32, #tpu.memory_space<vmem>>, vector<1x1x8x352xf32>
    %180 = vector.shape_cast %179 : vector<1x1x8x352xf32> to vector<8x352xf32>
    %c0_219 = arith.constant 0 : index
    %c8_220 = arith.constant 8 : index
    %c0_221 = arith.constant 0 : index
    %181 = vector.load %arg6[%c0_219, %c8_220, %c0_221] : memref<2x56x352xf32, #tpu.memory_space<vmem>>, vector<1x8x352xf32>
    %182 = vector.shape_cast %181 : vector<1x8x352xf32> to vector<8x352xf32>
    %183 = vector.shape_cast %180 : vector<8x352xf32> to vector<1x8x352xf32>
    tpu.vector_store %arg6[%c0_219, %c8_220, %c0_221], %183 {strides = array<i32>} : memref<2x56x352xf32, #tpu.memory_space<vmem>>, vector<1x8x352xf32>,
    %c0_222 = arith.constant 0 : index
    %c0_223 = arith.constant 0 : index
    %c0_224 = arith.constant 0 : index
    %c90 = arith.constant 90 : index
    %184 = vector.load %arg1[%c0_222, %c0_223, %c0_224, %c90] : memref<1x1x8x512xf32, #tpu.memory_space<vmem>>, vector<1x1x8x352xf32>
    %185 = vector.shape_cast %184 : vector<1x1x8x352xf32> to vector<8x352xf32>
    %c0_225 = arith.constant 0 : index
    %c16_226 = arith.constant 16 : index
    %c0_227 = arith.constant 0 : index
    %186 = vector.load %arg6[%c0_225, %c16_226, %c0_227] : memref<2x56x352xf32, #tpu.memory_space<vmem>>, vector<1x8x352xf32>
    %187 = vector.shape_cast %186 : vector<1x8x352xf32> to vector<8x352xf32>
    %188 = vector.shape_cast %185 : vector<8x352xf32> to vector<1x8x352xf32>
    tpu.vector_store %arg6[%c0_225, %c16_226, %c0_227], %188 {strides = array<i32>} : memref<2x56x352xf32, #tpu.memory_space<vmem>>, vector<1x8x352xf32>,
    %c0_228 = arith.constant 0 : index
    %c0_229 = arith.constant 0 : index
    %c0_230 = arith.constant 0 : index
    %c91 = arith.constant 91 : index
    %189 = vector.load %arg1[%c0_228, %c0_229, %c0_230, %c91] : memref<1x1x8x512xf32, #tpu.memory_space<vmem>>, vector<1x1x8x352xf32>
    %190 = vector.shape_cast %189 : vector<1x1x8x352xf32> to vector<8x352xf32>
    %c0_231 = arith.constant 0 : index
    %c24_232 = arith.constant 24 : index
    %c0_233 = arith.constant 0 : index
    %191 = vector.load %arg6[%c0_231, %c24_232, %c0_233] : memref<2x56x352xf32, #tpu.memory_space<vmem>>, vector<1x8x352xf32>
    %192 = vector.shape_cast %191 : vector<1x8x352xf32> to vector<8x352xf32>
    %193 = vector.shape_cast %190 : vector<8x352xf32> to vector<1x8x352xf32>
    tpu.vector_store %arg6[%c0_231, %c24_232, %c0_233], %193 {strides = array<i32>} : memref<2x56x352xf32, #tpu.memory_space<vmem>>, vector<1x8x352xf32>,
    %c0_234 = arith.constant 0 : index
    %c0_235 = arith.constant 0 : index
    %c0_236 = arith.constant 0 : index
    %c92 = arith.constant 92 : index
    %194 = vector.load %arg1[%c0_234, %c0_235, %c0_236, %c92] : memref<1x1x8x512xf32, #tpu.memory_space<vmem>>, vector<1x1x8x352xf32>
    %195 = vector.shape_cast %194 : vector<1x1x8x352xf32> to vector<8x352xf32>
    %c0_237 = arith.constant 0 : index
    %c32_238 = arith.constant 32 : index
    %c0_239 = arith.constant 0 : index
    %196 = vector.load %arg6[%c0_237, %c32_238, %c0_239] : memref<2x56x352xf32, #tpu.memory_space<vmem>>, vector<1x8x352xf32>
    %197 = vector.shape_cast %196 : vector<1x8x352xf32> to vector<8x352xf32>
    %198 = vector.shape_cast %195 : vector<8x352xf32> to vector<1x8x352xf32>
    tpu.vector_store %arg6[%c0_237, %c32_238, %c0_239], %198 {strides = array<i32>} : memref<2x56x352xf32, #tpu.memory_space<vmem>>, vector<1x8x352xf32>,
    %c0_240 = arith.constant 0 : index
    %c0_241 = arith.constant 0 : index
    %c0_242 = arith.constant 0 : index
    %c93 = arith.constant 93 : index
    %199 = vector.load %arg1[%c0_240, %c0_241, %c0_242, %c93] : memref<1x1x8x512xf32, #tpu.memory_space<vmem>>, vector<1x1x8x352xf32>
    %200 = vector.shape_cast %199 : vector<1x1x8x352xf32> to vector<8x352xf32>
    %c0_243 = arith.constant 0 : index
    %c40_244 = arith.constant 40 : index
    %c0_245 = arith.constant 0 : index
    %201 = vector.load %arg6[%c0_243, %c40_244, %c0_245] : memref<2x56x352xf32, #tpu.memory_space<vmem>>, vector<1x8x352xf32>
    %202 = vector.shape_cast %201 : vector<1x8x352xf32> to vector<8x352xf32>
    %203 = vector.shape_cast %200 : vector<8x352xf32> to vector<1x8x352xf32>
    tpu.vector_store %arg6[%c0_243, %c40_244, %c0_245], %203 {strides = array<i32>} : memref<2x56x352xf32, #tpu.memory_space<vmem>>, vector<1x8x352xf32>,
    %c0_246 = arith.constant 0 : index
    %c0_247 = arith.constant 0 : index
    %c0_248 = arith.constant 0 : index
    %c94 = arith.constant 94 : index
    %204 = vector.load %arg1[%c0_246, %c0_247, %c0_248, %c94] : memref<1x1x8x512xf32, #tpu.memory_space<vmem>>, vector<1x1x8x352xf32>
    %205 = vector.shape_cast %204 : vector<1x1x8x352xf32> to vector<8x352xf32>
    %c0_249 = arith.constant 0 : index
    %c48_250 = arith.constant 48 : index
    %c0_251 = arith.constant 0 : index
    %206 = vector.load %arg6[%c0_249, %c48_250, %c0_251] : memref<2x56x352xf32, #tpu.memory_space<vmem>>, vector<1x8x352xf32>
    %207 = vector.shape_cast %206 : vector<1x8x352xf32> to vector<8x352xf32>
    %208 = vector.shape_cast %205 : vector<8x352xf32> to vector<1x8x352xf32>
    tpu.vector_store %arg6[%c0_249, %c48_250, %c0_251], %208 {strides = array<i32>} : memref<2x56x352xf32, #tpu.memory_space<vmem>>, vector<1x8x352xf32>,
    %c0_252 = arith.constant 0 : index
    %c0_253 = arith.constant 0 : index
    %209 = vector.load %arg5[%c0_252, %c0_253] : memref<32x352xf32, #tpu.memory_space<vmem>>, vector<32x352xf32>
    %c4_254 = arith.constant 4 : index
    %c0_255 = arith.constant 0 : index
    %c0_256 = arith.constant 0 : index
    %210 = vector.load %arg2[%c4_254, %c0_255, %c0_256] : memref<7x32x56xf32, #tpu.memory_space<vmem>>, vector<1x32x56xf32>
    %211 = vector.shape_cast %210 : vector<1x32x56xf32> to vector<32x56xf32>
    %c0_257 = arith.constant 0 : index
    %c0_258 = arith.constant 0 : index
    %c0_259 = arith.constant 0 : index
    %212 = vector.load %arg6[%c0_257, %c0_258, %c0_259] : memref<2x56x352xf32, #tpu.memory_space<vmem>>, vector<1x56x352xf32>
    %213 = vector.shape_cast %212 : vector<1x56x352xf32> to vector<56x352xf32>
    %cst_260 = arith.constant dense<0.000000e+00> : vector<32x352xf32>
    %214 = tpu.matmul %211, %213, %cst_260 {dimension_numbers = #tpu.dot_dimension_numbers<[1], [0], [0], [1], [0, 0, 1, 1], [], []>} : vector<32x56xf32>, vector<56x352xf32>, vector<32x352xf32> -> vector<32x352xf32>
    %215 = arith.addf %209, %214 : vector<32x352xf32>
    %c0_261 = arith.constant 0 : index
    %c0_262 = arith.constant 0 : index
    %216 = vector.load %arg5[%c0_261, %c0_262] : memref<32x352xf32, #tpu.memory_space<vmem>>, vector<32x352xf32>
    tpu.vector_store %arg5[%c0_261, %c0_262], %215 {strides = array<i32>} : memref<32x352xf32, #tpu.memory_space<vmem>>, vector<32x352xf32>,
    %c0_263 = arith.constant 0 : index
    %c0_264 = arith.constant 0 : index
    %c0_265 = arith.constant 0 : index
    %c110 = arith.constant 110 : index
    %217 = vector.load %arg1[%c0_263, %c0_264, %c0_265, %c110] : memref<1x1x8x512xf32, #tpu.memory_space<vmem>>, vector<1x1x8x352xf32>
    %218 = vector.shape_cast %217 : vector<1x1x8x352xf32> to vector<8x352xf32>
    %c1_266 = arith.constant 1 : index
    %c0_267 = arith.constant 0 : index
    %c0_268 = arith.constant 0 : index
    %219 = vector.load %arg6[%c1_266, %c0_267, %c0_268] : memref<2x56x352xf32, #tpu.memory_space<vmem>>, vector<1x8x352xf32>
    %220 = vector.shape_cast %219 : vector<1x8x352xf32> to vector<8x352xf32>
    %221 = vector.shape_cast %218 : vector<8x352xf32> to vector<1x8x352xf32>
    tpu.vector_store %arg6[%c1_266, %c0_267, %c0_268], %221 {strides = array<i32>} : memref<2x56x352xf32, #tpu.memory_space<vmem>>, vector<1x8x352xf32>,
    %c0_269 = arith.constant 0 : index
    %c0_270 = arith.constant 0 : index
    %c0_271 = arith.constant 0 : index
    %c111 = arith.constant 111 : index
    %222 = vector.load %arg1[%c0_269, %c0_270, %c0_271, %c111] : memref<1x1x8x512xf32, #tpu.memory_space<vmem>>, vector<1x1x8x352xf32>
    %223 = vector.shape_cast %222 : vector<1x1x8x352xf32> to vector<8x352xf32>
    %c1_272 = arith.constant 1 : index
    %c8_273 = arith.constant 8 : index
    %c0_274 = arith.constant 0 : index
    %224 = vector.load %arg6[%c1_272, %c8_273, %c0_274] : memref<2x56x352xf32, #tpu.memory_space<vmem>>, vector<1x8x352xf32>
    %225 = vector.shape_cast %224 : vector<1x8x352xf32> to vector<8x352xf32>
    %226 = vector.shape_cast %223 : vector<8x352xf32> to vector<1x8x352xf32>
    tpu.vector_store %arg6[%c1_272, %c8_273, %c0_274], %226 {strides = array<i32>} : memref<2x56x352xf32, #tpu.memory_space<vmem>>, vector<1x8x352xf32>,
    %c0_275 = arith.constant 0 : index
    %c0_276 = arith.constant 0 : index
    %c0_277 = arith.constant 0 : index
    %c112 = arith.constant 112 : index
    %227 = vector.load %arg1[%c0_275, %c0_276, %c0_277, %c112] : memref<1x1x8x512xf32, #tpu.memory_space<vmem>>, vector<1x1x8x352xf32>
    %228 = vector.shape_cast %227 : vector<1x1x8x352xf32> to vector<8x352xf32>
    %c1_278 = arith.constant 1 : index
    %c16_279 = arith.constant 16 : index
    %c0_280 = arith.constant 0 : index
    %229 = vector.load %arg6[%c1_278, %c16_279, %c0_280] : memref<2x56x352xf32, #tpu.memory_space<vmem>>, vector<1x8x352xf32>
    %230 = vector.shape_cast %229 : vector<1x8x352xf32> to vector<8x352xf32>
    %231 = vector.shape_cast %228 : vector<8x352xf32> to vector<1x8x352xf32>
    tpu.vector_store %arg6[%c1_278, %c16_279, %c0_280], %231 {strides = array<i32>} : memref<2x56x352xf32, #tpu.memory_space<vmem>>, vector<1x8x352xf32>,
    %c0_281 = arith.constant 0 : index
    %c0_282 = arith.constant 0 : index
    %c0_283 = arith.constant 0 : index
    %c113 = arith.constant 113 : index
    %232 = vector.load %arg1[%c0_281, %c0_282, %c0_283, %c113] : memref<1x1x8x512xf32, #tpu.memory_space<vmem>>, vector<1x1x8x352xf32>
    %233 = vector.shape_cast %232 : vector<1x1x8x352xf32> to vector<8x352xf32>
    %c1_284 = arith.constant 1 : index
    %c24_285 = arith.constant 24 : index
    %c0_286 = arith.constant 0 : index
    %234 = vector.load %arg6[%c1_284, %c24_285, %c0_286] : memref<2x56x352xf32, #tpu.memory_space<vmem>>, vector<1x8x352xf32>
    %235 = vector.shape_cast %234 : vector<1x8x352xf32> to vector<8x352xf32>
    %236 = vector.shape_cast %233 : vector<8x352xf32> to vector<1x8x352xf32>
    tpu.vector_store %arg6[%c1_284, %c24_285, %c0_286], %236 {strides = array<i32>} : memref<2x56x352xf32, #tpu.memory_space<vmem>>, vector<1x8x352xf32>,
    %c0_287 = arith.constant 0 : index
    %c0_288 = arith.constant 0 : index
    %c0_289 = arith.constant 0 : index
    %c114 = arith.constant 114 : index
    %237 = vector.load %arg1[%c0_287, %c0_288, %c0_289, %c114] : memref<1x1x8x512xf32, #tpu.memory_space<vmem>>, vector<1x1x8x352xf32>
    %238 = vector.shape_cast %237 : vector<1x1x8x352xf32> to vector<8x352xf32>
    %c1_290 = arith.constant 1 : index
    %c32_291 = arith.constant 32 : index
    %c0_292 = arith.constant 0 : index
    %239 = vector.load %arg6[%c1_290, %c32_291, %c0_292] : memref<2x56x352xf32, #tpu.memory_space<vmem>>, vector<1x8x352xf32>
    %240 = vector.shape_cast %239 : vector<1x8x352xf32> to vector<8x352xf32>
    %241 = vector.shape_cast %238 : vector<8x352xf32> to vector<1x8x352xf32>
    tpu.vector_store %arg6[%c1_290, %c32_291, %c0_292], %241 {strides = array<i32>} : memref<2x56x352xf32, #tpu.memory_space<vmem>>, vector<1x8x352xf32>,
    %c0_293 = arith.constant 0 : index
    %c0_294 = arith.constant 0 : index
    %c0_295 = arith.constant 0 : index
    %c115 = arith.constant 115 : index
    %242 = vector.load %arg1[%c0_293, %c0_294, %c0_295, %c115] : memref<1x1x8x512xf32, #tpu.memory_space<vmem>>, vector<1x1x8x352xf32>
    %243 = vector.shape_cast %242 : vector<1x1x8x352xf32> to vector<8x352xf32>
    %c1_296 = arith.constant 1 : index
    %c40_297 = arith.constant 40 : index
    %c0_298 = arith.constant 0 : index
    %244 = vector.load %arg6[%c1_296, %c40_297, %c0_298] : memref<2x56x352xf32, #tpu.memory_space<vmem>>, vector<1x8x352xf32>
    %245 = vector.shape_cast %244 : vector<1x8x352xf32> to vector<8x352xf32>
    %246 = vector.shape_cast %243 : vector<8x352xf32> to vector<1x8x352xf32>
    tpu.vector_store %arg6[%c1_296, %c40_297, %c0_298], %246 {strides = array<i32>} : memref<2x56x352xf32, #tpu.memory_space<vmem>>, vector<1x8x352xf32>,
    %c0_299 = arith.constant 0 : index
    %c0_300 = arith.constant 0 : index
    %c0_301 = arith.constant 0 : index
    %c116 = arith.constant 116 : index
    %247 = vector.load %arg1[%c0_299, %c0_300, %c0_301, %c116] : memref<1x1x8x512xf32, #tpu.memory_space<vmem>>, vector<1x1x8x352xf32>
    %248 = vector.shape_cast %247 : vector<1x1x8x352xf32> to vector<8x352xf32>
    %c1_302 = arith.constant 1 : index
    %c48_303 = arith.constant 48 : index
    %c0_304 = arith.constant 0 : index
    %249 = vector.load %arg6[%c1_302, %c48_303, %c0_304] : memref<2x56x352xf32, #tpu.memory_space<vmem>>, vector<1x8x352xf32>
    %250 = vector.shape_cast %249 : vector<1x8x352xf32> to vector<8x352xf32>
    %251 = vector.shape_cast %248 : vector<8x352xf32> to vector<1x8x352xf32>
    tpu.vector_store %arg6[%c1_302, %c48_303, %c0_304], %251 {strides = array<i32>} : memref<2x56x352xf32, #tpu.memory_space<vmem>>, vector<1x8x352xf32>,
    %c0_305 = arith.constant 0 : index
    %c0_306 = arith.constant 0 : index
    %252 = vector.load %arg5[%c0_305, %c0_306] : memref<32x352xf32, #tpu.memory_space<vmem>>, vector<32x352xf32>
    %c5_307 = arith.constant 5 : index
    %c0_308 = arith.constant 0 : index
    %c0_309 = arith.constant 0 : index
    %253 = vector.load %arg2[%c5_307, %c0_308, %c0_309] : memref<7x32x56xf32, #tpu.memory_space<vmem>>, vector<1x32x56xf32>
    %254 = vector.shape_cast %253 : vector<1x32x56xf32> to vector<32x56xf32>
    %c1_310 = arith.constant 1 : index
    %c0_311 = arith.constant 0 : index
    %c0_312 = arith.constant 0 : index
    %255 = vector.load %arg6[%c1_310, %c0_311, %c0_312] : memref<2x56x352xf32, #tpu.memory_space<vmem>>, vector<1x56x352xf32>
    %256 = vector.shape_cast %255 : vector<1x56x352xf32> to vector<56x352xf32>
    %cst_313 = arith.constant dense<0.000000e+00> : vector<32x352xf32>
    %257 = tpu.matmul %254, %256, %cst_313 {dimension_numbers = #tpu.dot_dimension_numbers<[1], [0], [0], [1], [0, 0, 1, 1], [], []>} : vector<32x56xf32>, vector<56x352xf32>, vector<32x352xf32> -> vector<32x352xf32>
    %258 = arith.addf %252, %257 : vector<32x352xf32>
    %c0_314 = arith.constant 0 : index
    %c0_315 = arith.constant 0 : index
    %259 = vector.load %arg5[%c0_314, %c0_315] : memref<32x352xf32, #tpu.memory_space<vmem>>, vector<32x352xf32>
    tpu.vector_store %arg5[%c0_314, %c0_315], %258 {strides = array<i32>} : memref<32x352xf32, #tpu.memory_space<vmem>>, vector<32x352xf32>,
    %c0_316 = arith.constant 0 : index
    %c0_317 = arith.constant 0 : index
    %c0_318 = arith.constant 0 : index
    %c132 = arith.constant 132 : index
    %260 = vector.load %arg1[%c0_316, %c0_317, %c0_318, %c132] : memref<1x1x8x512xf32, #tpu.memory_space<vmem>>, vector<1x1x8x352xf32>
    %261 = vector.shape_cast %260 : vector<1x1x8x352xf32> to vector<8x352xf32>
    %c0_319 = arith.constant 0 : index
    %c0_320 = arith.constant 0 : index
    %c0_321 = arith.constant 0 : index
    %262 = vector.load %arg6[%c0_319, %c0_320, %c0_321] : memref<2x56x352xf32, #tpu.memory_space<vmem>>, vector<1x8x352xf32>
    %263 = vector.shape_cast %262 : vector<1x8x352xf32> to vector<8x352xf32>
    %264 = vector.shape_cast %261 : vector<8x352xf32> to vector<1x8x352xf32>
    tpu.vector_store %arg6[%c0_319, %c0_320, %c0_321], %264 {strides = array<i32>} : memref<2x56x352xf32, #tpu.memory_space<vmem>>, vector<1x8x352xf32>,
    %c0_322 = arith.constant 0 : index
    %c0_323 = arith.constant 0 : index
    %c0_324 = arith.constant 0 : index
    %c133 = arith.constant 133 : index
    %265 = vector.load %arg1[%c0_322, %c0_323, %c0_324, %c133] : memref<1x1x8x512xf32, #tpu.memory_space<vmem>>, vector<1x1x8x352xf32>
    %266 = vector.shape_cast %265 : vector<1x1x8x352xf32> to vector<8x352xf32>
    %c0_325 = arith.constant 0 : index
    %c8_326 = arith.constant 8 : index
    %c0_327 = arith.constant 0 : index
    %267 = vector.load %arg6[%c0_325, %c8_326, %c0_327] : memref<2x56x352xf32, #tpu.memory_space<vmem>>, vector<1x8x352xf32>
    %268 = vector.shape_cast %267 : vector<1x8x352xf32> to vector<8x352xf32>
    %269 = vector.shape_cast %266 : vector<8x352xf32> to vector<1x8x352xf32>
    tpu.vector_store %arg6[%c0_325, %c8_326, %c0_327], %269 {strides = array<i32>} : memref<2x56x352xf32, #tpu.memory_space<vmem>>, vector<1x8x352xf32>,
    %c0_328 = arith.constant 0 : index
    %c0_329 = arith.constant 0 : index
    %c0_330 = arith.constant 0 : index
    %c134 = arith.constant 134 : index
    %270 = vector.load %arg1[%c0_328, %c0_329, %c0_330, %c134] : memref<1x1x8x512xf32, #tpu.memory_space<vmem>>, vector<1x1x8x352xf32>
    %271 = vector.shape_cast %270 : vector<1x1x8x352xf32> to vector<8x352xf32>
    %c0_331 = arith.constant 0 : index
    %c16_332 = arith.constant 16 : index
    %c0_333 = arith.constant 0 : index
    %272 = vector.load %arg6[%c0_331, %c16_332, %c0_333] : memref<2x56x352xf32, #tpu.memory_space<vmem>>, vector<1x8x352xf32>
    %273 = vector.shape_cast %272 : vector<1x8x352xf32> to vector<8x352xf32>
    %274 = vector.shape_cast %271 : vector<8x352xf32> to vector<1x8x352xf32>
    tpu.vector_store %arg6[%c0_331, %c16_332, %c0_333], %274 {strides = array<i32>} : memref<2x56x352xf32, #tpu.memory_space<vmem>>, vector<1x8x352xf32>,
    %c0_334 = arith.constant 0 : index
    %c0_335 = arith.constant 0 : index
    %c0_336 = arith.constant 0 : index
    %c135 = arith.constant 135 : index
    %275 = vector.load %arg1[%c0_334, %c0_335, %c0_336, %c135] : memref<1x1x8x512xf32, #tpu.memory_space<vmem>>, vector<1x1x8x352xf32>
    %276 = vector.shape_cast %275 : vector<1x1x8x352xf32> to vector<8x352xf32>
    %c0_337 = arith.constant 0 : index
    %c24_338 = arith.constant 24 : index
    %c0_339 = arith.constant 0 : index
    %277 = vector.load %arg6[%c0_337, %c24_338, %c0_339] : memref<2x56x352xf32, #tpu.memory_space<vmem>>, vector<1x8x352xf32>
    %278 = vector.shape_cast %277 : vector<1x8x352xf32> to vector<8x352xf32>
    %279 = vector.shape_cast %276 : vector<8x352xf32> to vector<1x8x352xf32>
    tpu.vector_store %arg6[%c0_337, %c24_338, %c0_339], %279 {strides = array<i32>} : memref<2x56x352xf32, #tpu.memory_space<vmem>>, vector<1x8x352xf32>,
    %c0_340 = arith.constant 0 : index
    %c0_341 = arith.constant 0 : index
    %c0_342 = arith.constant 0 : index
    %c136 = arith.constant 136 : index
    %280 = vector.load %arg1[%c0_340, %c0_341, %c0_342, %c136] : memref<1x1x8x512xf32, #tpu.memory_space<vmem>>, vector<1x1x8x352xf32>
    %281 = vector.shape_cast %280 : vector<1x1x8x352xf32> to vector<8x352xf32>
    %c0_343 = arith.constant 0 : index
    %c32_344 = arith.constant 32 : index
    %c0_345 = arith.constant 0 : index
    %282 = vector.load %arg6[%c0_343, %c32_344, %c0_345] : memref<2x56x352xf32, #tpu.memory_space<vmem>>, vector<1x8x352xf32>
    %283 = vector.shape_cast %282 : vector<1x8x352xf32> to vector<8x352xf32>
    %284 = vector.shape_cast %281 : vector<8x352xf32> to vector<1x8x352xf32>
    tpu.vector_store %arg6[%c0_343, %c32_344, %c0_345], %284 {strides = array<i32>} : memref<2x56x352xf32, #tpu.memory_space<vmem>>, vector<1x8x352xf32>,
    %c0_346 = arith.constant 0 : index
    %c0_347 = arith.constant 0 : index
    %c0_348 = arith.constant 0 : index
    %c137 = arith.constant 137 : index
    %285 = vector.load %arg1[%c0_346, %c0_347, %c0_348, %c137] : memref<1x1x8x512xf32, #tpu.memory_space<vmem>>, vector<1x1x8x352xf32>
    %286 = vector.shape_cast %285 : vector<1x1x8x352xf32> to vector<8x352xf32>
    %c0_349 = arith.constant 0 : index
    %c40_350 = arith.constant 40 : index
    %c0_351 = arith.constant 0 : index
    %287 = vector.load %arg6[%c0_349, %c40_350, %c0_351] : memref<2x56x352xf32, #tpu.memory_space<vmem>>, vector<1x8x352xf32>
    %288 = vector.shape_cast %287 : vector<1x8x352xf32> to vector<8x352xf32>
    %289 = vector.shape_cast %286 : vector<8x352xf32> to vector<1x8x352xf32>
    tpu.vector_store %arg6[%c0_349, %c40_350, %c0_351], %289 {strides = array<i32>} : memref<2x56x352xf32, #tpu.memory_space<vmem>>, vector<1x8x352xf32>,
    %c0_352 = arith.constant 0 : index
    %c0_353 = arith.constant 0 : index
    %c0_354 = arith.constant 0 : index
    %c138 = arith.constant 138 : index
    %290 = vector.load %arg1[%c0_352, %c0_353, %c0_354, %c138] : memref<1x1x8x512xf32, #tpu.memory_space<vmem>>, vector<1x1x8x352xf32>
    %291 = vector.shape_cast %290 : vector<1x1x8x352xf32> to vector<8x352xf32>
    %c0_355 = arith.constant 0 : index
    %c48_356 = arith.constant 48 : index
    %c0_357 = arith.constant 0 : index
    %292 = vector.load %arg6[%c0_355, %c48_356, %c0_357] : memref<2x56x352xf32, #tpu.memory_space<vmem>>, vector<1x8x352xf32>
    %293 = vector.shape_cast %292 : vector<1x8x352xf32> to vector<8x352xf32>
    %294 = vector.shape_cast %291 : vector<8x352xf32> to vector<1x8x352xf32>
    tpu.vector_store %arg6[%c0_355, %c48_356, %c0_357], %294 {strides = array<i32>} : memref<2x56x352xf32, #tpu.memory_space<vmem>>, vector<1x8x352xf32>,
    %c0_358 = arith.constant 0 : index
    %c0_359 = arith.constant 0 : index
    %295 = vector.load %arg5[%c0_358, %c0_359] : memref<32x352xf32, #tpu.memory_space<vmem>>, vector<32x352xf32>
    %c6_360 = arith.constant 6 : index
    %c0_361 = arith.constant 0 : index
    %c0_362 = arith.constant 0 : index
    %296 = vector.load %arg2[%c6_360, %c0_361, %c0_362] : memref<7x32x56xf32, #tpu.memory_space<vmem>>, vector<1x32x56xf32>
    %297 = vector.shape_cast %296 : vector<1x32x56xf32> to vector<32x56xf32>
    %c0_363 = arith.constant 0 : index
    %c0_364 = arith.constant 0 : index
    %c0_365 = arith.constant 0 : index
    %298 = vector.load %arg6[%c0_363, %c0_364, %c0_365] : memref<2x56x352xf32, #tpu.memory_space<vmem>>, vector<1x56x352xf32>
    %299 = vector.shape_cast %298 : vector<1x56x352xf32> to vector<56x352xf32>
    %cst_366 = arith.constant dense<0.000000e+00> : vector<32x352xf32>
    %300 = tpu.matmul %297, %299, %cst_366 {dimension_numbers = #tpu.dot_dimension_numbers<[1], [0], [0], [1], [0, 0, 1, 1], [], []>} : vector<32x56xf32>, vector<56x352xf32>, vector<32x352xf32> -> vector<32x352xf32>
    %301 = arith.addf %295, %300 : vector<32x352xf32>
    %c0_367 = arith.constant 0 : index
    %c0_368 = arith.constant 0 : index
    %302 = vector.load %arg5[%c0_367, %c0_368] : memref<32x352xf32, #tpu.memory_space<vmem>>, vector<32x352xf32>
    tpu.vector_store %arg5[%c0_367, %c0_368], %301 {strides = array<i32>} : memref<32x352xf32, #tpu.memory_space<vmem>>, vector<32x352xf32>,
    %c0_369 = arith.constant 0 : index
    %c0_370 = arith.constant 0 : index
    %303 = vector.load %arg5[%c0_369, %c0_370] : memref<32x352xf32, #tpu.memory_space<vmem>>, vector<32x352xf32>
    %c0_371 = arith.constant 0 : index
    %c0_372 = arith.constant 0 : index
    %304 = vector.load %arg3[%c0_371, %c0_372] : memref<32x1xf32, #tpu.memory_space<vmem>>, vector<32x1xf32>
    %305 = vector.broadcast %304 : vector<32x1xf32> to vector<32x352xf32>
    %306 = arith.addf %303, %305 : vector<32x352xf32>
    %c0_373 = arith.constant 0 : index
    %c0_374 = arith.constant 0 : index
    %c0_375 = arith.constant 0 : index
    %307 = vector.load %arg4[%c0_373, %c0_374, %c0_375] : memref<1x32x352xf32, #tpu.memory_space<vmem>>, vector<1x32x352xf32>
    %308 = vector.shape_cast %307 : vector<1x32x352xf32> to vector<32x352xf32>
    %309 = vector.shape_cast %306 : vector<32x352xf32> to vector<1x32x352xf32>
    tpu.vector_store %arg4[%c0_373, %c0_374, %c0_375], %309 {strides = array<i32>} : memref<1x32x352xf32, #tpu.memory_space<vmem>>, vector<1x32x352xf32>,
    return
  }
  func.func @transform_0(%arg0: i32) -> (i32, i32, i32, i32) {
    %c0_i32 = arith.constant 0 : i32
    %c0_i32_0 = arith.constant 0 : i32
    %c0_i32_1 = arith.constant 0 : i32
    %c0_i32_2 = arith.constant 0 : i32
    return %arg0, %c0_i32, %c0_i32_0, %c0_i32_1 : i32, i32, i32, i32
  }
  func.func @transform_1(%arg0: i32) -> (i32, i32, i32) {
    %c0_i32 = arith.constant 0 : i32
    %c0_i32_0 = arith.constant 0 : i32
    %c0_i32_1 = arith.constant 0 : i32
    %c0_i32_2 = arith.constant 0 : i32
    return %c0_i32, %c0_i32_0, %c0_i32_1 : i32, i32, i32
  }
  func.func @transform_2(%arg0: i32) -> (i32, i32) {
    %c0_i32 = arith.constant 0 : i32
    %c0_i32_0 = arith.constant 0 : i32
    %c0_i32_1 = arith.constant 0 : i32
    return %c0_i32, %c0_i32_0 : i32, i32
  }
  func.func @transform_3(%arg0: i32) -> (i32, i32, i32) {
    %c0_i32 = arith.constant 0 : i32
    %c0_i32_0 = arith.constant 0 : i32
    %c0_i32_1 = arith.constant 0 : i32
    return %arg0, %c0_i32, %c0_i32_0 : i32, i32, i32
  }
}

</mosaic_0001>

<bundles_post_ra>
// kernel: conv_norm_forward.1
= control target key start
LH: loop header
LB: loop body
LE: loop exit
PB: predicated region body
PF: predicated region fallthrough
CT: control target
= control target key end

     0   :  { %s3627_s12 = smov 0   ;;  %s4492_s0 = inlined_call_operand.vmem [shape: f32[2,1,8,512], index: 0, kind: input, shape index: {}]   ;;  %s4493_s1 = inlined_call_operand.vmem [shape: f32[7,32,56], index: 1, kind: input, shape index: {}]   ;;  %s4494_s2 = inlined_call_operand.vmem [shape: f32[32,1], index: 2, kind: input, shape index: {}]   ;;  %s4495_s3 = inlined_call_operand.vmem [shape: f32[2,32,352], index: 3, kind: output, shape index: {}]  }
   0x1 LB: > { %s3186_s13 = sadd.s32 4294967295, %s3558_s12   ;;  %p3190_p0 = scmp.ge.s32.totalorder %s3558_s12, 1  ;;  %s3558_s12 = sphi %s3627_s12, %s13_s12  }
   0x2   : > { %p137_p1 = scmp.lt.s32.totalorder %s3558_s12, 3 }
   0x4   : > { %p138_p2 = pnand %p3190_p0, %p137_p1 }
   0x5   : > { %p161_p3 = scmp.lt.s32.totalorder (!%p138_p2), %s3186_s13, 1  ;;  %s3560_s18 = smov (!%p138_p2), 122  }
   0x6   : > { %141 = sbr.rel (%p138_p2) target bundleno = 692 (0x2b4), region = 32  ;;  %s3561_s19 = smov (!%p138_p2), 123  }
   0x7   : > { %s3562_s20 = smov (!%p138_p2), 124   ;;  %s3563_s21 = smov (!%p138_p2), 125  }
   0x8   : > { %s3564_s22 = smov (!%p138_p2), 126   ;;  %s3565_s23 = smov (!%p138_p2), 127  }
   0x9   : > { %s3567_s26 = smov (!%p138_p2), 100   ;;  %s3568_s27 = smov (!%p138_p2), 101  }
   0xa   : > { %s3569_s28 = smov (!%p138_p2), 102   ;;  %s3570_s29 = smov (!%p138_p2), 103  }
   0xb   : > { %s4497_s13 = smov (!%p161_p3, %s3186_s13), 1  ;;  %vm173_vm0 = vcmask 785408   ;;  %v3682_v3 = vld [vmem:[%s4493_s1] sm:$0xff]  ;;  %vm353_vm1 = vcmask 457728   ;;  %v3566_v4 = vmov 0.0   ;;  %s3571_s30 = smov 104  }
   0xc   : > { %s3276_s14 = sshll.u32 %s4497_s13, 5  ;;  %174 = vst.msk [vmem:[#allocation2 + $0x10] sm:$0xff] %vm173_vm0, %v3566_v4  ;;  %177 = vst.msk [vmem:[#allocation2 + $0x28] sm:$0xff] %vm173_vm0, %v3566_v4  ;;  %430 = vmatprep.mubr.f32.mxu0 %v3566_v4  ;;  %3368 = vmatprep.mubr.msk.f32.mxu1 %vm353_vm1, %v3682_v3  ;;  %s3572_s4 = smov 105   ;;  %vm307_vm2 = vcmask 998400   ;;  %vm286_vm3 = vcmask 1006592  }
   0xd   : > { %s3641_s17 = scalar_lea.vmem %s4492_s0, %s3276_s14  ;;  %180 = vst.msk [vmem:[#allocation2 + $0x40] sm:$0xff] %vm173_vm0, %v3566_v4  ;;  %183 = vst.msk [vmem:[#allocation2 + $0x58] sm:$0xff] %vm173_vm0, %v3566_v4  ;;  %s3573_s5 = smov 106   ;;  %vm265_vm4 = vcmask 1014784   ;;  %vm244_vm5 = vcmask 1022976   ;;  %vm223_vm6 = vcmask 1031168  }
   0xe   : > { %v3644_v0 = vld [vmem:[%s3641_s17 + $0x8] sm:$0xff]  ;;  %v3647_v1 = vld [vmem:[%s3641_s17] sm:$0xff]  ;;  %v3650_v2 = vld [vmem:[%s3641_s17 + $0x10] sm:$0xff]  ;;  %s3574_s6 = smov 78   ;;  %s3575_s7 = smov 79   ;;  %vm202_vm7 = vcmask 1039360  }
   0xf   : > { %303 = vrot.lane.b32.xlu0 %v3644_v0, %s3560_s18  ;;  %301 = vrot.lane.b32.xlu1 %v3647_v1, %s3560_s18  ;;  %189 = vst.msk [vmem:[#allocation3 + $0x10] sm:$0xff] %vm173_vm0, %v3650_v2  ;;  %s3576_s8 = smov 80   ;;  %v3728_v5 = vld [vmem:[%s3641_s17 + $0x18] sm:$0xff]  ;;  %s3577_s9 = smov 81   ;;  %vm703_vm8 = vcmask 818176   ;;  %v329_v47 = vld [vmem:[%s4493_s1 + $0x8] sm:$0xff] }
  0x10   : > { %s3578_s10 = smov 82   ;;  %s3579_s11 = smov 83   ;;  %vm682_vm9 = vcmask 826368   ;;  %vm661_vm10 = vcmask 834560   ;;  %v330_v59 = vld [vmem:[%s4493_s1 + $0x10] sm:$0xff]  ;;  %vm640_vm11 = vcmask 842752  }
  0x11   : > { %s3580_s14 = smov 84   ;;  %s3581_s15 = smov 56   ;;  %v331_v63 = vld [vmem:[%s4493_s1 + $0x18] sm:$0xff]  ;;  %vm619_vm12 = vcmask 850944   ;;  %vm598_vm13 = vcmask 859136   ;;  %vm1132_vm14 = vcmask 637952  }
  0x12   : > { %s3582_s16 = smov 57   ;;  %vm576_vm15 = vcmask 867328   ;;  %s3592_s25 = smov 38  }
  0x13   : > { %305 = vrot.lane.b32.xlu0 %v3650_v2, %s3560_s18  ;;  %282 = vrot.lane.b32.xlu1 %v3644_v0, %s3561_s19 }
  0x16   : > { %v334_v46 = vld [vmem:[#allocation3 + $0x10] sm:$0xff] }
  0x17   : > { %284 = vrot.lane.b32.xlu0 %v3650_v2, %s3561_s19  ;;  %280 = vrot.lane.b32.xlu1 %v3647_v1, %s3561_s19 }
  0x1b   : > { %263 = vrot.lane.b32.xlu1 %v3650_v2, %s3562_s20  ;;  %261 = vrot.lane.b32.xlu0 %v3644_v0, %s3562_s20 }
  0x1f   : > { %259 = vrot.lane.b32.xlu0 %v3647_v1, %s3562_s20  ;;  %240 = vrot.lane.b32.xlu1 %v3644_v0, %s3563_s21 }
  0x23   : > { %242 = vrot.lane.b32.xlu0 %v3650_v2, %s3563_s21  ;;  %238 = vrot.lane.b32.xlu1 %v3647_v1, %s3563_s21  ;;  %s3583_s21 = smov 58  }
  0x27   : > { %221 = vrot.lane.b32.xlu1 %v3650_v2, %s3564_s22  ;;  %219 = vrot.lane.b32.xlu0 %v3644_v0, %s3564_s22 }
  0x2b   : > { %217 = vrot.lane.b32.xlu0 %v3647_v1, %s3564_s22  ;;  %198 = vrot.lane.b32.xlu1 %v3644_v0, %s3565_s23  ;;  %s3584_s22 = smov 59  }
  0x2f   : > { %200 = vrot.lane.b32.xlu0 %v3650_v2, %s3565_s23  ;;  %196 = vrot.lane.b32.xlu1 %v3647_v1, %s3565_s23  ;;  %s3585_s23 = smov 60  }
  0x33   : > { %701 = vrot.lane.b32.xlu0 %v3650_v2, %s3567_s26  ;;  %680 = vrot.lane.b32.xlu1 %v3650_v2, %s3568_s27 }
  0x37   : > { %699 = vrot.lane.b32.xlu0 %v3644_v0, %s3567_s26  ;;  %659 = vrot.lane.b32.xlu1 %v3650_v2, %s3569_s28 }
  0x3b   : > { %697 = vrot.lane.b32.xlu0 %v3647_v1, %s3567_s26  ;;  %678 = vrot.lane.b32.xlu1 %v3644_v0, %s3568_s27  ;;  %s3593_s26 = smov 39  }
  0x3f   : > { %638 = vrot.lane.b32.xlu0 %v3650_v2, %s3570_s29  ;;  %676 = vrot.lane.b32.xlu1 %v3647_v1, %s3568_s27  ;;  %s3594_s27 = smov 40  }
  0x43   : > { %657 = vrot.lane.b32.xlu0 %v3644_v0, %s3569_s28  ;;  %617 = vrot.lane.b32.xlu1 %v3650_v2, %s3571_s30 }
  0x47   : > { %655 = vrot.lane.b32.xlu0 %v3647_v1, %s3569_s28  ;;  %636 = vrot.lane.b32.xlu1 %v3644_v0, %s3570_s29  ;;  %s3586_s28 = smov 61  }
  0x4b   : > { %596 = vrot.lane.b32.xlu0 %v3650_v2, %s3572_s4  ;;  %634 = vrot.lane.b32.xlu1 %v3647_v1, %s3570_s29  ;;  %s3605_s29 = smov 121  }
  0x4f   : > { %615 = vrot.lane.b32.xlu0 %v3644_v0, %s3571_s30  ;;  %574 = vrot.lane.b32.xlu1 %v3650_v2, %s3573_s5 }
  0x53   : > { %613 = vrot.lane.b32.xlu0 %v3647_v1, %s3571_s30  ;;  %594 = vrot.lane.b32.xlu1 %v3644_v0, %s3572_s4 }
  0x57   : > { %1126 = vrot.lane.b32.xlu0 %v3644_v0, %s3574_s6  ;;  %1128 = vrot.lane.b32.xlu1 %v3650_v2, %s3574_s6 }
  0x5b   : > { %592 = vrot.lane.b32.xlu0 %v3647_v1, %s3572_s4  ;;  %1124 = vrot.lane.b32.xlu1 %v3647_v1, %s3574_s6 }
  0x5f   : > { %572 = vrot.lane.b32.xlu0 %v3644_v0, %s3573_s5  ;;  %1100 = vrot.lane.b32.xlu1 %v3644_v0, %s3575_s7 }
  0x63   : > { %1102 = vrot.lane.b32.xlu0 %v3650_v2, %s3575_s7  ;;  %570 = vrot.lane.b32.xlu1 %v3647_v1, %s3573_s5  ;;  %s3596_s5 = smov 13  }
  0x67   : > { %1098 = vrot.lane.b32.xlu0 %v3647_v1, %s3575_s7  ;;  %1074 = vrot.lane.b32.xlu1 %v3644_v0, %s3576_s8 }
  0x6b   : > { %1076 = vrot.lane.b32.xlu0 %v3650_v2, %s3576_s8  ;;  %1072 = vrot.lane.b32.xlu1 %v3647_v1, %s3576_s8 }
  0x6f   : > { %1130 = vrot.lane.b32.xlu0 %v3728_v5, %s3574_s6  ;;  %1048 = vrot.lane.b32.xlu1 %v3644_v0, %s3577_s9  ;;  %s3587_s6 = smov 62  }
  0x73   : > { %1050 = vrot.lane.b32.xlu0 %v3650_v2, %s3577_s9  ;;  %1046 = vrot.lane.b32.xlu1 %v3647_v1, %s3577_s9 }
  0x77   : > { %1104 = vrot.lane.b32.xlu0 %v3728_v5, %s3575_s7  ;;  %1022 = vrot.lane.b32.xlu1 %v3644_v0, %s3578_s10  ;;  %s3588_s7 = smov 34  }
  0x7b   : > { %1024 = vrot.lane.b32.xlu0 %v3650_v2, %s3578_s10  ;;  %1020 = vrot.lane.b32.xlu1 %v3647_v1, %s3578_s10 }
  0x7f   : > { %1078 = vrot.lane.b32.xlu0 %v3728_v5, %s3576_s8  ;;  %996 = vrot.lane.b32.xlu1 %v3644_v0, %s3579_s11 }
  0x81   : > { %v304_v6 = vpop.permute.xlu0 %303  ;;  %v302_v7 = vpop.permute.xlu1 %301 }
  0x82   : > { %v308_v11 = vsel %vm307_vm2, %v302_v7, %v304_v6 }
  0x83   : > { %998 = vrot.lane.b32.xlu0 %v3650_v2, %s3579_s11  ;;  %994 = vrot.lane.b32.xlu1 %v3647_v1, %s3579_s11 }
  0x85   : > { %v306_v8 = vpop.permute.xlu0 %305  ;;  %v283_v9 = vpop.permute.xlu1 %282 }
  0x86   : > { %v309_v10 = vsel %vm307_vm2, %v304_v6, %v306_v8  ;;  %315 = vst.msk [vmem:[#allocation3 + $0xa0] sm:$0xff] %vm173_vm0, %v306_v8 }
  0x87   : > { %1052 = vrot.lane.b32.xlu0 %v3728_v5, %s3577_s9  ;;  %970 = vrot.lane.b32.xlu1 %v3644_v0, %s3580_s14 }
  0x88   : > { %384 = vmatprep.subr.mxu0 %v309_v10  ;;  %v3848_v10 = vld [vmem:[%s4493_s1 + $0x20] sm:$0xff] }
  0x89   : > { %v285_v12 = vpop.permute.xlu0 %284  ;;  %v281_v13 = vpop.permute.xlu1 %280  ;;  %385 = vmatpush1.msra.mxu0 %v308_v11 }
  0x8a   : > { %v288_v14 = vsel %vm286_vm3, %v283_v9, %v285_v12  ;;  %294 = vst.msk [vmem:[#allocation3 + $0x88] sm:$0xff] %vm173_vm0, %v285_v12  ;;  %v287_v15 = vsel %vm286_vm3, %v281_v13, %v283_v9 }
  0x8b   : > { %972 = vrot.lane.b32.xlu0 %v3650_v2, %s3580_s14  ;;  %968 = vrot.lane.b32.xlu1 %v3647_v1, %s3580_s14 }
  0x8c   : > { %386 = vmatprep.subr.mxu0 %v288_v14 }
  0x8d   : > { %v264_v16 = vpop.permute.xlu1 %263  ;;  %v262_v17 = vpop.permute.xlu0 %261  ;;  %v352_v18 = vld [vmem:[#allocation3 + $0xa0] sm:$0xff]  ;;  %387 = vmatpush1.msra.mxu0 %v287_v15 }
  0x8e   : > { %273 = vst.msk [vmem:[#allocation3 + $0x70] sm:$0xff] %vm173_vm0, %v264_v16  ;;  %v267_v19 = vsel %vm265_vm4, %v262_v17, %v264_v16  ;;  %3354 = vmatprep.subr.mxu1 %v352_v18 }
  0x8f   : > { %3355 = vmatpush3.msra.mxu1 %v352_v18  ;;  %1026 = vrot.lane.b32.xlu0 %v3728_v5, %s3578_s10  ;;  %s3597_s10 = smov 14  }
  0x90   : > { %1000 = vrot.lane.b32.xlu1 %v3728_v5, %s3579_s11  ;;  %388 = vmatprep.subr.mxu0 %v267_v19  ;;  %s3598_s11 = smov 15  }
  0x91   : > { %v260_v20 = vpop.permute.xlu0 %259  ;;  %v241_v21 = vpop.permute.xlu1 %240  ;;  %v349_v22 = vld [vmem:[#allocation3 + $0x88] sm:$0xff] }
  0x92   : > { %v266_v23 = vsel %vm265_vm4, %v260_v20, %v262_v17  ;;  %3356 = vmatprep.subr.mxu1 %v349_v22 }
  0x93   : > { %3357 = vmatpush3.msra.mxu1 %v349_v22  ;;  %1558 = vrot.lane.b32.xlu0 %v3650_v2, %s3581_s15 }
  0x94   : > { %1560 = vrot.lane.b32.xlu1 %v3728_v5, %s3581_s15  ;;  %389 = vmatpush1.msra.mxu0 %v266_v23 }
  0x95   : > { %v243_v24 = vpop.permute.xlu0 %242  ;;  %v239_v25 = vpop.permute.xlu1 %238  ;;  %v346_v26 = vld [vmem:[#allocation3 + $0x70] sm:$0xff] }
  0x96   : > { %v246_v27 = vsel %vm244_vm5, %v241_v21, %v243_v24  ;;  %252 = vst.msk [vmem:[#allocation3 + $0x58] sm:$0xff] %vm173_vm0, %v243_v24  ;;  %v245_v28 = vsel %vm244_vm5, %v239_v25, %v241_v21  ;;  %3358 = vmatprep.subr.mxu1 %v346_v26  ;;  %vm1106_vm5 = vcmask 646144  }
  0x97   : > { %3359 = vmatpush3.msra.mxu1 %v346_v26  ;;  %974 = vrot.lane.b32.xlu0 %v3728_v5, %s3580_s14  ;;  %s3599_s14 = smov 16  }
  0x98   : > { %1532 = vrot.lane.b32.xlu1 %v3650_v2, %s3582_s16  ;;  %390 = vmatprep.subr.mxu0 %v246_v27  ;;  %v3203_v27 = vld [vmem:[%s4493_s1 + $0x28] sm:$0xff] }
  0x99   : > { %v222_v29 = vpop.permute.xlu1 %221  ;;  %v220_v30 = vpop.permute.xlu0 %219  ;;  %391 = vmatpush1.msra.mxu0 %v245_v28  ;;  %v3204_v28 = vld [vmem:[%s4493_s1 + $0x30] sm:$0xff] }
  0x9a   : > { %231 = vst.msk [vmem:[#allocation3 + $0x40] sm:$0xff] %vm173_vm0, %v222_v29  ;;  %v225_v31 = vsel %vm223_vm6, %v220_v30, %v222_v29 }
  0x9b   : > { %1534 = vrot.lane.b32.xlu0 %v3728_v5, %s3582_s16  ;;  %392 = vmatprep.subr.mxu0 %v225_v31 }
  0x9c   : > { %1506 = vrot.lane.b32.xlu1 %v3650_v2, %s3583_s21 }
  0x9d   : > { %v218_v32 = vpop.permute.xlu0 %217  ;;  %v199_v33 = vpop.permute.xlu1 %198  ;;  %v343_v34 = vld [vmem:[#allocation3 + $0x58] sm:$0xff] }
  0x9e   : > { %v224_v35 = vsel %vm223_vm6, %v218_v32, %v220_v30  ;;  %3360 = vmatprep.subr.mxu1 %v343_v34  ;;  %vm1080_vm6 = vcmask 654336  }
  0x9f   : > { %3361 = vmatpush3.msra.mxu1 %v343_v34  ;;  %1508 = vrot.lane.b32.xlu0 %v3728_v5, %s3583_s21 }
  0xa0   : > { %1556 = vrot.lane.b32.xlu1 %v3644_v0, %s3581_s15  ;;  %393 = vmatpush1.msra.mxu0 %v224_v35 }
  0xa1   : > { %v201_v36 = vpop.permute.xlu0 %200  ;;  %v197_v37 = vpop.permute.xlu1 %196  ;;  %v340_v38 = vld [vmem:[#allocation3 + $0x40] sm:$0xff] }
  0xa2   : > { %v204_v39 = vsel %vm202_vm7, %v199_v33, %v201_v36  ;;  %210 = vst.msk [vmem:[#allocation3 + $0x28] sm:$0xff] %vm173_vm0, %v201_v36  ;;  %v203_v40 = vsel %vm202_vm7, %v197_v37, %v199_v33  ;;  %3362 = vmatprep.subr.mxu1 %v340_v38  ;;  %v3205_v33 = vld [vmem:[%s4493_s1 + $0x38] sm:$0xff]  ;;  %vm1054_vm7 = vcmask 662528  }
  0xa3   : > { %3363 = vmatpush3.msra.mxu1 %v340_v38  ;;  %1554 = vrot.lane.b32.xlu0 %v3647_v1, %s3581_s15  ;;  %s3600_s15 = smov 17  }
  0xa4   : > { %1480 = vrot.lane.b32.xlu1 %v3650_v2, %s3584_s22  ;;  %394 = vmatprep.subr.mxu0 %v204_v39 }
  0xa5   : > { %v702_v41 = vpop.permute.xlu0 %701  ;;  %v681_v42 = vpop.permute.xlu1 %680  ;;  %395 = vmatpush1.msra.mxu0 %v203_v40 }
  0xa6   : > { %711 = vst.msk [vmem:[#allocation3 + $0x148] sm:$0xff] %vm173_vm0, %v702_v41  ;;  %690 = vst.msk [vmem:[#allocation3 + $0x130] sm:$0xff] %vm173_vm0, %v681_v42  ;;  %396 = vmatprep.subr.mxu0 %v3644_v0 }
  0xa7   : > { %1482 = vrot.lane.b32.xlu0 %v3728_v5, %s3584_s22  ;;  %397 = vmatpush1.msra.mxu0 %v3647_v1 }
  0xa8   : > { %1530 = vrot.lane.b32.xlu1 %v3644_v0, %s3582_s16  ;;  %3194 = vmatmul.mubr.msk.f32.vlgmr.msra.gmra.mxu0 %vm353_vm1, %v3682_v3 }
  0xa9   : > { %v700_v43 = vpop.permute.xlu0 %699  ;;  %v660_v44 = vpop.permute.xlu1 %659  ;;  %v337_v45 = vld [vmem:[#allocation3 + $0x28] sm:$0xff]  ;;  %436 = vmatprep.mubr.f32.mxu0 %v3566_v4 }
  0xaa   : > { %669 = vst.msk [vmem:[#allocation3 + $0x118] sm:$0xff] %vm173_vm0, %v660_v44  ;;  %3364 = vmatprep.subr.mxu1 %v337_v45  ;;  %v705_v48 = vsel %vm703_vm8, %v700_v43, %v702_v41 }
  0xab   : > { %1528 = vrot.lane.b32.xlu0 %v3647_v1, %s3582_s16  ;;  %3365 = vmatpush3.msra.mxu1 %v337_v45  ;;  %s3589_s16 = smov 35   ;;  %v3920_v45 = vld [vmem:[%s3641_s17 + $0x8] sm:$0xff] }
  0xac   : > { %1454 = vrot.lane.b32.xlu1 %v3650_v2, %s3585_s23  ;;  %3366 = vmatprep.subr.mxu1 %v334_v46 }
  0xad   : > { %v698_v49 = vpop.permute.xlu0 %697  ;;  %v679_v50 = vpop.permute.xlu1 %678  ;;  %v749_v51 = vld [vmem:[#allocation3 + $0x148] sm:$0xff]  ;;  %v746_v52 = vld [vmem:[#allocation3 + $0x130] sm:$0xff]  ;;  %3367 = vmatpush3.msra.mxu1 %v334_v46  ;;  %3195 = vmatmul.mubr.msk.f32.gmra.mxu0 %vm353_vm1, %v329_v47 }
  0xae   : > { %3374 = vmatprep.subr.mxu0 %v749_v51  ;;  %780 = vmatprep.subr.mxu1 %v705_v48  ;;  %v704_v53 = vsel %vm703_vm8, %v698_v49, %v700_v43  ;;  %v684_v54 = vsel %vm682_vm9, %v679_v50, %v681_v42  ;;  %v3934_v49 = vld [vmem:[%s3641_s17] sm:$0xff]  ;;  %vm1028_vm8 = vcmask 670720  }
  0xaf   : > { %1456 = vrot.lane.b32.xlu0 %v3728_v5, %s3585_s23  ;;  %3375 = vmatpush3.msra.mxu0 %v749_v51 }
  0xb0   : > { %1504 = vrot.lane.b32.xlu1 %v3644_v0, %s3583_s21  ;;  %3376 = vmatprep.subr.mxu0 %v746_v52 }
  0xb1   : > { %v639_v55 = vpop.permute.xlu0 %638  ;;  %v677_v56 = vpop.permute.xlu1 %676  ;;  %3377 = vmatpush3.msra.mxu0 %v746_v52  ;;  %v743_v57 = vld [vmem:[#allocation3 + $0x118] sm:$0xff]  ;;  %3369 = vmatmul.mubr.msk.f32.vlgmr.msra.gmra.mxu1 %vm353_vm1, %v329_v47 }
  0xb2   : > { %648 = vst.msk [vmem:[#allocation3 + $0x100] sm:$0xff] %vm173_vm0, %v639_v55  ;;  %v683_v58 = vsel %vm682_vm9, %v677_v56, %v679_v50  ;;  %3378 = vmatprep.subr.mxu0 %v743_v57  ;;  %781 = vmatpush1.msra.mxu1 %v704_v53  ;;  %v3948_v53 = vld [vmem:[%s4493_s1 + $0x40] sm:$0xff]  ;;  %vm1002_vm9 = vcmask 678912  }
  0xb3   : > { %1502 = vrot.lane.b32.xlu0 %v3647_v1, %s3583_s21  ;;  %3379 = vmatpush3.msra.mxu0 %v743_v57  ;;  %s3590_s21 = smov 36  }
  0xb4   : > { %1428 = vrot.lane.b32.xlu1 %v3650_v2, %s3586_s28  ;;  %782 = vmatprep.subr.mxu1 %v684_v54 }
  0xb5   : > { %v658_v60 = vpop.permute.xlu0 %657  ;;  %v618_v61 = vpop.permute.xlu1 %617  ;;  %783 = vmatpush1.msra.mxu1 %v683_v58  ;;  %442 = vmatprep.mubr.f32.mxu0 %v3566_v4 }
  0xb6   : > { %v663_v62 = vsel %vm661_vm10, %v658_v60, %v660_v44  ;;  %627 = vst.msk [vmem:[#allocation3 + $0xe8] sm:$0xff] %vm173_vm0, %v618_v61  ;;  %3196 = vmatmul.mubr.msk.f32.gmra.mxu0 %vm353_vm1, %v330_v59  ;;  %3371 = vmatprep.mubr.msk.f32.mxu1 %vm353_vm1, %v330_v59 }
  0xb7   : > { %1430 = vrot.lane.b32.xlu0 %v3728_v5, %s3586_s28  ;;  %784 = vmatprep.subr.mxu1 %v663_v62 }
  0xb8   : > { %1478 = vrot.lane.b32.xlu1 %v3644_v0, %s3584_s22  ;;  %448 = vmatprep.mubr.f32.mxu0 %v3566_v4 }
  0xb9   : > { %v656_v3 = vpop.permute.xlu0 %655  ;;  %v637_v6 = vpop.permute.xlu1 %636  ;;  %v740_v7 = vld [vmem:[#allocation3 + $0x100] sm:$0xff]  ;;  %3372 = vmatmul.mubr.msk.f32.gmra.mxu1 %vm353_vm1, %v331_v63 }
  0xba   : > { %v662_v8 = vsel %vm661_vm10, %v656_v3, %v658_v60  ;;  %v642_v9 = vsel %vm640_vm11, %v637_v6, %v639_v55  ;;  %3380 = vmatprep.subr.mxu0 %v740_v7  ;;  %3197 = vmatmul.mubr.msk.f32.gmra.mxu0 %vm353_vm1, %v331_v63  ;;  %vm976_vm10 = vcmask 687104  }
  0xbb   : > { %1476 = vrot.lane.b32.xlu0 %v3647_v1, %s3584_s22  ;;  %3381 = vmatpush3.msra.mxu0 %v740_v7  ;;  %s3591_s22 = smov 37  }
  0xbc   : > { %1402 = vrot.lane.b32.xlu1 %v3650_v2, %s3587_s6  ;;  %785 = vmatpush1.msra.mxu1 %v662_v8 }
  0xbd   : > { %v597_v11 = vpop.permute.xlu0 %596  ;;  %v635_v12 = vpop.permute.xlu1 %634  ;;  %v737_v13 = vld [vmem:[#allocation3 + $0xe8] sm:$0xff]  ;;  %786 = vmatprep.subr.mxu1 %v642_v9  ;;  %3388 = vmatprep.mubr.msk.f32.mxu0 %vm353_vm1, %v3848_v10 }
  0xbe   : > { %606 = vst.msk [vmem:[#allocation3 + $0xd0] sm:$0xff] %vm173_vm0, %v597_v11  ;;  %v641_v14 = vsel %vm640_vm11, %v635_v12, %v637_v6  ;;  %3382 = vmatprep.subr.mxu0 %v737_v13  ;;  %826 = vmatprep.mubr.f32.mxu1 %v3566_v4  ;;  %vm1536_vm11 = vcmask 465920  }
  0xbf   : > { %1404 = vrot.lane.b32.xlu0 %v3728_v5, %s3587_s6  ;;  %3383 = vmatpush3.msra.mxu0 %v737_v13 }
  0xc0   : > { %1452 = vrot.lane.b32.xlu1 %v3644_v0, %s3585_s23  ;;  %787 = vmatpush1.msra.mxu1 %v641_v14 }
  0xc1   : > { %v616_v15 = vpop.permute.xlu0 %615  ;;  %v575_v16 = vpop.permute.xlu1 %574 }
  0xc2   : > { %v621_v17 = vsel %vm619_vm12, %v616_v15, %v618_v61  ;;  %585 = vst.msk [vmem:[#allocation3 + $0xb8] sm:$0xff] %vm173_vm0, %v575_v16 }
  0xc3   : > { %1450 = vrot.lane.b32.xlu0 %v3647_v1, %s3585_s23  ;;  %788 = vmatprep.subr.mxu1 %v621_v17 }
  0xc4   : > { %1426 = vrot.lane.b32.xlu1 %v3644_v0, %s3586_s28 }
  0xc5   : > { %v614_v18 = vpop.permute.xlu0 %613  ;;  %v595_v19 = vpop.permute.xlu1 %594  ;;  %v734_v20 = vld [vmem:[#allocation3 + $0xd0] sm:$0xff] }
  0xc6   : > { %v620_v21 = vsel %vm619_vm12, %v614_v18, %v616_v15  ;;  %v600_v22 = vsel %vm598_vm13, %v595_v19, %v597_v11  ;;  %3384 = vmatprep.subr.mxu0 %v734_v20  ;;  %vm1510_vm12 = vcmask 474112  }
  0xc7   : > { %1985 = vrot.lane.b32.xlu0 %v3644_v0, %s3588_s7  ;;  %3385 = vmatpush3.msra.mxu0 %v734_v20 }
  0xc8   : > { %1987 = vrot.lane.b32.xlu1 %v3650_v2, %s3588_s7  ;;  %789 = vmatpush1.msra.mxu1 %v620_v21 }
  0xc9   : > { %v1127_v23 = vpop.permute.xlu0 %1126  ;;  %v3873_v24 = vpop.permute.xlu1 %1128  ;;  %v731_v25 = vld [vmem:[#allocation3 + $0xb8] sm:$0xff]  ;;  %790 = vmatprep.subr.mxu1 %v600_v22 }
  0xca   : > { %v1134_v26 = vsel %vm1132_vm14, %v1127_v23, %v3873_v24  ;;  %3386 = vmatprep.subr.mxu0 %v731_v25 }
  0xcb   : > { %1424 = vrot.lane.b32.xlu0 %v3647_v1, %s3586_s28  ;;  %3387 = vmatpush3.msra.mxu0 %v731_v25  ;;  %s3604_s28 = smov 120  }
  0xcc   : > { %1983 = vrot.lane.b32.xlu1 %v3647_v1, %s3588_s7  ;;  %1210 = vmatprep.subr.mxu0 %v1134_v26  ;;  %v3215_v26 = vld [vmem:[%s4493_s1 + $0x48] sm:$0xff] }
  0xcd   : > { %v593_v29 = vpop.permute.xlu0 %592  ;;  %v1125_v30 = vpop.permute.xlu1 %1124  ;;  %3389 = vmatmul.mubr.msk.f32.vlgmr.msra.gmra.mxu0 %vm353_vm1, %v3203_v27 }
  0xce   : > { %v599_v31 = vsel %vm598_vm13, %v593_v29, %v595_v19  ;;  %v1133_v32 = vsel %vm1132_vm14, %v1125_v30, %v1127_v23  ;;  %3391 = vmatprep.mubr.msk.f32.mxu0 %vm353_vm1, %v3204_v28  ;;  %v3216_v29 = vld [vmem:[%s4493_s1 + $0x50] sm:$0xff]  ;;  %vm1484_vm13 = vcmask 482304  }
  0xcf   : > { %1400 = vrot.lane.b32.xlu0 %v3644_v0, %s3587_s6  ;;  %791 = vmatpush1.msra.mxu1 %v599_v31 }
  0xd0   : > { %1959 = vrot.lane.b32.xlu1 %v3644_v0, %s3589_s16  ;;  %1211 = vmatpush1.msra.mxu0 %v1133_v32 }
  0xd1   : > { %v573_v34 = vpop.permute.xlu0 %572  ;;  %v1101_v35 = vpop.permute.xlu1 %1100  ;;  %3392 = vmatmul.mubr.msk.f32.gmra.mxu0 %vm353_vm1, %v3205_v33 }
  0xd2   : > { %v578_v36 = vsel %vm576_vm15, %v573_v34, %v575_v16  ;;  %1256 = vmatprep.mubr.f32.mxu0 %v3566_v4 }
  0xd3   : > { %1961 = vrot.lane.b32.xlu0 %v3650_v2, %s3589_s16  ;;  %792 = vmatprep.subr.mxu1 %v578_v36  ;;  %v4035_v36 = vld [vmem:[%s4493_s1 + $0x60] sm:$0xff] }
  0xd4   : > { %1398 = vrot.lane.b32.xlu1 %v3647_v1, %s3587_s6 }
  0xd5   : > { %v1103_v37 = vpop.permute.xlu0 %1102  ;;  %v571_v38 = vpop.permute.xlu1 %570 }
  0xd6   : > { %v1108_v39 = vsel %vm1106_vm5, %v1101_v35, %v1103_v37  ;;  %v577_v40 = vsel %vm576_vm15, %v571_v38, %v573_v34  ;;  %vm1432_vm15 = vcmask 498688  }
  0xd7   : > { %1957 = vrot.lane.b32.xlu0 %v3647_v1, %s3589_s16  ;;  %793 = vmatpush1.msra.mxu1 %v577_v40 }
  0xd8   : > { %1933 = vrot.lane.b32.xlu1 %v3644_v0, %s3590_s21  ;;  %1212 = vmatprep.subr.mxu0 %v1108_v39 }
  0xd9   : > { %v1099_v41 = vpop.permute.xlu0 %1098  ;;  %v1075_v42 = vpop.permute.xlu1 %1074  ;;  %3206 = vmatmul.mubr.msk.f32.vlgmr.msra.gmra.mxu1 %vm353_vm1, %v3848_v10 }
  0xda   : > { %v1107_v43 = vsel %vm1106_vm5, %v1099_v41, %v1101_v35  ;;  %832 = vmatprep.mubr.f32.mxu1 %v3566_v4  ;;  %v3217_v35 = vld [vmem:[%s4493_s1 + $0x58] sm:$0xff] }
  0xdb   : > { %1935 = vrot.lane.b32.xlu0 %v3650_v2, %s3590_s21  ;;  %1213 = vmatpush1.msra.mxu0 %v1107_v43 }
  0xdc   : > { %1931 = vrot.lane.b32.xlu1 %v3647_v1, %s3590_s21  ;;  %v3931_v1 = vld [vmem:[%s3641_s17 + $0x10] sm:$0xff] }
  0xdd   : > { %v1077_v0 = vpop.permute.xlu0 %1076  ;;  %v1073_v44 = vpop.permute.xlu1 %1072  ;;  %3207 = vmatmul.mubr.msk.f32.gmra.mxu1 %vm353_vm1, %v3203_v27 }
  0xde   : > { %v1082_v46 = vsel %vm1080_vm6, %v1075_v42, %v1077_v0  ;;  %v1081_v47 = vsel %vm1080_vm6, %v1073_v44, %v1075_v42  ;;  %838 = vmatprep.mubr.f32.mxu1 %v3566_v4 }
  0xdf   : > { %1989 = vrot.lane.b32.xlu0 %v3728_v5, %s3588_s7  ;;  %1214 = vmatprep.subr.mxu0 %v1082_v46  ;;  %s3494_s7 = smul.u32 96, %s4497_s13 }
  0xe0   : > { %1907 = vrot.lane.b32.xlu1 %v3920_v45, %s3591_s22  ;;  %1215 = vmatpush1.msra.mxu0 %v1081_v47 }
  0xe1   : > { %v1131_v2 = vpop.permute.xlu0 %1130  ;;  %v1049_v48 = vpop.permute.xlu1 %1048  ;;  %3208 = vmatmul.mubr.msk.f32.gmra.mxu1 %vm353_vm1, %v3204_v28 }
  0xe2   : > { %v1135_v50 = vsel %vm1132_vm14, %v3873_v24, %v1131_v2  ;;  %844 = vmatprep.mubr.f32.mxu1 %v3566_v4  ;;  %vm1458_vm14 = vcmask 490496  }
  0xe3   : > { %1141 = vst.msk [vmem:[#allocation3 + $0xa0] sm:$0xff] %vm173_vm0, %v1135_v50  ;;  %1909 = vrot.lane.b32.xlu0 %v3931_v1, %s3591_s22 }
  0xe4   : > { %1905 = vrot.lane.b32.xlu1 %v3934_v49, %s3591_s22 }
  0xe5   : > { %v1051_v51 = vpop.permute.xlu0 %1050  ;;  %v1047_v52 = vpop.permute.xlu1 %1046  ;;  %3209 = vmatmul.mubr.msk.f32.gmra.mxu1 %vm353_vm1, %v3205_v33 }
  0xe6   : > { %v1056_v54 = vsel %vm1054_vm7, %v1049_v48, %v1051_v51  ;;  %v1055_v55 = vsel %vm1054_vm7, %v1047_v52, %v1049_v48  ;;  %3408 = vmatprep.mubr.msk.f32.mxu1 %vm353_vm1, %v3948_v53 }
  0xe7   : > { %1963 = vrot.lane.b32.xlu0 %v3728_v5, %s3589_s16  ;;  %1216 = vmatprep.subr.mxu0 %v1056_v54  ;;  %s3601_s16 = smov 18  }
  0xe8   : > { %1881 = vrot.lane.b32.xlu1 %v3920_v45, %s3592_s25  ;;  %1217 = vmatpush1.msra.mxu0 %v1055_v55 }
  0xe9   : > { %v1105_v56 = vpop.permute.xlu0 %1104  ;;  %v1023_v57 = vpop.permute.xlu1 %1022 }
  0xea   : > { %v1109_v58 = vsel %vm1106_vm5, %v1103_v37, %v1105_v56  ;;  %v1179_v59 = vld [vmem:[#allocation3 + $0xa0] sm:$0xff]  ;;  %vm1406_vm5 = vcmask 506880  }
  0xeb   : > { %1115 = vst.msk [vmem:[#allocation3 + $0x88] sm:$0xff] %vm173_vm0, %v1109_v58  ;;  %1883 = vrot.lane.b32.xlu0 %v3931_v1, %s3592_s25  ;;  %3394 = vmatprep.subr.mxu1 %v1179_v59 }
  0xec   : > { %1879 = vrot.lane.b32.xlu1 %v3934_v49, %s3592_s25  ;;  %3395 = vmatpush3.msra.mxu1 %v1179_v59 }
  0xed   : > { %v1025_v60 = vpop.permute.xlu0 %1024  ;;  %v1021_v61 = vpop.permute.xlu1 %1020 }
  0xee   : > { %v1030_v62 = vsel %vm1028_vm8, %v1023_v57, %v1025_v60  ;;  %v1029_v63 = vsel %vm1028_vm8, %v1021_v61, %v1023_v57 }
  0xef   : > { %1937 = vrot.lane.b32.xlu0 %v3728_v5, %s3590_s21  ;;  %1218 = vmatprep.subr.mxu0 %v1030_v62  ;;  %s3602_s21 = smov 118  }
  0xf0   : > { %1855 = vrot.lane.b32.xlu1 %v3920_v45, %s3593_s26  ;;  %1219 = vmatpush1.msra.mxu0 %v1029_v63 }
  0xf1   : > { %v1079_v3 = vpop.permute.xlu0 %1078  ;;  %v997_v6 = vpop.permute.xlu1 %996 }
  0xf2   : > { %v1083_v7 = vsel %vm1080_vm6, %v1077_v0, %v1079_v3  ;;  %v1176_v8 = vld [vmem:[#allocation3 + $0x88] sm:$0xff]  ;;  %vm1991_vm6 = vcmask 277504  }
  0xf3   : > { %1089 = vst.msk [vmem:[#allocation3 + $0x70] sm:$0xff] %vm173_vm0, %v1083_v7  ;;  %1857 = vrot.lane.b32.xlu0 %v3931_v1, %s3593_s26  ;;  %3396 = vmatprep.subr.mxu1 %v1176_v8 }
  0xf4   : > { %1853 = vrot.lane.b32.xlu1 %v3934_v49, %s3593_s26  ;;  %3397 = vmatpush3.msra.mxu1 %v1176_v8 }
  0xf5   : > { %v999_v9 = vpop.permute.xlu0 %998  ;;  %v995_v10 = vpop.permute.xlu1 %994 }
  0xf6   : > { %v1004_v11 = vsel %vm1002_vm9, %v997_v6, %v999_v9  ;;  %v1003_v12 = vsel %vm1002_vm9, %v995_v10, %v997_v6 }
  0xf7   : > { %1911 = vrot.lane.b32.xlu0 %v3728_v5, %s3591_s22  ;;  %1220 = vmatprep.subr.mxu0 %v1004_v11  ;;  %v3990_v5 = vld [vmem:[%s3641_s17 + $0x18] sm:$0xff]  ;;  %s3595_s17 = smov 12  }
  0xf8   : > { %1829 = vrot.lane.b32.xlu1 %v3920_v45, %s3594_s27  ;;  %1221 = vmatpush1.msra.mxu0 %v1003_v12 }
  0xf9   : > { %v1053_v13 = vpop.permute.xlu0 %1052  ;;  %v971_v14 = vpop.permute.xlu1 %970 }
  0xfa   : > { %v1057_v15 = vsel %vm1054_vm7, %v1051_v51, %v1053_v13  ;;  %v1173_v16 = vld [vmem:[#allocation3 + $0x70] sm:$0xff]  ;;  %vm1965_vm7 = vcmask 285696  }
  0xfb   : > { %1063 = vst.msk [vmem:[#allocation3 + $0x58] sm:$0xff] %vm173_vm0, %v1057_v15  ;;  %1831 = vrot.lane.b32.xlu0 %v3931_v1, %s3594_s27  ;;  %3398 = vmatprep.subr.mxu1 %v1173_v16 }
  0xfc   : > { %1827 = vrot.lane.b32.xlu1 %v3934_v49, %s3594_s27  ;;  %3399 = vmatpush3.msra.mxu1 %v1173_v16 }
  0xfd   : > { %v973_v17 = vpop.permute.xlu0 %972  ;;  %v969_v18 = vpop.permute.xlu1 %968 }
  0xfe   : > { %v978_v19 = vsel %vm976_vm10, %v971_v14, %v973_v17  ;;  %v977_v20 = vsel %vm976_vm10, %v969_v18, %v971_v14 }
  0xff   : > { %1885 = vrot.lane.b32.xlu0 %v3990_v5, %s3592_s25  ;;  %1222 = vmatprep.subr.mxu0 %v978_v19 }
 0x100   : > { %1859 = vrot.lane.b32.xlu1 %v3990_v5, %s3593_s26  ;;  %1223 = vmatpush1.msra.mxu0 %v977_v20 }
 0x101   : > { %v1027_v21 = vpop.permute.xlu0 %1026  ;;  %3218 = vmatmul.mubr.msk.f32.vlgmr.msra.gmra.mxu0 %vm353_vm1, %v3948_v53 }
 0x102   : > { %v1031_v22 = vsel %vm1028_vm8, %v1025_v60, %v1027_v21  ;;  %v1001_v23 = vpop.permute.xlu1 %1000  ;;  %v1170_v24 = vld [vmem:[#allocation3 + $0x58] sm:$0xff]  ;;  %1262 = vmatprep.mubr.f32.mxu0 %v3566_v4  ;;  %vm1939_vm8 = vcmask 293888  }
 0x103   : > { %1037 = vst.msk [vmem:[#allocation3 + $0x40] sm:$0xff] %vm173_vm0, %v1031_v22  ;;  %v1005_v25 = vsel %vm1002_vm9, %v999_v9, %v1001_v23  ;;  %2417 = vrot.lane.b32.xlu0 %v3931_v1, %s3595_s17  ;;  %3400 = vmatprep.subr.mxu1 %v1170_v24  ;;  %vm1913_vm9 = vcmask 302080  }
 0x104   : > { %1011 = vst.msk [vmem:[#allocation3 + $0x28] sm:$0xff] %vm173_vm0, %v1005_v25  ;;  %2419 = vrot.lane.b32.xlu1 %v3990_v5, %s3595_s17  ;;  %3401 = vmatpush3.msra.mxu1 %v1170_v24 }
 0x105   : > { %v1559_v27 = vpop.permute.xlu0 %1558  ;;  %3219 = vmatmul.mubr.msk.f32.gmra.mxu0 %vm353_vm1, %v3215_v26 }
 0x106   : > { %v1561_v28 = vpop.permute.xlu1 %1560  ;;  %1268 = vmatprep.mubr.f32.mxu0 %v3566_v4 }
 0x107   : > { %v1564_v30 = vsel %vm353_vm1, %v1559_v27, %v1561_v28  ;;  %1833 = vrot.lane.b32.xlu0 %v3990_v5, %s3594_s27  ;;  %v3227_v28 = vld [vmem:[%s4493_s1 + $0x68] sm:$0xff] }
 0x108   : > { %1570 = vst.msk [vmem:[#allocation3 + $0x148] sm:$0xff] %vm173_vm0, %v1564_v30  ;;  %2391 = vrot.lane.b32.xlu1 %v3931_v1, %s3596_s5 }
 0x109   : > { %v975_v31 = vpop.permute.xlu0 %974  ;;  %3220 = vmatmul.mubr.msk.f32.gmra.mxu0 %vm353_vm1, %v3216_v29 }
 0x10a   : > { %v979_v32 = vsel %vm976_vm10, %v973_v17, %v975_v31  ;;  %v1533_v33 = vpop.permute.xlu1 %1532  ;;  %v1167_v34 = vld [vmem:[#allocation3 + $0x40] sm:$0xff]  ;;  %1274 = vmatprep.mubr.f32.mxu0 %v3566_v4  ;;  %vm1887_vm10 = vcmask 310272  }
 0x10b   : > { %985 = vst.msk [vmem:[#allocation3 + $0x10] sm:$0xff] %vm173_vm0, %v979_v32  ;;  %2393 = vrot.lane.b32.xlu0 %v3990_v5, %s3596_s5  ;;  %3402 = vmatprep.subr.mxu1 %v1167_v34  ;;  %v1164_v37 = vld [vmem:[#allocation3 + $0x28] sm:$0xff] }
 0x10c   : > { %2365 = vrot.lane.b32.xlu1 %v3931_v1, %s3597_s10  ;;  %3403 = vmatpush3.msra.mxu1 %v1167_v34  ;;  %v3229_v34 = vld [vmem:[%s4493_s1 + $0x78] sm:$0xff] }
 0x10d   : > { %v1535_v38 = vpop.permute.xlu0 %1534  ;;  %3404 = vmatprep.subr.mxu1 %v1164_v37  ;;  %3221 = vmatmul.mubr.msk.f32.gmra.mxu0 %vm353_vm1, %v3217_v35 }
 0x10e   : > { %v1539_v39 = vsel %vm1536_vm11, %v1533_v33, %v1535_v38  ;;  %v1507_v40 = vpop.permute.xlu1 %1506  ;;  %3405 = vmatpush3.msra.mxu1 %v1164_v37  ;;  %3428 = vmatprep.mubr.msk.f32.mxu0 %vm353_vm1, %v4035_v36 }
 0x10f   : > { %1545 = vst.msk [vmem:[#allocation3 + $0x130] sm:$0xff] %vm173_vm0, %v1539_v39  ;;  %2367 = vrot.lane.b32.xlu0 %v3990_v5, %s3597_s10  ;;  %v1608_v41 = vld [vmem:[#allocation3 + $0x148] sm:$0xff] }
 0x110   : > { %2415 = vrot.lane.b32.xlu1 %v3920_v45, %s3595_s17  ;;  %3414 = vmatprep.subr.mxu0 %v1608_v41 }
 0x111   : > { %3415 = vmatpush3.msra.mxu0 %v1608_v41  ;;  %v1509_v42 = vpop.permute.xlu0 %1508 }
 0x112   : > { %v1513_v43 = vsel %vm1510_vm12, %v1507_v40, %v1509_v42  ;;  %v1557_v0 = vpop.permute.xlu1 %1556  ;;  %v1161_v44 = vld [vmem:[#allocation3 + $0x10] sm:$0xff] }
 0x113   : > { %1519 = vst.msk [vmem:[#allocation3 + $0x118] sm:$0xff] %vm173_vm0, %v1513_v43  ;;  %2413 = vrot.lane.b32.xlu0 %v3934_v49, %s3595_s17  ;;  %3406 = vmatprep.subr.mxu1 %v1161_v44  ;;  %v1563_v46 = vsel %vm353_vm1, %v1557_v0, %v1559_v27  ;;  %s3603_s17 = smov 119  }
 0x114   : > { %2339 = vrot.lane.b32.xlu1 %v3931_v1, %s3598_s11  ;;  %3407 = vmatpush3.msra.mxu1 %v1161_v44 }
 0x115   : > { %v1555_v47 = vpop.permute.xlu0 %1554  ;;  %1639 = vmatprep.subr.mxu1 %v1563_v46  ;;  %3409 = vmatmul.mubr.msk.f32.vlgmr.msra.gmra.mxu1 %vm353_vm1, %v3215_v26 }
 0x116   : > { %v1562_v2 = vsel %vm353_vm1, %v1555_v47, %v1557_v0  ;;  %v1481_v48 = vpop.permute.xlu1 %1480  ;;  %v1605_v50 = vld [vmem:[#allocation3 + $0x130] sm:$0xff]  ;;  %3411 = vmatprep.mubr.msk.f32.mxu1 %vm353_vm1, %v3216_v29 }
 0x117   : > { %2341 = vrot.lane.b32.xlu0 %v3990_v5, %s3598_s11  ;;  %3416 = vmatprep.subr.mxu0 %v1605_v50  ;;  %v3228_v29 = vld [vmem:[%s4493_s1 + $0x70] sm:$0xff] }
 0x118   : > { %2389 = vrot.lane.b32.xlu1 %v3920_v45, %s3596_s5  ;;  %3417 = vmatpush3.msra.mxu0 %v1605_v50 }
 0x119   : > { %v1483_v51 = vpop.permute.xlu0 %1482  ;;  %1640 = vmatpush1.msra.mxu1 %v1562_v2 }
 0x11a   : > { %v1487_v52 = vsel %vm1484_vm13, %v1481_v48, %v1483_v51  ;;  %v1531_v53 = vpop.permute.xlu1 %1530  ;;  %v1602_v54 = vld [vmem:[#allocation3 + $0x118] sm:$0xff]  ;;  %3412 = vmatmul.mubr.msk.f32.gmra.mxu1 %vm353_vm1, %v3217_v35 }
 0x11b   : > { %1493 = vst.msk [vmem:[#allocation3 + $0x100] sm:$0xff] %vm173_vm0, %v1487_v52  ;;  %v1538_v55 = vsel %vm1536_vm11, %v1531_v53, %v1533_v33  ;;  %2387 = vrot.lane.b32.xlu0 %v3934_v49, %s3596_s5  ;;  %3418 = vmatprep.subr.mxu0 %v1602_v54 }
 0x11c   : > { %2313 = vrot.lane.b32.xlu1 %v3931_v1, %s3599_s14  ;;  %3419 = vmatpush3.msra.mxu0 %v1602_v54 }
 0x11d   : > { %v1529_v56 = vpop.permute.xlu0 %1528  ;;  %1641 = vmatprep.subr.mxu1 %v1538_v55  ;;  %1685 = vmatprep.mubr.f32.mxu1 %v3566_v4 }
 0x11e   : > { %v1537_v57 = vsel %vm1536_vm11, %v1529_v56, %v1531_v53  ;;  %v1455_v58 = vpop.permute.xlu1 %1454  ;;  %v4167_v53 = vld [vmem:[%s4493_s1 + $0x80] sm:$0xff]  ;;  %vm1861_vm11 = vcmask 318464  }
 0x11f   : > { %2315 = vrot.lane.b32.xlu0 %v3990_v5, %s3599_s14  ;;  %1642 = vmatpush1.msra.mxu1 %v1537_v57 }
 0x120   : > { %2363 = vrot.lane.b32.xlu1 %v3920_v45, %s3597_s10 }
 0x121   : > { %v1457_v59 = vpop.permute.xlu0 %1456 }
 0x122   : > { %v1461_v60 = vsel %vm1458_vm14, %v1455_v58, %v1457_v59  ;;  %v1505_v61 = vpop.permute.xlu1 %1504  ;;  %v1599_v62 = vld [vmem:[#allocation3 + $0x100] sm:$0xff] }
 0x123   : > { %1467 = vst.msk [vmem:[#allocation3 + $0xe8] sm:$0xff] %vm173_vm0, %v1461_v60  ;;  %v1512_v63 = vsel %vm1510_vm12, %v1505_v61, %v1507_v40  ;;  %2361 = vrot.lane.b32.xlu0 %v3934_v49, %s3597_s10  ;;  %3420 = vmatprep.subr.mxu0 %v1599_v62  ;;  %s4458_s10 = scalar_lea.vmem %s4495_s3, %s3494_s7 }
 0x124   : > { %2287 = vrot.lane.b32.xlu1 %v3931_v1, %s3600_s15  ;;  %3421 = vmatpush3.msra.mxu0 %v1599_v62 }
 0x125   : > { %v1503_v3 = vpop.permute.xlu0 %1502  ;;  %1643 = vmatprep.subr.mxu1 %v1512_v63 }
 0x126   : > { %v1511_v6 = vsel %vm1510_vm12, %v1503_v3, %v1505_v61  ;;  %v1429_v7 = vpop.permute.xlu1 %1428  ;;  %vm1835_vm12 = vcmask 326656  }
 0x127   : > { %2289 = vrot.lane.b32.xlu0 %v3990_v5, %s3600_s15  ;;  %1644 = vmatpush1.msra.mxu1 %v1511_v6 }
 0x128   : > { %2337 = vrot.lane.b32.xlu1 %v3920_v45, %s3598_s11 }
 0x129   : > { %v1431_v8 = vpop.permute.xlu0 %1430 }
 0x12a   : > { %v1435_v9 = vsel %vm1432_vm15, %v1429_v7, %v1431_v8  ;;  %v1479_v10 = vpop.permute.xlu1 %1478  ;;  %v1596_v11 = vld [vmem:[#allocation3 + $0xe8] sm:$0xff] }
 0x12b   : > { %1441 = vst.msk [vmem:[#allocation3 + $0xd0] sm:$0xff] %vm173_vm0, %v1435_v9  ;;  %v1486_v12 = vsel %vm1484_vm13, %v1479_v10, %v1481_v48  ;;  %2335 = vrot.lane.b32.xlu0 %v3934_v49, %s3598_s11  ;;  %3422 = vmatprep.subr.mxu0 %v1596_v11 }
 0x12c   : > { %2261 = vrot.lane.b32.xlu1 %v3931_v1, %s3601_s16  ;;  %3423 = vmatpush3.msra.mxu0 %v1596_v11  ;;  %v3084_v11 = vld [vmem:[%s4494_s2 + $0x8] sm:$0xff] }
 0x12d   : > { %v1477_v13 = vpop.permute.xlu0 %1476  ;;  %1645 = vmatprep.subr.mxu1 %v1486_v12 }
 0x12e   : > { %v1485_v14 = vsel %vm1484_vm13, %v1477_v13, %v1479_v10  ;;  %v1403_v15 = vpop.permute.xlu1 %1402  ;;  %vm2421_vm13 = vcmask 97280  }
 0x12f   : > { %2263 = vrot.lane.b32.xlu0 %v3990_v5, %s3601_s16  ;;  %1646 = vmatpush1.msra.mxu1 %v1485_v14  ;;  %v3606_v14 = vmov 0  }
 0x130   : > { %2311 = vrot.lane.b32.xlu1 %v3920_v45, %s3599_s14  ;;  %3550 = vset.pattern.permute.xlu0 %v3606_v14 }
 0x131   : > { %v1405_v16 = vpop.permute.xlu0 %1404  ;;  %3551 = vset.pattern.permute.xlu1 %v3606_v14 }
 0x132   : > { %v1409_v17 = vsel %vm1406_vm5, %v1403_v15, %v1405_v16  ;;  %v1453_v18 = vpop.permute.xlu1 %1452  ;;  %v1593_v19 = vld [vmem:[#allocation3 + $0xd0] sm:$0xff] }
 0x133   : > { %1415 = vst.msk [vmem:[#allocation3 + $0xb8] sm:$0xff] %vm173_vm0, %v1409_v17  ;;  %v1460_v20 = vsel %vm1458_vm14, %v1453_v18, %v1455_v58  ;;  %2309 = vrot.lane.b32.xlu0 %v3934_v49, %s3599_s14  ;;  %3424 = vmatprep.subr.mxu0 %v1593_v19  ;;  %v3085_v16 = vld [vmem:[%s4494_s2 + $0x10] sm:$0xff] }
 0x134   : > { %2285 = vrot.lane.b32.xlu1 %v3920_v45, %s3600_s15  ;;  %3425 = vmatpush3.msra.mxu0 %v1593_v19 }
 0x135   : > { %v1451_v21 = vpop.permute.xlu0 %1450  ;;  %1647 = vmatprep.subr.mxu1 %v1460_v20 }
 0x136   : > { %v1459_v22 = vsel %vm1458_vm14, %v1451_v21, %v1453_v18  ;;  %v1427_v23 = vpop.permute.xlu1 %1426  ;;  %vm2395_vm14 = vcmask 105472  }
 0x137   : > { %v1434_v24 = vsel %vm1432_vm15, %v1427_v23, %v1429_v7  ;;  %2810 = vrot.lane.b32.xlu0 %v3931_v1, %s3602_s21  ;;  %1648 = vmatpush1.msra.mxu1 %v1459_v22 }
 0x138   : > { %2812 = vrot.lane.b32.xlu1 %v3990_v5, %s3602_s21  ;;  %1649 = vmatprep.subr.mxu1 %v1434_v24 }
 0x139   : > { %v1986_v25 = vpop.permute.xlu0 %1985 }
 0x13a   : > { %v4111_v26 = vpop.permute.xlu1 %1987  ;;  %v1590_v27 = vld [vmem:[#allocation3 + $0xb8] sm:$0xff] }
 0x13b   : > { %2283 = vrot.lane.b32.xlu0 %v3934_v49, %s3600_s15  ;;  %3426 = vmatprep.subr.mxu0 %v1590_v27  ;;  %v1993_v30 = vsel %vm1991_vm6, %v1986_v25, %v4111_v26 }
 0x13c   : > { %2808 = vrot.lane.b32.xlu1 %v3920_v45, %s3602_s21  ;;  %3427 = vmatpush3.msra.mxu0 %v1590_v27 }
 0x13d   : > { %v1425_v31 = vpop.permute.xlu0 %1424  ;;  %2069 = vmatprep.subr.mxu0 %v1993_v30  ;;  %3429 = vmatmul.mubr.msk.f32.vlgmr.msra.gmra.mxu0 %vm353_vm1, %v3227_v28 }
 0x13e   : > { %v1433_v32 = vsel %vm1432_vm15, %v1425_v31, %v1427_v23  ;;  %v1984_v33 = vpop.permute.xlu1 %1983  ;;  %3431 = vmatprep.mubr.msk.f32.mxu0 %vm353_vm1, %v3228_v29  ;;  %vm2369_vm15 = vcmask 113664  }
 0x13f   : > { %v1992_v35 = vsel %vm1991_vm6, %v1984_v33, %v1986_v25  ;;  %2259 = vrot.lane.b32.xlu0 %v3920_v45, %s3601_s16  ;;  %1650 = vmatpush1.msra.mxu1 %v1433_v32  ;;  %v321_v25 = vld [vmem:[#allocation2 + $0x28] sm:$0xff] }
 0x140   : > { %2789 = vrot.lane.b32.xlu1 %v3931_v1, %s3603_s17  ;;  %2070 = vmatpush1.msra.mxu0 %v1992_v35 }
 0x141   : > { %v1401_v37 = vpop.permute.xlu0 %1400  ;;  %3432 = vmatmul.mubr.msk.f32.gmra.mxu0 %vm353_vm1, %v3229_v34 }
 0x142   : > { %v1408_v38 = vsel %vm1406_vm5, %v1401_v37, %v1403_v15  ;;  %v1960_v39 = vpop.permute.xlu1 %1959  ;;  %2115 = vmatprep.mubr.f32.mxu0 %v3566_v4 }
 0x143   : > { %2791 = vrot.lane.b32.xlu0 %v3990_v5, %s3603_s17  ;;  %1651 = vmatprep.subr.mxu1 %v1408_v38 }
 0x144   : > { %2257 = vrot.lane.b32.xlu1 %v3934_v49, %s3601_s16 }
 0x145   : > { %v1962_v40 = vpop.permute.xlu0 %1961 }
 0x146   : > { %v1967_v41 = vsel %vm1965_vm7, %v1960_v39, %v1962_v40  ;;  %v1399_v42 = vpop.permute.xlu1 %1398 }
 0x147   : > { %v1407_v43 = vsel %vm1406_vm5, %v1399_v42, %v1401_v37  ;;  %2787 = vrot.lane.b32.xlu0 %v3920_v45, %s3603_s17  ;;  %2071 = vmatprep.subr.mxu0 %v1967_v41  ;;  %v3239_v37 = vld [vmem:[%s4493_s1 + $0x88] sm:$0xff]  ;;  %v3240_v42 = vld [vmem:[%s4493_s1 + $0x90] sm:$0xff]  ;;  %vm2343_vm5 = vcmask 121856  }
 0x148   : > { %2768 = vrot.lane.b32.xlu1 %v3931_v1, %s3604_s28  ;;  %1652 = vmatpush1.msra.mxu1 %v1407_v43 }
 0x149   : > { %v1958_v0 = vpop.permute.xlu0 %1957  ;;  %3230 = vmatmul.mubr.msk.f32.vlgmr.msra.gmra.mxu1 %vm353_vm1, %v4035_v36 }
 0x14a   : > { %v1966_v44 = vsel %vm1965_vm7, %v1958_v0, %v1960_v39  ;;  %v1934_v49 = vpop.permute.xlu1 %1933  ;;  %1691 = vmatprep.mubr.f32.mxu1 %v3566_v4  ;;  %v327_v0 = vld [vmem:[#allocation2 + $0x58] sm:$0xff] }
 0x14b   : > { %2770 = vrot.lane.b32.xlu0 %v3990_v5, %s3604_s28  ;;  %2072 = vmatpush1.msra.mxu0 %v1966_v44 }
 0x14c   : > { %2766 = vrot.lane.b32.xlu1 %v3920_v45, %s3604_s28 }
 0x14d   : > { %v1936_v46 = vpop.permute.xlu0 %1935  ;;  %3231 = vmatmul.mubr.msk.f32.gmra.mxu1 %vm353_vm1, %v3227_v28 }
 0x14e   : > { %v1941_v47 = vsel %vm1939_vm8, %v1934_v49, %v1936_v46  ;;  %v1932_v2 = vpop.permute.xlu1 %1931  ;;  %1697 = vmatprep.mubr.f32.mxu1 %v3566_v4 }
 0x14f   : > { %v1940_v36 = vsel %vm1939_vm8, %v1932_v2, %v1934_v49  ;;  %2747 = vrot.lane.b32.xlu0 %v3931_v1, %s3605_s29  ;;  %2073 = vmatprep.subr.mxu0 %v1941_v47  ;;  %v324_v47 = vld [vmem:[#allocation2 + $0x40] sm:$0xff] }
 0x150   : > { %2749 = vrot.lane.b32.xlu1 %v3990_v5, %s3605_s29  ;;  %2074 = vmatpush1.msra.mxu0 %v1940_v36 }
 0x151   : > { %v1990_v48 = vpop.permute.xlu0 %1989  ;;  %3232 = vmatmul.mubr.msk.f32.gmra.mxu1 %vm353_vm1, %v3228_v29  ;;  %v318_v29 = vld [vmem:[#allocation2 + $0x10] sm:$0xff] }
 0x152   : > { %v1994_v50 = vsel %vm1991_vm6, %v4111_v26, %v1990_v48  ;;  %v1908_v51 = vpop.permute.xlu1 %1907  ;;  %1703 = vmatprep.mubr.f32.mxu1 %v3566_v4  ;;  %vm2317_vm6 = vcmask 130048  }
 0x153   : > { %2000 = vst.msk [vmem:[#allocation3 + $0xa0] sm:$0xff] %vm173_vm0, %v1994_v50  ;;  %2745 = vrot.lane.b32.xlu0 %v3920_v45, %s3605_s29  ;;  %v3241_v50 = vld [vmem:[%s4493_s1 + $0x98] sm:$0xff] }
 0x154   : > { %2727 = vrot.lane.b32.xlu1 %v3931_v1, %s3560_s18 }
 0x155   : > { %v1910_v52 = vpop.permute.xlu0 %1909  ;;  %3233 = vmatmul.mubr.msk.f32.gmra.mxu1 %vm353_vm1, %v3229_v34 }
 0x156   : > { %v1915_v54 = vsel %vm1913_vm9, %v1908_v51, %v1910_v52  ;;  %v1906_v55 = vpop.permute.xlu1 %1905  ;;  %3448 = vmatprep.mubr.msk.f32.mxu1 %vm353_vm1, %v4167_v53 }
 0x157   : > { %v1914_v56 = vsel %vm1913_vm9, %v1906_v55, %v1908_v51  ;;  %2729 = vrot.lane.b32.xlu0 %v3990_v5, %s3560_s18  ;;  %2075 = vmatprep.subr.mxu0 %v1915_v54 }
 0x158   : > { %2725 = vrot.lane.b32.xlu1 %v3920_v45, %s3560_s18  ;;  %2076 = vmatpush1.msra.mxu0 %v1914_v56 }
 0x159   : > { %v1964_v57 = vpop.permute.xlu0 %1963 }
 0x15a   : > { %v1968_v58 = vsel %vm1965_vm7, %v1962_v40, %v1964_v57  ;;  %v1882_v59 = vpop.permute.xlu1 %1881  ;;  %v2038_v60 = vld [vmem:[#allocation3 + $0xa0] sm:$0xff]  ;;  %vm2291_vm7 = vcmask 138240  }
 0x15b   : > { %1974 = vst.msk [vmem:[#allocation3 + $0x88] sm:$0xff] %vm173_vm0, %v1968_v58  ;;  %2707 = vrot.lane.b32.xlu0 %v3931_v1, %s3561_s19  ;;  %3434 = vmatprep.subr.mxu1 %v2038_v60 }
 0x15c   : > { %2709 = vrot.lane.b32.xlu1 %v3990_v5, %s3561_s19  ;;  %3435 = vmatpush3.msra.mxu1 %v2038_v60 }
 0x15d   : > { %v1884_v61 = vpop.permute.xlu0 %1883 }
 0x15e   : > { %v1889_v62 = vsel %vm1887_vm10, %v1882_v59, %v1884_v61  ;;  %v1880_v63 = vpop.permute.xlu1 %1879 }
 0x15f   : > { %v1888_v3 = vsel %vm1887_vm10, %v1880_v63, %v1882_v59  ;;  %2705 = vrot.lane.b32.xlu0 %v3920_v45, %s3561_s19  ;;  %2077 = vmatprep.subr.mxu0 %v1889_v62 }
 0x160   : > { %2687 = vrot.lane.b32.xlu1 %v3931_v1, %s3562_s20  ;;  %2078 = vmatpush1.msra.mxu0 %v1888_v3  ;;  %v3083_v1 = vld [vmem:[%s4494_s2] sm:$0xff] }
 0x161   : > { %v1938_v6 = vpop.permute.xlu0 %1937 }
 0x162   : > { %v1942_v7 = vsel %vm1939_vm8, %v1936_v46, %v1938_v6  ;;  %v1856_v8 = vpop.permute.xlu1 %1855  ;;  %v2035_v9 = vld [vmem:[#allocation3 + $0x88] sm:$0xff]  ;;  %vm2265_vm8 = vcmask 146432  }
 0x163   : > { %1948 = vst.msk [vmem:[#allocation3 + $0x70] sm:$0xff] %vm173_vm0, %v1942_v7  ;;  %2689 = vrot.lane.b32.xlu0 %v3990_v5, %s3562_s20  ;;  %3436 = vmatprep.subr.mxu1 %v2035_v9 }
 0x164   : > { %2685 = vrot.lane.b32.xlu1 %v3920_v45, %s3562_s20  ;;  %3437 = vmatpush3.msra.mxu1 %v2035_v9  ;;  %v3086_v45 = vld [vmem:[%s4494_s2 + $0x18] sm:$0xff] }
 0x165   : > { %v1858_v10 = vpop.permute.xlu0 %1857 }
 0x166   : > { %v1863_v12 = vsel %vm1861_vm11, %v1856_v8, %v1858_v10  ;;  %v1854_v13 = vpop.permute.xlu1 %1853 }
 0x167   : > { %v1862_v5 = vsel %vm1861_vm11, %v1854_v13, %v1856_v8  ;;  %2079 = vmatprep.subr.mxu0 %v1863_v12  ;;  %3089 = vperm.xlu0 %3550, %v3083_v1  }
 0x168   : > { %2080 = vmatpush1.msra.mxu0 %v1862_v5  ;;  %3094 = vperm.xlu1 %3551, %v3084_v11   ;;  %v4212_v20 = vpop.f32.mrf.mxu0 }
 0x169   : > { %v1912_v15 = vpop.permute.xlu0 %1911 }
 0x16a   : > { %v1916_v17 = vsel %vm1913_vm9, %v1910_v52, %v1912_v15  ;;  %v1830_v18 = vpop.permute.xlu1 %1829  ;;  %v2032_v19 = vld [vmem:[#allocation3 + $0x70] sm:$0xff]  ;;  %v4216_v26 = vpop.f32.mrf.mxu0  ;;  %v4251_v52 = vld [vmem:[%s4493_s1 + $0xa0] sm:$0xff]  ;;  %vm2814_vm9 = vcmask 965632  }
 0x16b   : > { %1922 = vst.msk [vmem:[#allocation3 + $0x58] sm:$0xff] %vm173_vm0, %v1916_v17  ;;  %3438 = vmatprep.subr.mxu1 %v2032_v19  ;;  %3104 = vperm.xlu0 %3550, %v3086_v45  }
 0x16c   : > { %3439 = vmatpush3.msra.mxu1 %v2032_v19  ;;  %3099 = vperm.xlu1 %3551, %v3085_v16  }
 0x16d   : > { %v1832_v21 = vpop.permute.xlu0 %1831  ;;  %v4228_v38 = vpop.f32.mrf.mxu0 }
 0x16e   : > { %v1837_v22 = vsel %vm1835_vm12, %v1830_v18, %v1832_v21  ;;  %v1828_v23 = vpop.permute.xlu1 %1827 }
 0x16f   : > { %v1836_v24 = vsel %vm1835_vm12, %v1828_v23, %v1830_v18  ;;  %2081 = vmatprep.subr.mxu0 %v1837_v22  ;;  %v4239_v44 = vpop.f32.mrf.mxu0 }
 0x170   : > { %2082 = vmatpush1.msra.mxu0 %v1836_v24 }
 0x171   : > { %v1886_v27 = vpop.permute.xlu0 %1885  ;;  %3242 = vmatmul.mubr.msk.f32.vlgmr.msra.gmra.mxu0 %vm353_vm1, %v4167_v53  ;;  %v3370_v28 = vpop.f32.mrf.mxu1 }
 0x172   : > { %v1890_v30 = vsel %vm1887_vm10, %v1884_v61, %v1886_v27  ;;  %v1860_v31 = vpop.permute.xlu1 %1859  ;;  %v2029_v32 = vld [vmem:[#allocation3 + $0x58] sm:$0xff]  ;;  %2121 = vmatprep.mubr.f32.mxu0 %v3566_v4  ;;  %v545_v33 = vadd.f32 %v3370_v28, %v321_v25  ;;  %vm2793_vm10 = vcmask 973824  }
 0x173   : > { %1896 = vst.msk [vmem:[#allocation3 + $0x40] sm:$0xff] %vm173_vm0, %v1890_v30  ;;  %v1864_v34 = vsel %vm1861_vm11, %v1858_v10, %v1860_v31  ;;  %3440 = vmatprep.subr.mxu1 %v2029_v32  ;;  %v521_v35 = vpop.f32.mrf.mxu1  ;;  %vm2772_vm11 = vcmask 982016  }
 0x174   : > { %1870 = vst.msk [vmem:[#allocation3 + $0x28] sm:$0xff] %vm173_vm0, %v1864_v34  ;;  %3441 = vmatpush3.msra.mxu1 %v2029_v32  ;;  %557 = vst.msk [vmem:[#allocation2 + $0x28] sm:$0xff] %vm173_vm0, %v545_v33  ;;  %v542_v39 = vadd.f32 %v521_v35, %v318_v29 }
 0x175   : > { %v2418_v40 = vpop.permute.xlu0 %2417  ;;  %3243 = vmatmul.mubr.msk.f32.gmra.mxu0 %vm353_vm1, %v3239_v37 }
 0x176   : > { %v2420_v41 = vpop.permute.xlu1 %2419  ;;  %2127 = vmatprep.mubr.f32.mxu0 %v3566_v4  ;;  %554 = vst.msk [vmem:[#allocation2 + $0x10] sm:$0xff] %vm173_vm0, %v542_v39  ;;  %v4255_v57 = vpop.f32.mrf.mxu0 }
 0x177   : > { %v2424_v43 = vsel %vm2421_vm13, %v2418_v40, %v2420_v41 }
 0x178   : > { %2430 = vst.msk [vmem:[#allocation3 + $0x148] sm:$0xff] %vm173_vm0, %v2424_v43  ;;  %v4264_v62 = vpop.f32.mrf.mxu0 }
 0x179   : > { %v1834_v49 = vpop.permute.xlu0 %1833  ;;  %3244 = vmatmul.mubr.msk.f32.gmra.mxu0 %vm353_vm1, %v3240_v42  ;;  %v3373_v46 = vpop.f32.mrf.mxu1 }
 0x17a   : > { %v1838_v2 = vsel %vm1835_vm12, %v1832_v21, %v1834_v49  ;;  %v2392_v36 = vpop.permute.xlu1 %2391  ;;  %v2026_v48 = vld [vmem:[#allocation3 + $0x40] sm:$0xff]  ;;  %2133 = vmatprep.mubr.f32.mxu0 %v3566_v4  ;;  %v551_v51 = vadd.f32 %v3373_v46, %v327_v0  ;;  %v4271_v9 = vpop.f32.mrf.mxu0  ;;  %vm2751_vm12 = vcmask 990208  }
 0x17b   : > { %1844 = vst.msk [vmem:[#allocation3 + $0x10] sm:$0xff] %vm173_vm0, %v1838_v2  ;;  %3442 = vmatprep.subr.mxu1 %v2026_v48  ;;  %v531_v53 = vpop.f32.mrf.mxu1  ;;  %v2023_v54 = vld [vmem:[#allocation3 + $0x28] sm:$0xff] }
 0x17c   : > { %3443 = vmatpush3.msra.mxu1 %v2026_v48  ;;  %563 = vst.msk [vmem:[#allocation2 + $0x58] sm:$0xff] %vm173_vm0, %v551_v51  ;;  %v548_v55 = vadd.f32 %v531_v53, %v324_v47  ;;  %v4276_v13 = vpop.f32.mrf.mxu0  ;;  %v717_v16 = vld [vmem:[#allocation2 + $0x28] sm:$0xff] }
 0x17d   : > { %v2394_v56 = vpop.permute.xlu0 %2393  ;;  %3444 = vmatprep.subr.mxu1 %v2023_v54  ;;  %3245 = vmatmul.mubr.msk.f32.gmra.mxu0 %vm353_vm1, %v3241_v50  ;;  %v714_v19 = vld [vmem:[#allocation2 + $0x10] sm:$0xff] }
 0x17e   : > { %v2398_v58 = vsel %vm2395_vm14, %v2392_v36, %v2394_v56  ;;  %v4258_v59 = vpop.permute.xlu1 %2365  ;;  %3445 = vmatpush3.msra.mxu1 %v2023_v54  ;;  %3468 = vmatprep.mubr.msk.f32.mxu0 %vm353_vm1, %v4251_v52  ;;  %560 = vst.msk [vmem:[#allocation2 + $0x40] sm:$0xff] %vm173_vm0, %v548_v55 }
 0x17f   : > { %2404 = vst.msk [vmem:[#allocation3 + $0x130] sm:$0xff] %vm173_vm0, %v2398_v58  ;;  %v2468_v60 = vld [vmem:[#allocation3 + $0x148] sm:$0xff] }
 0x180   : > { %3454 = vmatprep.subr.mxu0 %v2468_v60 }
 0x181   : > { %3455 = vmatpush3.msra.mxu0 %v2468_v60  ;;  %v2368_v61 = vpop.permute.xlu0 %2367 }
 0x182   : > { %v2372_v63 = vsel %vm2369_vm15, %v4258_v59, %v2368_v61  ;;  %v2416_v3 = vpop.permute.xlu1 %2415  ;;  %v2020_v6 = vld [vmem:[#allocation3 + $0x10] sm:$0xff] }
 0x183   : > { %2378 = vst.msk [vmem:[#allocation3 + $0x118] sm:$0xff] %vm173_vm0, %v2372_v63  ;;  %v2423_v7 = vsel %vm2421_vm13, %v2416_v3, %v2418_v40  ;;  %3446 = vmatprep.subr.mxu1 %v2020_v6  ;;  %v723_v25 = vld [vmem:[#allocation2 + $0x58] sm:$0xff] }
 0x184   : > { %3447 = vmatpush3.msra.mxu1 %v2020_v6 }
 0x185   : > { %v2414_v8 = vpop.permute.xlu0 %2413  ;;  %2499 = vmatprep.subr.mxu1 %v2423_v7  ;;  %3449 = vmatmul.mubr.msk.f32.vlgmr.msra.gmra.mxu1 %vm353_vm1, %v3239_v37  ;;  %v720_v30 = vld [vmem:[#allocation2 + $0x40] sm:$0xff] }
 0x186   : > { %v2422_v10 = vsel %vm2421_vm13, %v2414_v8, %v2416_v3  ;;  %v2340_v1 = vpop.permute.xlu1 %2339  ;;  %v2465_v11 = vld [vmem:[#allocation3 + $0x130] sm:$0xff]  ;;  %3451 = vmatprep.mubr.msk.f32.mxu1 %vm353_vm1, %v3240_v42 }
 0x187   : > { %3456 = vmatprep.subr.mxu0 %v2465_v11  ;;  %2500 = vmatpush1.msra.mxu1 %v2422_v10 }
 0x188   : > { %3457 = vmatpush3.msra.mxu0 %v2465_v11 }
 0x189   : > { %v2342_v12 = vpop.permute.xlu0 %2341  ;;  %3452 = vmatmul.mubr.msk.f32.gmra.mxu1 %vm353_vm1, %v3241_v50 }
 0x18a   : > { %v2346_v14 = vsel %vm2343_vm5, %v2340_v1, %v2342_v12  ;;  %v2390_v5 = vpop.permute.xlu1 %2389  ;;  %v2462_v45 = vld [vmem:[#allocation3 + $0x118] sm:$0xff]  ;;  %2545 = vmatprep.mubr.f32.mxu1 %v3566_v4 }
 0x18b   : > { %2352 = vst.msk [vmem:[#allocation3 + $0x100] sm:$0xff] %vm173_vm0, %v2346_v14  ;;  %v2397_v15 = vsel %vm2395_vm14, %v2390_v5, %v2392_v36  ;;  %3458 = vmatprep.subr.mxu0 %v2462_v45 }
 0x18c   : > { %3459 = vmatpush3.msra.mxu0 %v2462_v45  ;;  %2501 = vmatprep.subr.mxu1 %v2397_v15  ;;  %v3251_v15 = vld [vmem:[%s4493_s1 + $0xa8] sm:$0xff] }
 0x18d   : > { %v2388_v17 = vpop.permute.xlu0 %2387  ;;  %v3390_v18 = vpop.f32.mrf.mxu0 }
 0x18e   : > { %v2396_v21 = vsel %vm2395_vm14, %v2388_v17, %v2390_v5  ;;  %v2314_v22 = vpop.permute.xlu1 %2313  ;;  %v941_v23 = vadd.f32 %v3390_v18, %v717_v16 }
 0x18f   : > { %2502 = vmatpush1.msra.mxu1 %v2396_v21  ;;  %v917_v24 = vpop.f32.mrf.mxu0 }
 0x190   : > { %953 = vst.msk [vmem:[#allocation2 + $0x28] sm:$0xff] %vm173_vm0, %v941_v23  ;;  %v938_v27 = vadd.f32 %v917_v24, %v714_v19  ;;  %v3253_v19 = vld [vmem:[%s4493_s1 + $0xb8] sm:$0xff] }
 0x191   : > { %v2316_v28 = vpop.permute.xlu0 %2315  ;;  %v3393_v29 = vpop.f32.mrf.mxu0 }
 0x192   : > { %v2320_v31 = vsel %vm2317_vm6, %v2314_v22, %v2316_v28  ;;  %v2364_v32 = vpop.permute.xlu1 %2363  ;;  %v2459_v33 = vld [vmem:[#allocation3 + $0x100] sm:$0xff]  ;;  %950 = vst.msk [vmem:[#allocation2 + $0x10] sm:$0xff] %vm173_vm0, %v938_v27  ;;  %v947_v34 = vadd.f32 %v3393_v29, %v723_v25 }
 0x193   : > { %2326 = vst.msk [vmem:[#allocation3 + $0xe8] sm:$0xff] %vm173_vm0, %v2320_v31  ;;  %v2371_v35 = vsel %vm2369_vm15, %v2364_v32, %v4258_v59  ;;  %3460 = vmatprep.subr.mxu0 %v2459_v33  ;;  %v927_v37 = vpop.f32.mrf.mxu0 }
 0x194   : > { %3461 = vmatpush3.msra.mxu0 %v2459_v33  ;;  %2503 = vmatprep.subr.mxu1 %v2371_v35  ;;  %959 = vst.msk [vmem:[#allocation2 + $0x58] sm:$0xff] %vm173_vm0, %v947_v34  ;;  %v944_v39 = vadd.f32 %v927_v37, %v720_v30 }
 0x195   : > { %v2362_v40 = vpop.permute.xlu0 %2361 }
 0x196   : > { %v2370_v41 = vsel %vm2369_vm15, %v2362_v40, %v2364_v32  ;;  %v2288_v42 = vpop.permute.xlu1 %2287  ;;  %956 = vst.msk [vmem:[#allocation2 + $0x40] sm:$0xff] %vm173_vm0, %v944_v39 }
 0x197   : > { %2504 = vmatpush1.msra.mxu1 %v2370_v41 }
 0x199   : > { %v2290_v43 = vpop.permute.xlu0 %2289  ;;  %v828_v0 = vpop.f32.mrf.mxu1 }
 0x19a   : > { %v2294_v49 = vsel %vm2291_vm7, %v2288_v42, %v2290_v43  ;;  %v2338_v46 = vpop.permute.xlu1 %2337  ;;  %v2456_v47 = vld [vmem:[#allocation3 + $0xe8] sm:$0xff]  ;;  %v4294_v2 = vadd.f32 %v828_v0, %v4212_v20 }
 0x19b   : > { %2300 = vst.msk [vmem:[#allocation3 + $0xd0] sm:$0xff] %vm173_vm0, %v2294_v49  ;;  %v2345_v36 = vsel %vm2343_vm5, %v2338_v46, %v2340_v1  ;;  %3462 = vmatprep.subr.mxu0 %v2456_v47  ;;  %v830_v48 = vpop.f32.mrf.mxu1 }
 0x19c   : > { %3463 = vmatpush3.msra.mxu0 %v2456_v47  ;;  %2505 = vmatprep.subr.mxu1 %v2345_v36  ;;  %v4299_v50 = vadd.f32 %v830_v48, %v4216_v26  ;;  %v3262_v48 = vld [vmem:[%s4493_s1 + $0xc0] sm:$0xff] }
 0x19d   : > { %v2336_v51 = vpop.permute.xlu0 %2335  ;;  %v834_v53 = vpop.f32.mrf.mxu1 }
 0x19e   : > { %v2344_v54 = vsel %vm2343_vm5, %v2336_v51, %v2338_v46  ;;  %v2262_v55 = vpop.permute.xlu1 %2261  ;;  %v4303_v56 = vadd.f32 %v834_v53, %v4228_v38 }
 0x19f   : > { %2506 = vmatpush1.msra.mxu1 %v2344_v54  ;;  %v836_v20 = vpop.f32.mrf.mxu1 }
 0x1a0   : > { %v4306_v58 = vadd.f32 %v836_v20, %v4239_v44 }
 0x1a1   : > { %v2264_v59 = vpop.permute.xlu0 %2263  ;;  %v840_v60 = vpop.f32.mrf.mxu1 }
 0x1a2   : > { %v2268_v61 = vsel %vm2265_vm8, %v2262_v55, %v2264_v59  ;;  %v2312_v26 = vpop.permute.xlu1 %2311  ;;  %v2453_v63 = vld [vmem:[#allocation3 + $0xd0] sm:$0xff]  ;;  %v4310_v3 = vadd.f32 %v840_v60, %v4255_v57 }
 0x1a3   : > { %2274 = vst.msk [vmem:[#allocation3 + $0xb8] sm:$0xff] %vm173_vm0, %v2268_v61  ;;  %v2319_v38 = vsel %vm2317_vm6, %v2312_v26, %v2314_v22  ;;  %3464 = vmatprep.subr.mxu0 %v2453_v63  ;;  %v842_v6 = vpop.f32.mrf.mxu1 }
 0x1a4   : > { %3465 = vmatpush3.msra.mxu0 %v2453_v63  ;;  %2507 = vmatprep.subr.mxu1 %v2319_v38  ;;  %v4315_v44 = vadd.f32 %v842_v6, %v4264_v62 }
 0x1a5   : > { %v2310_v7 = vpop.permute.xlu0 %2309  ;;  %v846_v8 = vpop.f32.mrf.mxu1 }
 0x1a6   : > { %v2318_v10 = vsel %vm2317_vm6, %v2310_v7, %v2312_v26  ;;  %v2286_v1 = vpop.permute.xlu1 %2285  ;;  %v4319_v11 = vadd.f32 %v846_v8, %v4271_v9  ;;  %v3252_v9 = vld [vmem:[%s4493_s1 + $0xb0] sm:$0xff] }
 0x1a7   : > { %v2293_v57 = vsel %vm2291_vm7, %v2286_v1, %v2288_v42  ;;  %2508 = vmatpush1.msra.mxu1 %v2318_v10  ;;  %v848_v12 = vpop.f32.mrf.mxu1 }
 0x1a8   : > { %2509 = vmatprep.subr.mxu1 %v2293_v57  ;;  %v4323_v14 = vadd.f32 %v848_v12, %v4276_v13 }
 0x1a9   : > { %v2811_v5 = vpop.permute.xlu0 %2810 }
 0x1aa   : > { %v2813_v62 = vpop.permute.xlu1 %2812  ;;  %v2450_v45 = vld [vmem:[#allocation3 + $0xb8] sm:$0xff] }
 0x1ab   : > { %v2816_v16 = vsel %vm2814_vm9, %v2811_v5, %v2813_v62  ;;  %2822 = vst.msk [vmem:[#allocation3 + $0xa0] sm:$0xff] %vm173_vm0, %v2813_v62  ;;  %3466 = vmatprep.subr.mxu0 %v2450_v45 }
 0x1ac   : > { %3467 = vmatpush3.msra.mxu0 %v2450_v45  ;;  %v1147_v45 = vld [vmem:[#allocation2 + $0x28] sm:$0xff] }
 0x1ad   : > { %v2284_v17 = vpop.permute.xlu0 %2283  ;;  %2891 = vmatprep.subr.mxu0 %v2816_v16  ;;  %3469 = vmatmul.mubr.msk.f32.vlgmr.msra.gmra.mxu0 %vm353_vm1, %v3251_v15  ;;  %v1144_v16 = vld [vmem:[#allocation2 + $0x10] sm:$0xff] }
 0x1ae   : > { %v2292_v13 = vsel %vm2291_vm7, %v2284_v17, %v2286_v1  ;;  %v2809_v18 = vpop.permute.xlu1 %2808  ;;  %3471 = vmatprep.mubr.msk.f32.mxu0 %vm353_vm1, %v3252_v9 }
 0x1af   : > { %v2815_v21 = vsel %vm2814_vm9, %v2809_v18, %v2811_v5  ;;  %2510 = vmatpush1.msra.mxu1 %v2292_v13 }
 0x1b0   : > { %2892 = vmatpush1.msra.mxu0 %v2815_v21 }
 0x1b1   : > { %v2260_v22 = vpop.permute.xlu0 %2259  ;;  %3472 = vmatmul.mubr.msk.f32.gmra.mxu0 %vm353_vm1, %v3253_v19 }
 0x1b2   : > { %v2267_v23 = vsel %vm2265_vm8, %v2260_v22, %v2262_v55  ;;  %v2790_v24 = vpop.permute.xlu1 %2789  ;;  %2937 = vmatprep.mubr.f32.mxu0 %v3566_v4  ;;  %v2860_v29 = vld [vmem:[#allocation3 + $0xa0] sm:$0xff] }
 0x1b3   : > { %2511 = vmatprep.subr.mxu1 %v2267_v23  ;;  %v3263_v23 = vld [vmem:[%s4493_s1 + $0xc8] sm:$0xff] }
 0x1b5   : > { %v2792_v25 = vpop.permute.xlu0 %2791 }
 0x1b6   : > { %v2795_v27 = vsel %vm2793_vm10, %v2790_v24, %v2792_v25  ;;  %2801 = vst.msk [vmem:[#allocation3 + $0x88] sm:$0xff] %vm173_vm0, %v2792_v25  ;;  %v2258_v28 = vpop.permute.xlu1 %2257  ;;  %v1150_v25 = vld [vmem:[#allocation2 + $0x40] sm:$0xff] }
 0x1b7   : > { %v2266_v30 = vsel %vm2265_vm8, %v2258_v28, %v2260_v22  ;;  %2893 = vmatprep.subr.mxu0 %v2795_v27  ;;  %v1153_v22 = vld [vmem:[#allocation2 + $0x58] sm:$0xff] }
 0x1b8   : > { %2512 = vmatpush1.msra.mxu1 %v2266_v30 }
 0x1b9   : > { %v2788_v31 = vpop.permute.xlu0 %2787  ;;  %3254 = vmatmul.mubr.msk.f32.vlgmr.msra.gmra.mxu1 %vm353_vm1, %v4251_v52  ;;  %3474 = vmatprep.subr.mxu1 %v2860_v29 }
 0x1ba   : > { %v2794_v32 = vsel %vm2793_vm10, %v2788_v31, %v2790_v24  ;;  %v2769_v33 = vpop.permute.xlu1 %2768  ;;  %3475 = vmatpush3.msra.mxu1 %v2860_v29  ;;  %2551 = vmatprep.mubr.f32.mxu1 %v3566_v4  ;;  %v3264_v31 = vld [vmem:[%s4493_s1 + $0xd0] sm:$0xff] }
 0x1bb   : > { %2894 = vmatpush1.msra.mxu0 %v2794_v32  ;;  %v3265_v32 = vld [vmem:[%s4493_s1 + $0xd8] sm:$0xff] }
 0x1bd   : > { %v2771_v34 = vpop.permute.xlu0 %2770  ;;  %v2857_v35 = vld [vmem:[#allocation3 + $0x88] sm:$0xff]  ;;  %3255 = vmatmul.mubr.msk.f32.gmra.mxu1 %vm353_vm1, %v3251_v15 }
 0x1be   : > { %v2774_v37 = vsel %vm2772_vm11, %v2769_v33, %v2771_v34  ;;  %2780 = vst.msk [vmem:[#allocation3 + $0x70] sm:$0xff] %vm173_vm0, %v2771_v34  ;;  %v2767_v39 = vpop.permute.xlu1 %2766  ;;  %3476 = vmatprep.subr.mxu1 %v2857_v35  ;;  %2557 = vmatprep.mubr.f32.mxu1 %v3566_v4 }
 0x1bf   : > { %v2773_v52 = vsel %vm2772_vm11, %v2767_v39, %v2769_v33  ;;  %3477 = vmatpush3.msra.mxu1 %v2857_v35  ;;  %2895 = vmatprep.subr.mxu0 %v2774_v37 }
 0x1c0   : > { %2896 = vmatpush1.msra.mxu0 %v2773_v52 }
 0x1c1   : > { %v2748_v40 = vpop.permute.xlu0 %2747  ;;  %3256 = vmatmul.mubr.msk.f32.gmra.mxu1 %vm353_vm1, %v3252_v9  ;;  %v1258_v41 = vpop.f32.mrf.mxu0 }
 0x1c2   : > { %v2750_v42 = vpop.permute.xlu1 %2749  ;;  %2563 = vmatprep.mubr.f32.mxu1 %v3566_v4  ;;  %v4354_v43 = vadd.f32 %v1258_v41, %v4294_v2 }
 0x1c3   : > { %v2753_v0 = vsel %vm2751_vm12, %v2748_v40, %v2750_v42  ;;  %2759 = vst.msk [vmem:[#allocation3 + $0x58] sm:$0xff] %vm173_vm0, %v2750_v42  ;;  %v1260_v49 = vpop.f32.mrf.mxu0 }
 0x1c4   : > { %2897 = vmatprep.subr.mxu0 %v2753_v0  ;;  %v4359_v46 = vadd.f32 %v1260_v49, %v4299_v50 }
 0x1c5   : > { %v2746_v47 = vpop.permute.xlu0 %2745  ;;  %v2854_v36 = vld [vmem:[#allocation3 + $0x70] sm:$0xff]  ;;  %3257 = vmatmul.mubr.msk.f32.gmra.mxu1 %vm353_vm1, %v3253_v19  ;;  %v1264_v51 = vpop.f32.mrf.mxu0 }
 0x1c6   : > { %v2752_v2 = vsel %vm2751_vm12, %v2746_v47, %v2748_v40  ;;  %v2728_v53 = vpop.permute.xlu1 %2727  ;;  %3478 = vmatprep.subr.mxu1 %v2854_v36  ;;  %3488 = vmatprep.mubr.msk.f32.mxu1 %vm353_vm1, %v3262_v48  ;;  %v4368_v54 = vadd.f32 %v1264_v51, %v4303_v56 }
 0x1c7   : > { %3479 = vmatpush3.msra.mxu1 %v2854_v36  ;;  %2898 = vmatpush1.msra.mxu0 %v2752_v2  ;;  %v1266_v50 = vpop.f32.mrf.mxu0 }
 0x1c8   : > { %v4371_v55 = vadd.f32 %v1266_v50, %v4306_v58 }
 0x1c9   : > { %v2730_v20 = vpop.permute.xlu0 %2729  ;;  %v1270_v59 = vpop.f32.mrf.mxu0 }
 0x1ca   : > { %v2732_v60 = vsel %vm307_vm2, %v2728_v53, %v2730_v20  ;;  %2738 = vst.msk [vmem:[#allocation3 + $0x40] sm:$0xff] %vm173_vm0, %v2730_v20  ;;  %v2726_v61 = vpop.permute.xlu1 %2725  ;;  %v2851_v26 = vld [vmem:[#allocation3 + $0x58] sm:$0xff]  ;;  %v4376_v63 = vadd.f32 %v1270_v59, %v4310_v3 }
 0x1cb   : > { %v2731_v56 = vsel %vm307_vm2, %v2726_v61, %v2728_v53  ;;  %3480 = vmatprep.subr.mxu1 %v2851_v26  ;;  %2899 = vmatprep.subr.mxu0 %v2732_v60  ;;  %v1272_v38 = vpop.f32.mrf.mxu0 }
 0x1cc   : > { %3481 = vmatpush3.msra.mxu1 %v2851_v26  ;;  %2900 = vmatpush1.msra.mxu0 %v2731_v56  ;;  %v4380_v58 = vadd.f32 %v1272_v38, %v4315_v44 }
 0x1cd   : > { %v2708_v6 = vpop.permute.xlu0 %2707  ;;  %v1276_v7 = vpop.f32.mrf.mxu0 }
 0x1ce   : > { %v2710_v8 = vpop.permute.xlu1 %2709  ;;  %v4383_v10 = vadd.f32 %v1276_v7, %v4319_v11 }
 0x1cf   : > { %v2712_v1 = vsel %vm286_vm3, %v2708_v6, %v2710_v8  ;;  %2718 = vst.msk [vmem:[#allocation3 + $0x28] sm:$0xff] %vm173_vm0, %v2710_v8  ;;  %v1278_v3 = vpop.f32.mrf.mxu0 }
 0x1d0   : > { %2901 = vmatprep.subr.mxu0 %v2712_v1  ;;  %v4388_v57 = vadd.f32 %v1278_v3, %v4323_v14 }
 0x1d1   : > { %v2706_v12 = vpop.permute.xlu0 %2705  ;;  %v2848_v5 = vld [vmem:[#allocation3 + $0x40] sm:$0xff] }
 0x1d2   : > { %v2711_v44 = vsel %vm286_vm3, %v2706_v12, %v2708_v6  ;;  %v2688_v62 = vpop.permute.xlu1 %2687  ;;  %3482 = vmatprep.subr.mxu1 %v2848_v5 }
 0x1d3   : > { %3483 = vmatpush3.msra.mxu1 %v2848_v5  ;;  %2902 = vmatpush1.msra.mxu0 %v2711_v44 }
 0x1d5   : > { %v2690_v11 = vpop.permute.xlu0 %2689  ;;  %v3410_v15 = vpop.f32.mrf.mxu1 }
 0x1d6   : > { %v2692_v9 = vsel %vm265_vm4, %v2688_v62, %v2690_v11  ;;  %2698 = vst.msk [vmem:[#allocation3 + $0x10] sm:$0xff] %vm173_vm0, %v2690_v11  ;;  %v2686_v17 = vpop.permute.xlu1 %2685  ;;  %v2845_v13 = vld [vmem:[#allocation3 + $0x28] sm:$0xff]  ;;  %v1371_v14 = vadd.f32 %v3410_v15, %v1147_v45 }
 0x1d7   : > { %v2691_v18 = vsel %vm265_vm4, %v2686_v17, %v2688_v62  ;;  %3484 = vmatprep.subr.mxu1 %v2845_v13  ;;  %2903 = vmatprep.subr.mxu0 %v2692_v9  ;;  %v1347_v19 = vpop.f32.mrf.mxu1 }
 0x1d8   : > { %3485 = vmatpush3.msra.mxu1 %v2845_v13  ;;  %2904 = vmatpush1.msra.mxu0 %v2691_v18  ;;  %1383 = vst.msk [vmem:[#allocation2 + $0x28] sm:$0xff] %vm173_vm0, %v1371_v14  ;;  %v1368_v21 = vadd.f32 %v1347_v19, %v1144_v16 }
 0x1d9   : > { %3266 = vmatmul.mubr.msk.f32.vlgmr.msra.gmra.mxu0 %vm353_vm1, %v3262_v48 }
 0x1da   : > { %2943 = vmatprep.mubr.f32.mxu0 %v3566_v4  ;;  %1380 = vst.msk [vmem:[#allocation2 + $0x10] sm:$0xff] %vm173_vm0, %v1368_v21  ;;  %v3413_v24 = vpop.f32.mrf.mxu1 }
 0x1db   : > { %v1377_v27 = vadd.f32 %v3413_v24, %v1153_v22 }
 0x1dc   : > { %v1357_v28 = vpop.f32.mrf.mxu1 }
 0x1dd   : > { %v2842_v29 = vld [vmem:[#allocation3 + $0x10] sm:$0xff]  ;;  %3267 = vmatmul.mubr.msk.f32.gmra.mxu0 %vm353_vm1, %v3263_v23  ;;  %1389 = vst.msk [vmem:[#allocation2 + $0x58] sm:$0xff] %vm173_vm0, %v1377_v27  ;;  %v1374_v30 = vadd.f32 %v1357_v28, %v1150_v25 }
 0x1de   : > { %3486 = vmatprep.subr.mxu1 %v2842_v29  ;;  %2949 = vmatprep.mubr.f32.mxu0 %v3566_v4 }
 0x1df   : > { %3487 = vmatpush3.msra.mxu1 %v2842_v29  ;;  %1386 = vst.msk [vmem:[#allocation2 + $0x40] sm:$0xff] %vm173_vm0, %v1374_v30  ;;  %v1576_v33 = vld [vmem:[#allocation2 + $0x28] sm:$0xff] }
 0x1e0   : > { %3489 = vmatmul.mubr.msk.f32.vlgmr.msra.gmra.mxu1 %vm353_vm1, %v3263_v23 }
 0x1e1   : > { %3491 = vmatprep.mubr.msk.f32.mxu1 %vm353_vm1, %v3264_v31  ;;  %3268 = vmatmul.mubr.msk.f32.gmra.mxu0 %vm353_vm1, %v3264_v31  ;;  %v1573_v35 = vld [vmem:[#allocation2 + $0x10] sm:$0xff] }
 0x1e2   : > { %2955 = vmatprep.mubr.f32.mxu0 %v3566_v4 }
 0x1e4   : > { %3492 = vmatmul.mubr.msk.f32.gmra.mxu1 %vm353_vm1, %v3265_v32  ;;  %v1582_v52 = vld [vmem:[#allocation2 + $0x58] sm:$0xff] }
 0x1e5   : > { %3269 = vmatmul.mubr.msk.f32.gmra.mxu0 %vm353_vm1, %v3265_v32 }
 0x1e6   : > { %v1579_v42 = vld [vmem:[#allocation2 + $0x40] sm:$0xff] }
 0x1fd   : > { %v3430_v34 = vpop.f32.mrf.mxu0 }
 0x1fe   : > { %v1800_v37 = vadd.f32 %v3430_v34, %v1576_v33 }
 0x1ff   : > { %v1776_v39 = vpop.f32.mrf.mxu0 }
 0x200   : > { %1812 = vst.msk [vmem:[#allocation2 + $0x28] sm:$0xff] %vm173_vm0, %v1800_v37  ;;  %v1797_v40 = vadd.f32 %v1776_v39, %v1573_v35 }
 0x201   : > { %v3433_v41 = vpop.f32.mrf.mxu0 }
 0x202   : > { %1809 = vst.msk [vmem:[#allocation2 + $0x10] sm:$0xff] %vm173_vm0, %v1797_v40  ;;  %v1806_v0 = vadd.f32 %v3433_v41, %v1582_v52  ;;  %v4452_v40 = vpop.permute.xlu0 %3089 }
 0x203   : > { %v1786_v49 = vpop.f32.mrf.mxu0 }
 0x204   : > { %1818 = vst.msk [vmem:[#allocation2 + $0x58] sm:$0xff] %vm173_vm0, %v1806_v0  ;;  %v1803_v4 = vadd.f32 %v1786_v49, %v1579_v42 }
 0x206   : > { %1815 = vst.msk [vmem:[#allocation2 + $0x40] sm:$0xff] %vm173_vm0, %v1803_v4 }
 0x207   : > { %v2006_v38 = vld [vmem:[#allocation2 + $0x28] sm:$0xff] }
 0x209   : > { %v1687_v47 = vpop.f32.mrf.mxu1 }
 0x20a   : > { %v1795_v36 = vadd.f32 %v1687_v47, %v4354_v43  ;;  %v3095_v47 = vpop.permute.xlu1 %3094 }
 0x20b   : > { %v1689_v48 = vpop.f32.mrf.mxu1  ;;  %v2012_v1 = vld [vmem:[#allocation2 + $0x58] sm:$0xff] }
 0x20c   : > { %v1796_v51 = vadd.f32 %v1689_v48, %v4359_v46 }
 0x20d   : > { %v1693_v2 = vpop.f32.mrf.mxu1 }
 0x20e   : > { %v4424_v53 = vadd.f32 %v1693_v2, %v4368_v54 }
 0x20f   : > { %v1695_v50 = vpop.f32.mrf.mxu1 }
 0x210   : > { %v4427_v20 = vadd.f32 %v1695_v50, %v4371_v55  ;;  %v2003_v55 = vld [vmem:[#allocation2 + $0x10] sm:$0xff] }
 0x211   : > { %v1699_v59 = vpop.f32.mrf.mxu1 }
 0x212   : > { %v4430_v60 = vadd.f32 %v1699_v59, %v4376_v63 }
 0x213   : > { %v1701_v61 = vpop.f32.mrf.mxu1 }
 0x214   : > { %v4433_v26 = vadd.f32 %v1701_v61, %v4380_v58  ;;  %v2009_v58 = vld [vmem:[#allocation2 + $0x40] sm:$0xff] }
 0x215   : > { %v1705_v43 = vpop.f32.mrf.mxu1 }
 0x216   : > { %v4436_v56 = vadd.f32 %v1705_v43, %v4383_v10 }
 0x217   : > { %v1707_v46 = vpop.f32.mrf.mxu1 }
 0x218   : > { %v4439_v54 = vadd.f32 %v1707_v46, %v4388_v57 }
 0x231   : > { %v2117_v57 = vpop.f32.mrf.mxu0 }
 0x232   : > { %v2225_v34 = vadd.f32 %v2117_v57, %v1795_v36 }
 0x233   : > { %v2119_v44 = vpop.f32.mrf.mxu0 }
 0x234   : > { %v2226_v37 = vadd.f32 %v2119_v44, %v1796_v51 }
 0x235   : > { %v2123_v62 = vpop.f32.mrf.mxu0 }
 0x236   : > { %v2228_v41 = vadd.f32 %v2123_v62, %v4424_v53 }
 0x237   : > { %v2125_v45 = vpop.f32.mrf.mxu0 }
 0x238   : > { %v2229_v36 = vadd.f32 %v2125_v45, %v4427_v20 }
 0x239   : > { %v2129_v11 = vpop.f32.mrf.mxu0 }
 0x23a   : > { %v2231_v53 = vadd.f32 %v2129_v11, %v4430_v60  ;;  %v3100_v60 = vpop.permute.xlu1 %3099 }
 0x23b   : > { %v2131_v15 = vpop.f32.mrf.mxu0 }
 0x23d   : > { %v2135_v16 = vpop.f32.mrf.mxu0 }
 0x23f   : > { %v4445_v9 = vpop.f32.mrf.mxu0 }
 0x240   : > { %v2235_v45 = vadd.f32 %v4445_v9, %v4439_v54 }
 0x245   : > { %v3450_v6 = vpop.f32.mrf.mxu1 }
 0x246   : > { %v2230_v7 = vadd.f32 %v3450_v6, %v2006_v38  ;;  %v2232_v6 = vadd.f32 %v2131_v15, %v4433_v26 }
 0x247   : > { %v2206_v8 = vpop.f32.mrf.mxu1 }
 0x248   : > { %2242 = vst.msk [vmem:[#allocation2 + $0x28] sm:$0xff] %vm173_vm0, %v2230_v7  ;;  %v2227_v63 = vadd.f32 %v2206_v8, %v2003_v55 }
 0x249   : > { %v3453_v3 = vpop.f32.mrf.mxu1 }
 0x24a   : > { %2239 = vst.msk [vmem:[#allocation2 + $0x10] sm:$0xff] %vm173_vm0, %v2227_v63  ;;  %v2236_v12 = vadd.f32 %v3453_v3, %v2012_v1 }
 0x24b   : > { %v2216_v10 = vpop.f32.mrf.mxu1 }
 0x24c   : > { %2248 = vst.msk [vmem:[#allocation2 + $0x58] sm:$0xff] %vm173_vm0, %v2236_v12  ;;  %v2233_v5 = vadd.f32 %v2216_v10, %v2009_v58  ;;  %v2234_v58 = vadd.f32 %v2135_v16, %v4436_v56 }
 0x24e   : > { %2245 = vst.msk [vmem:[#allocation2 + $0x40] sm:$0xff] %vm173_vm0, %v2233_v5 }
 0x24f   : > { %v2436_v17 = vld [vmem:[#allocation2 + $0x28] sm:$0xff] }
 0x251   : > { %v2433_v14 = vld [vmem:[#allocation2 + $0x10] sm:$0xff] }
 0x253   : > { %v2442_v21 = vld [vmem:[#allocation2 + $0x58] sm:$0xff] }
 0x255   : > { %v2439_v24 = vld [vmem:[#allocation2 + $0x40] sm:$0xff] }
 0x26d   : > { %v3470_v13 = vpop.f32.mrf.mxu0 }
 0x26e   : > { %v2660_v18 = vadd.f32 %v3470_v13, %v2436_v17 }
 0x26f   : > { %v2636_v19 = vpop.f32.mrf.mxu0 }
 0x270   : > { %2672 = vst.msk [vmem:[#allocation2 + $0x28] sm:$0xff] %vm173_vm0, %v2660_v18  ;;  %v2657_v22 = vadd.f32 %v2636_v19, %v2433_v14  ;;  %v3105_v18 = vpop.permute.xlu0 %3104 }
 0x271   : > { %v3473_v23 = vpop.f32.mrf.mxu0 }
 0x272   : > { %2669 = vst.msk [vmem:[#allocation2 + $0x10] sm:$0xff] %vm173_vm0, %v2657_v22  ;;  %v2666_v25 = vadd.f32 %v3473_v23, %v2442_v21 }
 0x273   : > { %v2646_v27 = vpop.f32.mrf.mxu0 }
 0x274   : > { %2678 = vst.msk [vmem:[#allocation2 + $0x58] sm:$0xff] %vm173_vm0, %v2666_v25  ;;  %v2663_v28 = vadd.f32 %v2646_v27, %v2439_v24 }
 0x276   : > { %2675 = vst.msk [vmem:[#allocation2 + $0x40] sm:$0xff] %vm173_vm0, %v2663_v28 }
 0x277   : > { %v2828_v20 = vld [vmem:[#allocation2 + $0x28] sm:$0xff] }
 0x279   : > { %v2547_v29 = vpop.f32.mrf.mxu1  ;;  %v2825_v10 = vld [vmem:[#allocation2 + $0x10] sm:$0xff] }
 0x27a   : > { %v2655_v39 = vadd.f32 %v2547_v29, %v2225_v34 }
 0x27b   : > { %v2549_v30 = vpop.f32.mrf.mxu1  ;;  %v2834_v15 = vld [vmem:[#allocation2 + $0x58] sm:$0xff] }
 0x27c   : > { %v2656_v42 = vadd.f32 %v2549_v30, %v2226_v37 }
 0x27d   : > { %v2553_v31 = vpop.f32.mrf.mxu1  ;;  %v2831_v21 = vld [vmem:[#allocation2 + $0x40] sm:$0xff] }
 0x27e   : > { %v2658_v48 = vadd.f32 %v2553_v31, %v2228_v41 }
 0x27f   : > { %v2555_v32 = vpop.f32.mrf.mxu1 }
 0x280   : > { %v2659_v59 = vadd.f32 %v2555_v32, %v2229_v36 }
 0x281   : > { %v2559_v33 = vpop.f32.mrf.mxu1 }
 0x282   : > { %v2661_v55 = vadd.f32 %v2559_v33, %v2231_v53 }
 0x283   : > { %v2561_v35 = vpop.f32.mrf.mxu1 }
 0x284   : > { %v2662_v12 = vadd.f32 %v2561_v35, %v2232_v6 }
 0x285   : > { %v2565_v0 = vpop.f32.mrf.mxu1 }
 0x286   : > { %v2664_v11 = vadd.f32 %v2565_v0, %v2234_v58 }
 0x287   : > { %v2567_v61 = vpop.f32.mrf.mxu1 }
 0x288   : > { %v2665_v19 = vadd.f32 %v2567_v61, %v2235_v45 }
 0x299   : > { %v2939_v52 = vpop.f32.mrf.mxu0 }
 0x29a   : > { %v3047_v49 = vadd.f32 %v2939_v52, %v2655_v39 }
 0x29b   : > { %v2941_v4 = vpop.f32.mrf.mxu0 }
 0x29c   : > { %v3048_v51 = vadd.f32 %v2941_v4, %v2656_v42  ;;  %v3107_v2 = vadd.f32 %v4452_v40, %v3047_v49 }
 0x29d   : > { %v2945_v50 = vpop.f32.mrf.mxu0 }
 0x29e   : > { %v3050_v43 = vadd.f32 %v2945_v50, %v2658_v48  ;;  %v3108_v46 = vadd.f32 %v4452_v40, %v3048_v51  ;;  %3119 = vst [vmem:[%s4458_s10] sm:$0xff] %v3107_v2 }
 0x29f   : > { %v2947_v38 = vpop.f32.mrf.mxu0 }
 0x2a0   : > { %v3490_v7 = vpop.f32.mrf.mxu1  ;;  %v3051_v8 = vadd.f32 %v2947_v38, %v2659_v59  ;;  %3120 = vst [vmem:[%s4458_s10 + $0x8] sm:$0xff] %v3108_v46  ;;  %v3110_v1 = vadd.f32 %v3095_v47, %v3050_v43 }
 0x2a1   : > { %v3052_v63 = vadd.f32 %v3490_v7, %v2828_v20  ;;  %v2951_v3 = vpop.f32.mrf.mxu0 }
 0x2a2   : > { %v3028_v5 = vpop.f32.mrf.mxu1  ;;  %v3053_v57 = vadd.f32 %v2951_v3, %v2661_v55  ;;  %v3111_v44 = vadd.f32 %v3095_v47, %v3051_v8  ;;  %3122 = vst [vmem:[%s4458_s10 + $0x18] sm:$0xff] %v3110_v1 }
 0x2a3   : > { %3064 = vst.msk [vmem:[#allocation2 + $0x28] sm:$0xff] %vm173_vm0, %v3052_v63  ;;  %v3049_v26 = vadd.f32 %v3028_v5, %v2825_v10  ;;  %v2953_v62 = vpop.f32.mrf.mxu0 }
 0x2a4   : > { %v3493_v17 = vpop.f32.mrf.mxu1  ;;  %3123 = vst [vmem:[%s4458_s10 + $0x20] sm:$0xff] %v3111_v44  ;;  %v3054_v13 = vadd.f32 %v2953_v62, %v2662_v12  ;;  %v3113_v56 = vadd.f32 %v3100_v60, %v3053_v57 }
 0x2a5   : > { %3061 = vst.msk [vmem:[#allocation2 + $0x10] sm:$0xff] %vm173_vm0, %v3049_v26  ;;  %v3058_v16 = vadd.f32 %v3493_v17, %v2834_v15  ;;  %v2957_v14 = vpop.f32.mrf.mxu0 }
 0x2a6   : > { %v3038_v22 = vpop.f32.mrf.mxu1  ;;  %v3056_v23 = vadd.f32 %v2957_v14, %v2664_v11  ;;  %v3114_v54 = vadd.f32 %v3100_v60, %v3054_v13  ;;  %3125 = vst [vmem:[%s4458_s10 + $0x30] sm:$0xff] %v3113_v56 }
 0x2a7   : > { %3070 = vst.msk [vmem:[#allocation2 + $0x58] sm:$0xff] %vm173_vm0, %v3058_v16  ;;  %v3055_v9 = vadd.f32 %v3038_v22, %v2831_v21  ;;  %v2959_v24 = vpop.f32.mrf.mxu0 }
 0x2a8   : > { %v3116_v25 = vadd.f32 %v3105_v18, %v3056_v23  ;;  %v3057_v27 = vadd.f32 %v2959_v24, %v2665_v19  ;;  %3126 = vst [vmem:[%s4458_s10 + $0x38] sm:$0xff] %v3114_v54 }
 0x2a9   : > { %3067 = vst.msk [vmem:[#allocation2 + $0x40] sm:$0xff] %vm173_vm0, %v3055_v9 }
 0x2aa   : > { %v3076_v28 = vld [vmem:[#allocation2 + $0x28] sm:$0xff]  ;;  %3128 = vst [vmem:[%s4458_s10 + $0x48] sm:$0xff] %v3116_v25  ;;  %v3117_v29 = vadd.f32 %v3105_v18, %v3057_v27 }
 0x2ab   : > { %v3112_v30 = vadd.f32 %v3095_v47, %v3076_v28 }
 0x2ac   : > { %v3073_v31 = vld [vmem:[#allocation2 + $0x10] sm:$0xff]  ;;  %3129 = vst [vmem:[%s4458_s10 + $0x50] sm:$0xff] %v3117_v29 }
 0x2ad   : > { %v3109_v32 = vadd.f32 %v4452_v40, %v3073_v31  ;;  %3124 = vst.msk [vmem:[%s4458_s10 + $0x28] sm:$0xff] %vm173_vm0, %v3112_v30 }
 0x2ae   : > { %v3082_v33 = vld [vmem:[#allocation2 + $0x58] sm:$0xff] }
 0x2af   : > { %3121 = vst.msk [vmem:[%s4458_s10 + $0x10] sm:$0xff] %vm173_vm0, %v3109_v32  ;;  %v3118_v34 = vadd.f32 %v3105_v18, %v3082_v33 }
 0x2b0   : > { %v3079_v35 = vld [vmem:[#allocation2 + $0x40] sm:$0xff] }
 0x2b1   : > { %3130 = vst.msk [vmem:[%s4458_s10 + $0x58] sm:$0xff] %vm173_vm0, %v3118_v34  ;;  %v3115_v37 = vadd.f32 %v3100_v60, %v3079_v35 }
 0x2b3   : > { %3127 = vst.msk [vmem:[%s4458_s10 + $0x40] sm:$0xff] %vm173_vm0, %v3115_v37 }
 0x2b4 PF: > { %s13_s12 = sadd.s32 1, %s3558_s12  }
 0x2b5   : > { %p10_p4 = scmp.ge.s32.totalorder %s13_s12, 4  }
 0x2b7   :  { %12 = sbr.rel (!%p10_p4) target bundleno = 1 (0x1), region = 69 }

</bundles_post_ra>
